<compile_context>
chip_gen: v6e
topology: v6e:2x2x1
jax: 0.10.0
libtpu: 0.0.40
codegen_flags: <defaults>
</compile_context>

<pallas_src>
import functools

import jax
import jax.numpy as jnp
from jax.experimental import pallas as pl
from jax.experimental.pallas import tpu as pltpu


# ----------------------------------------------------------------------------
# Fused decoder-layer kernel.
# grid = (N, KC): batch ("parallel") x BEV chunks ("arbitrary", innermost).
# ----------------------------------------------------------------------------
def _decoder_layer_kernel(
    q_ref, bev_ref, ref_ref,
    wqkv_ref, bqkv_ref, wo_ref, bo_ref,
    wv_ref, bv_ref, wol_ref, bol_ref, wdo_ref, bdo_ref,
    w1_ref, b1_ref, w2_ref, b2_ref, ln_ref,
    o_ref,
    out2_s, cat_s, acc_s, tapw_s, tapi_s,
    *, num_heads, num_points, offset_scale, bev_h, bev_w, hw_tile,
):
    Q, D = q_ref.shape[1], q_ref.shape[2]
    H, P = num_heads, num_points
    d = D // H
    HP = H * P
    TP = 4 * P                       # taps per head (4 bilinear corners x P points)
    kc = pl.program_id(1)
    bf16 = jnp.bfloat16

    def layer_norm(z, idx):
        g = ln_ref[2 * idx:2 * idx + 1, :]       # (1, D)
        b = ln_ref[2 * idx + 1:2 * idx + 2, :]   # (1, D)
        mu = jnp.mean(z, axis=-1, keepdims=True)
        var = jnp.mean(jnp.square(z - mu), axis=-1, keepdims=True)
        return (z - mu) * jax.lax.rsqrt(var + 1e-5) * g + b

    def softmax_last(s):
        m = jnp.max(s, axis=-1, keepdims=True)
        e = jnp.exp(s - m)
        return e * pl.reciprocal(jnp.sum(e, axis=-1, keepdims=True), approx=True)

    # ------------------------- prologue (first BEV chunk) --------------------
    @pl.when(kc == 0)
    def _prologue():
        x = q_ref[0]                                             # (Q, D) f32

        # fused QKV projection (bf16 MXU operands, f32 accumulation)
        qkv = jnp.dot(x.astype(bf16), wqkv_ref[...],
                      preferred_element_type=jnp.float32) + bqkv_ref[...]
        scale = 1.0 / float(d) ** 0.5
        for h in range(H):                       # static unrolled head loop
            qh = qkv[:, h * d:(h + 1) * d]
            kh = qkv[:, D + h * d:D + (h + 1) * d]
            vh = qkv[:, 2 * D + h * d:2 * D + (h + 1) * d]
            s = jax.lax.dot_general(
                qh.astype(bf16), kh.astype(bf16),
                (((1,), (1,)), ((), ())),
                preferred_element_type=jnp.float32) * scale
            p = softmax_last(s)
            # head result written straight into scratch slice (no concatenate)
            cat_s[:, h * d:(h + 1) * d] = jnp.dot(
                p.astype(bf16), vh.astype(bf16),
                preferred_element_type=jnp.float32)
        attn = jnp.dot(cat_s[...].astype(bf16), wo_ref[...],
                       preferred_element_type=jnp.float32) + bo_ref[...]
        out2 = layer_norm(x + attn, 0)
        out2_s[...] = out2

        # fused (off_x | off_y | attn-logit) projection
        ol = jnp.dot(out2.astype(bf16), wol_ref[...],
                     preferred_element_type=jnp.float32) + bol_ref[...]
        offx = ol[:, 0:HP]
        offy = ol[:, HP:2 * HP]
        logits = ol[:, 2 * HP:3 * HP]

        refp = ref_ref[0]                        # (Q, 2), un-normalized (x, y)
        rx = refp[:, 0:1]
        ry = refp[:, 1:2]

        # sampling-coordinate / bilinear-weight math vectorized over ALL H*P
        # points at once (single (Q, HP) pass, hoisted out of the head loop)
        sx = jnp.clip(rx + offx * offset_scale, 0.0, bev_w - 1.0)
        sy = jnp.clip(ry + offy * offset_scale, 0.0, bev_h - 1.0)
        x0 = jnp.floor(sx)
        y0 = jnp.floor(sy)
        x1 = jnp.minimum(x0 + 1.0, bev_w - 1.0)
        y1 = jnp.minimum(y0 + 1.0, bev_h - 1.0)
        wx = sx - x0
        wy = sy - y0
        x0i = x0.astype(jnp.int32)
        x1i = x1.astype(jnp.int32)
        y0i = y0.astype(jnp.int32)
        y1i = y1.astype(jnp.int32)
        taps = (
            (y0i * bev_w + x0i, (1.0 - wx) * (1.0 - wy)),
            (y0i * bev_w + x1i, wx * (1.0 - wy)),
            (y1i * bev_w + x0i, (1.0 - wx) * wy),
            (y1i * bev_w + x1i, wx * wy),
        )
        # per-head point softmax folded into the stored tap weights;
        # scratch layout is head-major: column = h*4P + tap*P + p
        for h in range(H):
            pw = softmax_last(logits[:, h * P:(h + 1) * P])     # (Q, P)
            for t, (lin_t, bw_t) in enumerate(taps):
                col = h * TP + t * P
                tapw_s[:, col:col + P] = pw * bw_t[:, h * P:(h + 1) * P]
                tapi_s[:, col:col + P] = lin_t[:, h * P:(h + 1) * P]
        acc_s[...] = jnp.zeros_like(acc_s)

    # ----------------- per-BEV-chunk value projection + sampling -------------
    # value projection of THIS chunk only (keeps VMEM bounded at large HW)
    val = jnp.dot(bev_ref[0], wv_ref[...],
                  preferred_element_type=jnp.float32) + bv_ref[...]   # (hw_tile, D)
    val_b = val.astype(bf16)
    base = kc * hw_tile
    iota = jax.lax.broadcasted_iota(jnp.int32, (Q, TP, hw_tile), 2) + base
    for h in range(H):                           # static unrolled head loop
        w_h = tapw_s[:, h * TP:(h + 1) * TP]                     # (Q, 4P)
        i_h = tapi_s[:, h * TP:(h + 1) * TP]                     # (Q, 4P)
        # one fused pass builds this head's chunk-local one-hot sampling matrix
        sel = iota == i_h[:, :, None]                            # (Q, 4P, hw_tile)
        mat = jnp.sum(jnp.where(sel, w_h[:, :, None], 0.0), axis=1)  # (Q, hw_tile)
        acc_s[:, h * d:(h + 1) * d] += jnp.dot(
            mat.astype(bf16), val_b[:, h * d:(h + 1) * d],
            preferred_element_type=jnp.float32)

    # ------------------------- epilogue (last BEV chunk) ---------------------
    @pl.when(kc == pl.num_programs(1) - 1)
    def _epilogue():
        out2 = out2_s[...]
        dout = jnp.dot(acc_s[...].astype(bf16), wdo_ref[...],
                       preferred_element_type=jnp.float32) + bdo_ref[...]
        out4 = layer_norm(out2 + dout, 1)
        hmid = jnp.maximum(
            jnp.dot(out4.astype(bf16), w1_ref[...],
                    preferred_element_type=jnp.float32) + b1_ref[...], 0.0)
        ffn = jnp.dot(hmid.astype(bf16), w2_ref[...],
                      preferred_element_type=jnp.float32) + b2_ref[...]
        o_ref[0] = layer_norm(out4 + ffn, 2)


def decoder_layer_forward(p, cfg, queries, bev_features, ref_points, *, bev_tile):
    N, Q, D = queries.shape
    Hb, Wb = cfg["bev_feature_shape"]
    HW = Hb * Wb
    H, P, F = cfg["num_heads"], cfg["num_ref_points"], cfg["dim_feedforward"]
    d = D // H
    assert HW % bev_tile == 0 and bev_tile % 8 == 0
    KC = HW // bev_tile

    kernel = functools.partial(
        _decoder_layer_kernel,
        num_heads=H, num_points=P, offset_scale=cfg["offset_scale"],
        bev_h=Hb, bev_w=Wb, hw_tile=bev_tile)

    weights = (p["wqkv"], p["bqkv"], p["wo"], p["bo"],
               p["wv"], p["bv"], p["wol"], p["bol"], p["wdo"], p["bdo"],
               p["w1"], p["b1"], p["w2"], p["b2"], p["ln"])

    def wspec(arr):
        nd = arr.ndim
        return pl.BlockSpec(tuple(arr.shape), lambda n, kc, _nd=nd: (0,) * _nd)

    # advisory cost hint so XLA can overlap the sequential per-layer launches
    flops = 2 * N * (Q * D * 3 * D + 2 * H * Q * Q * d + 2 * Q * D * D
                     + HW * D * D + Q * D * 3 * H * P
                     + H * Q * HW * d + 2 * Q * D * F)
    transcendentals = N * (H * Q * Q + H * Q * P)
    bytes_accessed = int(
        queries.size * queries.dtype.itemsize
        + bev_features.size * bev_features.dtype.itemsize
        + ref_points.size * ref_points.dtype.itemsize
        + sum(int(w.size) * w.dtype.itemsize for w in weights)
        + N * Q * D * 4)

    return pl.pallas_call(
        kernel,
        out_shape=jax.ShapeDtypeStruct((N, Q, D), jnp.float32),
        grid=(N, KC),
        in_specs=[pl.BlockSpec((1, Q, D), lambda n, kc: (n, 0, 0)),
                  pl.BlockSpec((1, bev_tile, D), lambda n, kc: (n, kc, 0)),
                  pl.BlockSpec((1, Q, 2), lambda n, kc: (n, 0, 0))]
                 + [wspec(w) for w in weights],
        out_specs=pl.BlockSpec((1, Q, D), lambda n, kc: (n, 0, 0)),
        scratch_shapes=[
            pltpu.VMEM((Q, D), jnp.float32),              # out2 (post AddNorm1)
            pltpu.VMEM((Q, D), jnp.float32),              # self-attn head concat
            pltpu.VMEM((Q, D), jnp.float32),              # deformable aggregation acc
            pltpu.VMEM((Q, 4 * H * P), jnp.float32),      # tap weights (softmax x bilinear)
            pltpu.VMEM((Q, 4 * H * P), jnp.int32),        # tap flat BEV indices
        ],
        compiler_params=pltpu.CompilerParams(
            dimension_semantics=("parallel", "arbitrary"),
            vmem_limit_bytes=48 * 1024 * 1024),
        cost_estimate=pl.CostEstimate(flops=flops,
                                      transcendentals=transcendentals,
                                      bytes_accessed=bytes_accessed),
    )(queries, bev_features, ref_points, *weights)


# ----------------------------------------------------------------------------
# Detection head: per the performance review a dedicated Pallas launch for a
# (D x num_classes+box) matmul is pure overhead (and the 11-wide output forces
# masked partial stores), so it is left to XLA as a single fused matmul over
# all stacked layer outputs.
# ----------------------------------------------------------------------------
def detection_head_forward(p, stacked, cfg):
    C = cfg["num_obj_classes"]
    y = jnp.einsum("lnqd,de->lnqe", stacked, p["w"]) + p["b"]
    # TODO(synk): DetectionHead source unavailable — sigmoid on class columns,
    #             raw box regression, box_dim = 8 when det_3d is an assumption.
    return jnp.concatenate([jax.nn.sigmoid(y[..., :C]), y[..., C:]], axis=-1)


# ----------------------------------------------------------------------------
# TrackFormer forward (plain-JAX glue only for query merge / ref-point grid /
# layer stacking / tiny det head — all heavy work runs in the Pallas kernel).
# ----------------------------------------------------------------------------
def generate_standard_ref_points(bev_shape, batch_size, n_sample):
    Hb, Wb = bev_shape
    idx = jnp.linspace(0.0, float(Hb * Wb - 1), n_sample)
    xs = jnp.mod(idx, float(Wb))
    ys = jnp.floor(idx / float(Wb))
    pts = jnp.stack([xs, ys], axis=-1).astype(jnp.float32)   # (n_sample, 2)
    return jnp.broadcast_to(pts[None], (batch_size, n_sample, 2))


def trackformer_forward(params, cfg, bev_features,
                        track_queries=None, track_queries_mask=None):
    assert bev_features.shape[-1] == cfg["embed_dim"]
    N = bev_features.shape[0]
    Hb, Wb = cfg["bev_feature_shape"]
    assert bev_features.shape[1] == Hb * Wb

    # bf16 BEV halves the dominant HBM->VMEM DMA traffic; cast once, reused by
    # every decoder layer.  All in-kernel VPU math stays f32.
    bev_bf16 = bev_features.astype(jnp.bfloat16)

    ref_points = generate_standard_ref_points((Hb, Wb), N, cfg["max_objs"])  # (N, Q, 2)

    det_q = jnp.broadcast_to(params["pos_emb"],
                             (N, cfg["max_objs"], cfg["embed_dim"]))
    if track_queries is not None:
        if track_queries_mask.ndim == 2:
            track_queries_mask = track_queries_mask[..., None]
        queries = jnp.where(track_queries_mask, track_queries, det_q)
    else:
        queries = det_q

    output = queries
    layer_outputs = []
    for lp in params["layers"]:
        output = decoder_layer_forward(lp, cfg, output + queries, bev_bf16,
                                       ref_points, bev_tile=cfg["bev_tile"])
        layer_outputs.append(output)

    stacked = jnp.stack(layer_outputs, axis=0)                 # (L, N, Q, D)
    layers_results = detection_head_forward(params["det_head"], stacked, cfg)
    detections = layers_results[-1]
    new_track_mask = detections[..., 0] >= cfg["track_threshold"]
    return output, detections, new_track_mask, layers_results


# ----------------------------------------------------------------------------
# Deterministic parameter initialization (weights pre-concatenated for fusion;
# MXU weights stored in bf16, biases / LayerNorm params in f32)
# ----------------------------------------------------------------------------
def _init_linear(key, din, dout, dtype=jnp.float32, scale=0.02):
    w = (jax.random.normal(key, (din, dout), jnp.float32) * scale).astype(dtype)
    b = jnp.zeros((1, dout), jnp.float32)
    return w, b


def init_params(key, cfg):
    D = cfg["embed_dim"]
    H = cfg["num_heads"]
    P = cfg["num_ref_points"]
    F = cfg["dim_feedforward"]
    HP = H * P
    box_dim = 8 if cfg["det_3d"] else 4   # TODO(synk): DetectionHead source unavailable
    bf16 = jnp.bfloat16

    keys = jax.random.split(key, 2 + cfg["num_layers"])
    params = {
        "pos_emb": jax.random.normal(keys[0], (1, cfg["max_objs"], D),
                                     jnp.float32) * 0.02,
    }

    ln = jnp.stack([jnp.ones((D,), jnp.float32),
                    jnp.zeros((D,), jnp.float32)] * 3, axis=0)   # (6, D)

    layers = []
    for li in range(cfg["num_layers"]):
        lk = jax.random.split(keys[2 + li], 8)
        wqkv, bqkv = _init_linear(lk[0], D, 3 * D, bf16)     # [Wq | Wk | Wv]
        wo, bo = _init_linear(lk[1], D, D, bf16)
        wv, bv = _init_linear(lk[2], D, D, bf16)
        wol, bol = _init_linear(lk[3], D, 3 * HP, bf16)      # [off_x | off_y | attn]
        wdo, bdo = _init_linear(lk[4], D, D, bf16)
        w1, b1 = _init_linear(lk[5], D, F, bf16)
        w2, b2 = _init_linear(lk[6], F, D, bf16)
        layers.append(dict(wqkv=wqkv, bqkv=bqkv, wo=wo, bo=bo, wv=wv, bv=bv,
                           wol=wol, bol=bol, wdo=wdo, bdo=bdo,
                           w1=w1, b1=b1, w2=w2, b2=b2, ln=ln))
    params["layers"] = layers

    wdet, bdet = _init_linear(keys[1], D, cfg["num_obj_classes"] + box_dim)  # f32 (XLA)
    params["det_head"] = {"w": wdet, "b": bdet}
    return params


# ----------------------------------------------------------------------------
if __name__ == "__main__":
    cfg = dict(
        num_heads=4,
        embed_dim=32,
        num_layers=2,
        num_obj_classes=3,
        num_ref_points=4,
        dim_feedforward=64,
        offset_scale=1.0,
        max_objs=16,
        bev_feature_shape=(16, 16),
        bev_tile=128,            # HW=256 -> 2 BEV chunks per batch element
        track_threshold=0.5,
        det_3d=True,
    )

    key = jax.random.PRNGKey(0)
    pkey, dkey = jax.random.split(key)
    params = init_params(pkey, cfg)

    N = 2
    Hb, Wb = cfg["bev_feature_shape"]
    bev_features = jax.random.normal(dkey, (N, Hb * Wb, cfg["embed_dim"]),
                                     jnp.float32)

    fwd = jax.jit(functools.partial(trackformer_forward, params, cfg))
    output, detections, track_mask, layers_results = fwd(bev_features)
    jax.block_until_ready((output, detections, track_mask, layers_results))

    assert output.shape == (N, cfg["max_objs"], cfg["embed_dim"])
    assert detections.shape[:2] == (N, cfg["max_objs"])
    assert track_mask.shape == (N, cfg["max_objs"])
    assert layers_results.shape[0] == cfg["num_layers"]
    print("KERNEL_OK")
</pallas_src>

<mosaic_0001>
module attributes {stable_mosaic.version = 11 : i64} {
  func.func @_decoder_layer_kernel(%arg0: i32, %arg1: i32, %arg2: memref<1x16x32xf32, #tpu.memory_space<vmem>>, %arg3: memref<1x128x32xbf16, #tpu.memory_space<vmem>>, %arg4: memref<1x16x2xf32, #tpu.memory_space<vmem>>, %arg5: memref<32x96xbf16, #tpu.memory_space<vmem>>, %arg6: memref<1x96xf32, #tpu.memory_space<vmem>>, %arg7: memref<32x32xbf16, #tpu.memory_space<vmem>>, %arg8: memref<1x32xf32, #tpu.memory_space<vmem>>, %arg9: memref<32x32xbf16, #tpu.memory_space<vmem>>, %arg10: memref<1x32xf32, #tpu.memory_space<vmem>>, %arg11: memref<32x48xbf16, #tpu.memory_space<vmem>>, %arg12: memref<1x48xf32, #tpu.memory_space<vmem>>, %arg13: memref<32x32xbf16, #tpu.memory_space<vmem>>, %arg14: memref<1x32xf32, #tpu.memory_space<vmem>>, %arg15: memref<32x64xbf16, #tpu.memory_space<vmem>>, %arg16: memref<1x64xf32, #tpu.memory_space<vmem>>, %arg17: memref<64x32xbf16, #tpu.memory_space<vmem>>, %arg18: memref<1x32xf32, #tpu.memory_space<vmem>>, %arg19: memref<6x32xf32, #tpu.memory_space<vmem>>, %arg20: memref<1x16x32xf32, #tpu.memory_space<vmem>>, %arg21: memref<16x32xf32, #tpu.memory_space<vmem>>, %arg22: memref<16x32xf32, #tpu.memory_space<vmem>>, %arg23: memref<16x32xf32, #tpu.memory_space<vmem>>, %arg24: memref<16x64xf32, #tpu.memory_space<vmem>>, %arg25: memref<16x64xi32, #tpu.memory_space<vmem>>) attributes {dimension_semantics = [#tpu.dimension_semantics<parallel>, #tpu.dimension_semantics<arbitrary>], iteration_bounds = array<i64: 2, 2>, scalar_prefetch = 0 : i64, scratch_operands = 5 : i64, tpu.core_type = #tpu.core_type<tc>, window_params = [{transform_indices = @transform_0, window_bounds = array<i64: 1, 16, 32>}, {transform_indices = @transform_1, window_bounds = array<i64: 1, 128, 32>}, {transform_indices = @transform_2, window_bounds = array<i64: 1, 16, 2>}, {pipeline_mode = #tpu.pipeline_mode<synchronous>, transform_indices = @transform_3, window_bounds = array<i64: 32, 96>}, {pipeline_mode = #tpu.pipeline_mode<synchronous>, transform_indices = @transform_4, window_bounds = array<i64: 1, 96>}, {pipeline_mode = #tpu.pipeline_mode<synchronous>, transform_indices = @transform_5, window_bounds = array<i64: 32, 32>}, {pipeline_mode = #tpu.pipeline_mode<synchronous>, transform_indices = @transform_6, window_bounds = array<i64: 1, 32>}, {pipeline_mode = #tpu.pipeline_mode<synchronous>, transform_indices = @transform_7, window_bounds = array<i64: 32, 32>}, {pipeline_mode = #tpu.pipeline_mode<synchronous>, transform_indices = @transform_8, window_bounds = array<i64: 1, 32>}, {pipeline_mode = #tpu.pipeline_mode<synchronous>, transform_indices = @transform_9, window_bounds = array<i64: 32, 48>}, {pipeline_mode = #tpu.pipeline_mode<synchronous>, transform_indices = @transform_10, window_bounds = array<i64: 1, 48>}, {pipeline_mode = #tpu.pipeline_mode<synchronous>, transform_indices = @transform_11, window_bounds = array<i64: 32, 32>}, {pipeline_mode = #tpu.pipeline_mode<synchronous>, transform_indices = @transform_12, window_bounds = array<i64: 1, 32>}, {pipeline_mode = #tpu.pipeline_mode<synchronous>, transform_indices = @transform_13, window_bounds = array<i64: 32, 64>}, {pipeline_mode = #tpu.pipeline_mode<synchronous>, transform_indices = @transform_14, window_bounds = array<i64: 1, 64>}, {pipeline_mode = #tpu.pipeline_mode<synchronous>, transform_indices = @transform_15, window_bounds = array<i64: 64, 32>}, {pipeline_mode = #tpu.pipeline_mode<synchronous>, transform_indices = @transform_16, window_bounds = array<i64: 1, 32>}, {pipeline_mode = #tpu.pipeline_mode<synchronous>, transform_indices = @transform_17, window_bounds = array<i64: 6, 32>}, {transform_indices = @transform_18, window_bounds = array<i64: 1, 16, 32>}]} {
    %c0_i32 = arith.constant 0 : i32
    %0 = arith.cmpi eq, %arg1, %c0_i32 : i32
    %1 = arith.extui %0 : i1 to i32
    %c0_i32_0 = arith.constant 0 : i32
    %2 = arith.cmpi ne, %1, %c0_i32_0 : i32
    scf.if %2 {
      %c0_47 = arith.constant 0 : index
      %c0_48 = arith.constant 0 : index
      %c0_49 = arith.constant 0 : index
      %86 = vector.load %arg2[%c0_47, %c0_48, %c0_49] : memref<1x16x32xf32, #tpu.memory_space<vmem>>, vector<1x16x32xf32>
      %87 = vector.shape_cast %86 : vector<1x16x32xf32> to vector<16x32xf32>
      %88 = arith.truncf %87 : vector<16x32xf32> to vector<16x32xbf16>
      %c0_50 = arith.constant 0 : index
      %c0_51 = arith.constant 0 : index
      %89 = vector.load %arg5[%c0_50, %c0_51] : memref<32x96xbf16, #tpu.memory_space<vmem>>, vector<32x96xbf16>
      %cst_52 = arith.constant dense<0.000000e+00> : vector<16x96xf32>
      %90 = tpu.matmul %88, %89, %cst_52 {dimension_numbers = #tpu.dot_dimension_numbers<[1], [0], [0], [1], [0, 0, 1, 1], [], []>} : vector<16x32xbf16>, vector<32x96xbf16>, vector<16x96xf32> -> vector<16x96xf32>
      %c0_53 = arith.constant 0 : index
      %c0_54 = arith.constant 0 : index
      %91 = vector.load %arg6[%c0_53, %c0_54] : memref<1x96xf32, #tpu.memory_space<vmem>>, vector<1x96xf32>
      %92 = vector.broadcast %91 : vector<1x96xf32> to vector<16x96xf32>
      %93 = arith.addf %90, %92 : vector<16x96xf32>
      %94 = vector.extract_strided_slice %93 {offsets = [0, 0], sizes = [16, 8], strides = [1, 1]} : vector<16x96xf32> to vector<16x8xf32>
      %95 = vector.extract_strided_slice %93 {offsets = [0, 32], sizes = [16, 8], strides = [1, 1]} : vector<16x96xf32> to vector<16x8xf32>
      %96 = vector.extract_strided_slice %93 {offsets = [0, 64], sizes = [16, 8], strides = [1, 1]} : vector<16x96xf32> to vector<16x8xf32>
      %97 = arith.truncf %94 : vector<16x8xf32> to vector<16x8xbf16>
      %98 = arith.truncf %95 : vector<16x8xf32> to vector<16x8xbf16>
      %cst_55 = arith.constant dense<0.000000e+00> : vector<16x16xf32>
      %99 = tpu.matmul %97, %98, %cst_55 {dimension_numbers = #tpu.dot_dimension_numbers<[1], [1], [0], [0], [0, 0, 1, 0], [], []>} : vector<16x8xbf16>, vector<16x8xbf16>, vector<16x16xf32> -> vector<16x16xf32>
      %cst_56 = arith.constant 0.353553385 : f32
      %100 = vector.broadcast %cst_56 : f32 to vector<16x16xf32>
      %101 = arith.mulf %99, %100 : vector<16x16xf32>
      %cst_57 = arith.constant dense<0xFF800000> : vector<16xf32>
      %102 = vector.multi_reduction <maximumf>, %101, %cst_57 [1] : vector<16x16xf32> to vector<16xf32>
      %103 = vector.shape_cast %102 : vector<16xf32> to vector<16x1xf32>
      %104 = vector.broadcast %103 : vector<16x1xf32> to vector<16x16xf32>
      %105 = arith.subf %101, %104 : vector<16x16xf32>
      %106 = math.exp %105 : vector<16x16xf32>
      %cst_58 = arith.constant dense<0.000000e+00> : vector<16xf32>
      %107 = vector.multi_reduction <add>, %106, %cst_58 [1] : vector<16x16xf32> to vector<16xf32>
      %108 = vector.shape_cast %107 : vector<16xf32> to vector<16x1xf32>
      %109 = tpu.reciprocal %108 {approx = true} : vector<16x1xf32> -> vector<16x1xf32>
      %110 = vector.broadcast %109 : vector<16x1xf32> to vector<16x16xf32>
      %111 = arith.mulf %106, %110 : vector<16x16xf32>
      %112 = arith.truncf %111 : vector<16x16xf32> to vector<16x16xbf16>
      %113 = arith.truncf %96 : vector<16x8xf32> to vector<16x8xbf16>
      %cst_59 = arith.constant dense<0.000000e+00> : vector<16x8xf32>
      %114 = tpu.matmul %112, %113, %cst_59 {dimension_numbers = #tpu.dot_dimension_numbers<[1], [0], [0], [1], [0, 0, 1, 1], [], []>} : vector<16x16xbf16>, vector<16x8xbf16>, vector<16x8xf32> -> vector<16x8xf32>
      %c0_60 = arith.constant 0 : index
      %c0_61 = arith.constant 0 : index
      %115 = vector.load %arg22[%c0_60, %c0_61] : memref<16x32xf32, #tpu.memory_space<vmem>>, vector<16x8xf32>
      tpu.vector_store %arg22[%c0_60, %c0_61], %114 {strides = array<i32>} : memref<16x32xf32, #tpu.memory_space<vmem>>, vector<16x8xf32>,
      %116 = vector.extract_strided_slice %93 {offsets = [0, 8], sizes = [16, 8], strides = [1, 1]} : vector<16x96xf32> to vector<16x8xf32>
      %117 = vector.extract_strided_slice %93 {offsets = [0, 40], sizes = [16, 8], strides = [1, 1]} : vector<16x96xf32> to vector<16x8xf32>
      %118 = vector.extract_strided_slice %93 {offsets = [0, 72], sizes = [16, 8], strides = [1, 1]} : vector<16x96xf32> to vector<16x8xf32>
      %119 = arith.truncf %116 : vector<16x8xf32> to vector<16x8xbf16>
      %120 = arith.truncf %117 : vector<16x8xf32> to vector<16x8xbf16>
      %cst_62 = arith.constant dense<0.000000e+00> : vector<16x16xf32>
      %121 = tpu.matmul %119, %120, %cst_62 {dimension_numbers = #tpu.dot_dimension_numbers<[1], [1], [0], [0], [0, 0, 1, 0], [], []>} : vector<16x8xbf16>, vector<16x8xbf16>, vector<16x16xf32> -> vector<16x16xf32>
      %cst_63 = arith.constant 0.353553385 : f32
      %122 = vector.broadcast %cst_63 : f32 to vector<16x16xf32>
      %123 = arith.mulf %121, %122 : vector<16x16xf32>
      %cst_64 = arith.constant dense<0xFF800000> : vector<16xf32>
      %124 = vector.multi_reduction <maximumf>, %123, %cst_64 [1] : vector<16x16xf32> to vector<16xf32>
      %125 = vector.shape_cast %124 : vector<16xf32> to vector<16x1xf32>
      %126 = vector.broadcast %125 : vector<16x1xf32> to vector<16x16xf32>
      %127 = arith.subf %123, %126 : vector<16x16xf32>
      %128 = math.exp %127 : vector<16x16xf32>
      %cst_65 = arith.constant dense<0.000000e+00> : vector<16xf32>
      %129 = vector.multi_reduction <add>, %128, %cst_65 [1] : vector<16x16xf32> to vector<16xf32>
      %130 = vector.shape_cast %129 : vector<16xf32> to vector<16x1xf32>
      %131 = tpu.reciprocal %130 {approx = true} : vector<16x1xf32> -> vector<16x1xf32>
      %132 = vector.broadcast %131 : vector<16x1xf32> to vector<16x16xf32>
      %133 = arith.mulf %128, %132 : vector<16x16xf32>
      %134 = arith.truncf %133 : vector<16x16xf32> to vector<16x16xbf16>
      %135 = arith.truncf %118 : vector<16x8xf32> to vector<16x8xbf16>
      %cst_66 = arith.constant dense<0.000000e+00> : vector<16x8xf32>
      %136 = tpu.matmul %134, %135, %cst_66 {dimension_numbers = #tpu.dot_dimension_numbers<[1], [0], [0], [1], [0, 0, 1, 1], [], []>} : vector<16x16xbf16>, vector<16x8xbf16>, vector<16x8xf32> -> vector<16x8xf32>
      %c0_67 = arith.constant 0 : index
      %c8_68 = arith.constant 8 : index
      %137 = vector.load %arg22[%c0_67, %c8_68] : memref<16x32xf32, #tpu.memory_space<vmem>>, vector<16x8xf32>
      tpu.vector_store %arg22[%c0_67, %c8_68], %136 {strides = array<i32>} : memref<16x32xf32, #tpu.memory_space<vmem>>, vector<16x8xf32>,
      %138 = vector.extract_strided_slice %93 {offsets = [0, 16], sizes = [16, 8], strides = [1, 1]} : vector<16x96xf32> to vector<16x8xf32>
      %139 = vector.extract_strided_slice %93 {offsets = [0, 48], sizes = [16, 8], strides = [1, 1]} : vector<16x96xf32> to vector<16x8xf32>
      %140 = vector.extract_strided_slice %93 {offsets = [0, 80], sizes = [16, 8], strides = [1, 1]} : vector<16x96xf32> to vector<16x8xf32>
      %141 = arith.truncf %138 : vector<16x8xf32> to vector<16x8xbf16>
      %142 = arith.truncf %139 : vector<16x8xf32> to vector<16x8xbf16>
      %cst_69 = arith.constant dense<0.000000e+00> : vector<16x16xf32>
      %143 = tpu.matmul %141, %142, %cst_69 {dimension_numbers = #tpu.dot_dimension_numbers<[1], [1], [0], [0], [0, 0, 1, 0], [], []>} : vector<16x8xbf16>, vector<16x8xbf16>, vector<16x16xf32> -> vector<16x16xf32>
      %cst_70 = arith.constant 0.353553385 : f32
      %144 = vector.broadcast %cst_70 : f32 to vector<16x16xf32>
      %145 = arith.mulf %143, %144 : vector<16x16xf32>
      %cst_71 = arith.constant dense<0xFF800000> : vector<16xf32>
      %146 = vector.multi_reduction <maximumf>, %145, %cst_71 [1] : vector<16x16xf32> to vector<16xf32>
      %147 = vector.shape_cast %146 : vector<16xf32> to vector<16x1xf32>
      %148 = vector.broadcast %147 : vector<16x1xf32> to vector<16x16xf32>
      %149 = arith.subf %145, %148 : vector<16x16xf32>
      %150 = math.exp %149 : vector<16x16xf32>
      %cst_72 = arith.constant dense<0.000000e+00> : vector<16xf32>
      %151 = vector.multi_reduction <add>, %150, %cst_72 [1] : vector<16x16xf32> to vector<16xf32>
      %152 = vector.shape_cast %151 : vector<16xf32> to vector<16x1xf32>
      %153 = tpu.reciprocal %152 {approx = true} : vector<16x1xf32> -> vector<16x1xf32>
      %154 = vector.broadcast %153 : vector<16x1xf32> to vector<16x16xf32>
      %155 = arith.mulf %150, %154 : vector<16x16xf32>
      %156 = arith.truncf %155 : vector<16x16xf32> to vector<16x16xbf16>
      %157 = arith.truncf %140 : vector<16x8xf32> to vector<16x8xbf16>
      %cst_73 = arith.constant dense<0.000000e+00> : vector<16x8xf32>
      %158 = tpu.matmul %156, %157, %cst_73 {dimension_numbers = #tpu.dot_dimension_numbers<[1], [0], [0], [1], [0, 0, 1, 1], [], []>} : vector<16x16xbf16>, vector<16x8xbf16>, vector<16x8xf32> -> vector<16x8xf32>
      %c0_74 = arith.constant 0 : index
      %c16_75 = arith.constant 16 : index
      %159 = vector.load %arg22[%c0_74, %c16_75] : memref<16x32xf32, #tpu.memory_space<vmem>>, vector<16x8xf32>
      tpu.vector_store %arg22[%c0_74, %c16_75], %158 {strides = array<i32>} : memref<16x32xf32, #tpu.memory_space<vmem>>, vector<16x8xf32>,
      %160 = vector.extract_strided_slice %93 {offsets = [0, 24], sizes = [16, 8], strides = [1, 1]} : vector<16x96xf32> to vector<16x8xf32>
      %161 = vector.extract_strided_slice %93 {offsets = [0, 56], sizes = [16, 8], strides = [1, 1]} : vector<16x96xf32> to vector<16x8xf32>
      %162 = vector.extract_strided_slice %93 {offsets = [0, 88], sizes = [16, 8], strides = [1, 1]} : vector<16x96xf32> to vector<16x8xf32>
      %163 = arith.truncf %160 : vector<16x8xf32> to vector<16x8xbf16>
      %164 = arith.truncf %161 : vector<16x8xf32> to vector<16x8xbf16>
      %cst_76 = arith.constant dense<0.000000e+00> : vector<16x16xf32>
      %165 = tpu.matmul %163, %164, %cst_76 {dimension_numbers = #tpu.dot_dimension_numbers<[1], [1], [0], [0], [0, 0, 1, 0], [], []>} : vector<16x8xbf16>, vector<16x8xbf16>, vector<16x16xf32> -> vector<16x16xf32>
      %cst_77 = arith.constant 0.353553385 : f32
      %166 = vector.broadcast %cst_77 : f32 to vector<16x16xf32>
      %167 = arith.mulf %165, %166 : vector<16x16xf32>
      %cst_78 = arith.constant dense<0xFF800000> : vector<16xf32>
      %168 = vector.multi_reduction <maximumf>, %167, %cst_78 [1] : vector<16x16xf32> to vector<16xf32>
      %169 = vector.shape_cast %168 : vector<16xf32> to vector<16x1xf32>
      %170 = vector.broadcast %169 : vector<16x1xf32> to vector<16x16xf32>
      %171 = arith.subf %167, %170 : vector<16x16xf32>
      %172 = math.exp %171 : vector<16x16xf32>
      %cst_79 = arith.constant dense<0.000000e+00> : vector<16xf32>
      %173 = vector.multi_reduction <add>, %172, %cst_79 [1] : vector<16x16xf32> to vector<16xf32>
      %174 = vector.shape_cast %173 : vector<16xf32> to vector<16x1xf32>
      %175 = tpu.reciprocal %174 {approx = true} : vector<16x1xf32> -> vector<16x1xf32>
      %176 = vector.broadcast %175 : vector<16x1xf32> to vector<16x16xf32>
      %177 = arith.mulf %172, %176 : vector<16x16xf32>
      %178 = arith.truncf %177 : vector<16x16xf32> to vector<16x16xbf16>
      %179 = arith.truncf %162 : vector<16x8xf32> to vector<16x8xbf16>
      %cst_80 = arith.constant dense<0.000000e+00> : vector<16x8xf32>
      %180 = tpu.matmul %178, %179, %cst_80 {dimension_numbers = #tpu.dot_dimension_numbers<[1], [0], [0], [1], [0, 0, 1, 1], [], []>} : vector<16x16xbf16>, vector<16x8xbf16>, vector<16x8xf32> -> vector<16x8xf32>
      %c0_81 = arith.constant 0 : index
      %c24_82 = arith.constant 24 : index
      %181 = vector.load %arg22[%c0_81, %c24_82] : memref<16x32xf32, #tpu.memory_space<vmem>>, vector<16x8xf32>
      tpu.vector_store %arg22[%c0_81, %c24_82], %180 {strides = array<i32>} : memref<16x32xf32, #tpu.memory_space<vmem>>, vector<16x8xf32>,
      %c0_83 = arith.constant 0 : index
      %c0_84 = arith.constant 0 : index
      %182 = vector.load %arg22[%c0_83, %c0_84] : memref<16x32xf32, #tpu.memory_space<vmem>>, vector<16x32xf32>
      %183 = arith.truncf %182 : vector<16x32xf32> to vector<16x32xbf16>
      %c0_85 = arith.constant 0 : index
      %c0_86 = arith.constant 0 : index
      %184 = vector.load %arg7[%c0_85, %c0_86] : memref<32x32xbf16, #tpu.memory_space<vmem>>, vector<32x32xbf16>
      %cst_87 = arith.constant dense<0.000000e+00> : vector<16x32xf32>
      %185 = tpu.matmul %183, %184, %cst_87 {dimension_numbers = #tpu.dot_dimension_numbers<[1], [0], [0], [1], [0, 0, 1, 1], [], []>} : vector<16x32xbf16>, vector<32x32xbf16>, vector<16x32xf32> -> vector<16x32xf32>
      %c0_88 = arith.constant 0 : index
      %c0_89 = arith.constant 0 : index
      %186 = vector.load %arg8[%c0_88, %c0_89] : memref<1x32xf32, #tpu.memory_space<vmem>>, vector<1x32xf32>
      %187 = vector.broadcast %186 : vector<1x32xf32> to vector<16x32xf32>
      %188 = arith.addf %185, %187 : vector<16x32xf32>
      %189 = arith.addf %87, %188 : vector<16x32xf32>
      %c0_90 = arith.constant 0 : index
      %c0_91 = arith.constant 0 : index
      %190 = vector.load %arg19[%c0_90, %c0_91] : memref<6x32xf32, #tpu.memory_space<vmem>>, vector<1x32xf32>
      %c1 = arith.constant 1 : index
      %c0_92 = arith.constant 0 : index
      %191 = vector.load %arg19[%c1, %c0_92] : memref<6x32xf32, #tpu.memory_space<vmem>>, vector<1x32xf32>
      %cst_93 = arith.constant dense<0.000000e+00> : vector<16xf32>
      %192 = vector.multi_reduction <add>, %189, %cst_93 [1] : vector<16x32xf32> to vector<16xf32>
      %193 = vector.shape_cast %192 : vector<16xf32> to vector<16x1xf32>
      %cst_94 = arith.constant 3.200000e+01 : f32
      %194 = vector.broadcast %cst_94 : f32 to vector<16x1xf32>
      %195 = arith.divf %193, %194 : vector<16x1xf32>
      %196 = vector.broadcast %195 : vector<16x1xf32> to vector<16x32xf32>
      %197 = arith.subf %189, %196 : vector<16x32xf32>
      %198 = arith.mulf %197, %197 : vector<16x32xf32>
      %cst_95 = arith.constant dense<0.000000e+00> : vector<16xf32>
      %199 = vector.multi_reduction <add>, %198, %cst_95 [1] : vector<16x32xf32> to vector<16xf32>
      %200 = vector.shape_cast %199 : vector<16xf32> to vector<16x1xf32>
      %cst_96 = arith.constant 3.200000e+01 : f32
      %201 = vector.broadcast %cst_96 : f32 to vector<16x1xf32>
      %202 = arith.divf %200, %201 : vector<16x1xf32>
      %203 = vector.broadcast %195 : vector<16x1xf32> to vector<16x32xf32>
      %204 = arith.subf %189, %203 : vector<16x32xf32>
      %cst_97 = arith.constant 9.99999974E-6 : f32
      %205 = vector.broadcast %cst_97 : f32 to vector<16x1xf32>
      %206 = arith.addf %202, %205 : vector<16x1xf32>
      %207 = math.rsqrt %206 : vector<16x1xf32>
      %208 = vector.broadcast %207 : vector<16x1xf32> to vector<16x32xf32>
      %209 = arith.mulf %204, %208 : vector<16x32xf32>
      %210 = vector.broadcast %190 : vector<1x32xf32> to vector<16x32xf32>
      %211 = arith.mulf %209, %210 : vector<16x32xf32>
      %212 = vector.broadcast %191 : vector<1x32xf32> to vector<16x32xf32>
      %213 = arith.addf %211, %212 : vector<16x32xf32>
      %c0_98 = arith.constant 0 : index
      %c0_99 = arith.constant 0 : index
      %214 = vector.load %arg21[%c0_98, %c0_99] : memref<16x32xf32, #tpu.memory_space<vmem>>, vector<16x32xf32>
      tpu.vector_store %arg21[%c0_98, %c0_99], %213 {strides = array<i32>} : memref<16x32xf32, #tpu.memory_space<vmem>>, vector<16x32xf32>,
      %215 = arith.truncf %213 : vector<16x32xf32> to vector<16x32xbf16>
      %c0_100 = arith.constant 0 : index
      %c0_101 = arith.constant 0 : index
      %216 = vector.load %arg11[%c0_100, %c0_101] : memref<32x48xbf16, #tpu.memory_space<vmem>>, vector<32x48xbf16>
      %cst_102 = arith.constant dense<0.000000e+00> : vector<16x48xf32>
      %217 = tpu.matmul %215, %216, %cst_102 {dimension_numbers = #tpu.dot_dimension_numbers<[1], [0], [0], [1], [0, 0, 1, 1], [], []>} : vector<16x32xbf16>, vector<32x48xbf16>, vector<16x48xf32> -> vector<16x48xf32>
      %c0_103 = arith.constant 0 : index
      %c0_104 = arith.constant 0 : index
      %218 = vector.load %arg12[%c0_103, %c0_104] : memref<1x48xf32, #tpu.memory_space<vmem>>, vector<1x48xf32>
      %219 = vector.broadcast %218 : vector<1x48xf32> to vector<16x48xf32>
      %220 = arith.addf %217, %219 : vector<16x48xf32>
      %221 = vector.extract_strided_slice %220 {offsets = [0, 0], sizes = [16, 16], strides = [1, 1]} : vector<16x48xf32> to vector<16x16xf32>
      %222 = vector.extract_strided_slice %220 {offsets = [0, 16], sizes = [16, 16], strides = [1, 1]} : vector<16x48xf32> to vector<16x16xf32>
      %223 = vector.extract_strided_slice %220 {offsets = [0, 32], sizes = [16, 16], strides = [1, 1]} : vector<16x48xf32> to vector<16x16xf32>
      %c0_105 = arith.constant 0 : index
      %c0_106 = arith.constant 0 : index
      %c0_107 = arith.constant 0 : index
      %224 = vector.load %arg4[%c0_105, %c0_106, %c0_107] : memref<1x16x2xf32, #tpu.memory_space<vmem>>, vector<1x16x2xf32>
      %225 = vector.shape_cast %224 : vector<1x16x2xf32> to vector<16x2xf32>
      %226 = vector.extract_strided_slice %225 {offsets = [0, 0], sizes = [16, 1], strides = [1, 1]} : vector<16x2xf32> to vector<16x1xf32>
      %227 = vector.extract_strided_slice %225 {offsets = [0, 1], sizes = [16, 1], strides = [1, 1]} : vector<16x2xf32> to vector<16x1xf32>
      %cst_108 = arith.constant 1.000000e+00 : f32
      %228 = vector.broadcast %cst_108 : f32 to vector<16x16xf32>
      %229 = arith.mulf %221, %228 : vector<16x16xf32>
      %230 = vector.broadcast %226 : vector<16x1xf32> to vector<16x16xf32>
      %231 = arith.addf %230, %229 : vector<16x16xf32>
      %cst_109 = arith.constant 0.000000e+00 : f32
      %cst_110 = arith.constant 1.500000e+01 : f32
      %232 = vector.broadcast %cst_109 : f32 to vector<16x16xf32>
      %233 = arith.maximumf %232, %231 : vector<16x16xf32>
      %234 = vector.broadcast %cst_110 : f32 to vector<16x16xf32>
      %235 = arith.minimumf %234, %233 : vector<16x16xf32>
      %cst_111 = arith.constant 1.000000e+00 : f32
      %236 = vector.broadcast %cst_111 : f32 to vector<16x16xf32>
      %237 = arith.mulf %222, %236 : vector<16x16xf32>
      %238 = vector.broadcast %227 : vector<16x1xf32> to vector<16x16xf32>
      %239 = arith.addf %238, %237 : vector<16x16xf32>
      %cst_112 = arith.constant 0.000000e+00 : f32
      %cst_113 = arith.constant 1.500000e+01 : f32
      %240 = vector.broadcast %cst_112 : f32 to vector<16x16xf32>
      %241 = arith.maximumf %240, %239 : vector<16x16xf32>
      %242 = vector.broadcast %cst_113 : f32 to vector<16x16xf32>
      %243 = arith.minimumf %242, %241 : vector<16x16xf32>
      %244 = math.floor %235 : vector<16x16xf32>
      %245 = math.floor %243 : vector<16x16xf32>
      %cst_114 = arith.constant 1.000000e+00 : f32
      %246 = vector.broadcast %cst_114 : f32 to vector<16x16xf32>
      %247 = arith.addf %244, %246 : vector<16x16xf32>
      %cst_115 = arith.constant 1.500000e+01 : f32
      %248 = vector.broadcast %cst_115 : f32 to vector<16x16xf32>
      %249 = arith.minimumf %247, %248 : vector<16x16xf32>
      %cst_116 = arith.constant 1.000000e+00 : f32
      %250 = vector.broadcast %cst_116 : f32 to vector<16x16xf32>
      %251 = arith.addf %245, %250 : vector<16x16xf32>
      %cst_117 = arith.constant 1.500000e+01 : f32
      %252 = vector.broadcast %cst_117 : f32 to vector<16x16xf32>
      %253 = arith.minimumf %251, %252 : vector<16x16xf32>
      %254 = arith.subf %235, %244 : vector<16x16xf32>
      %255 = arith.subf %243, %245 : vector<16x16xf32>
      %256 = arith.fptosi %244 : vector<16x16xf32> to vector<16x16xi32>
      %257 = arith.fptosi %249 : vector<16x16xf32> to vector<16x16xi32>
      %258 = arith.fptosi %245 : vector<16x16xf32> to vector<16x16xi32>
      %259 = arith.fptosi %253 : vector<16x16xf32> to vector<16x16xi32>
      %c16_i32 = arith.constant 16 : i32
      %260 = vector.broadcast %c16_i32 : i32 to vector<16x16xi32>
      %261 = arith.muli %258, %260 : vector<16x16xi32>
      %262 = arith.addi %261, %256 : vector<16x16xi32>
      %cst_118 = arith.constant 1.000000e+00 : f32
      %263 = vector.broadcast %cst_118 : f32 to vector<16x16xf32>
      %264 = arith.subf %263, %254 : vector<16x16xf32>
      %cst_119 = arith.constant 1.000000e+00 : f32
      %265 = vector.broadcast %cst_119 : f32 to vector<16x16xf32>
      %266 = arith.subf %265, %255 : vector<16x16xf32>
      %267 = arith.mulf %264, %266 : vector<16x16xf32>
      %c16_i32_120 = arith.constant 16 : i32
      %268 = vector.broadcast %c16_i32_120 : i32 to vector<16x16xi32>
      %269 = arith.muli %258, %268 : vector<16x16xi32>
      %270 = arith.addi %269, %257 : vector<16x16xi32>
      %cst_121 = arith.constant 1.000000e+00 : f32
      %271 = vector.broadcast %cst_121 : f32 to vector<16x16xf32>
      %272 = arith.subf %271, %255 : vector<16x16xf32>
      %273 = arith.mulf %254, %272 : vector<16x16xf32>
      %c16_i32_122 = arith.constant 16 : i32
      %274 = vector.broadcast %c16_i32_122 : i32 to vector<16x16xi32>
      %275 = arith.muli %259, %274 : vector<16x16xi32>
      %276 = arith.addi %275, %256 : vector<16x16xi32>
      %cst_123 = arith.constant 1.000000e+00 : f32
      %277 = vector.broadcast %cst_123 : f32 to vector<16x16xf32>
      %278 = arith.subf %277, %254 : vector<16x16xf32>
      %279 = arith.mulf %278, %255 : vector<16x16xf32>
      %c16_i32_124 = arith.constant 16 : i32
      %280 = vector.broadcast %c16_i32_124 : i32 to vector<16x16xi32>
      %281 = arith.muli %259, %280 : vector<16x16xi32>
      %282 = arith.addi %281, %257 : vector<16x16xi32>
      %283 = arith.mulf %254, %255 : vector<16x16xf32>
      %284 = vector.extract_strided_slice %223 {offsets = [0, 0], sizes = [16, 4], strides = [1, 1]} : vector<16x16xf32> to vector<16x4xf32>
      %cst_125 = arith.constant dense<0xFF800000> : vector<16xf32>
      %285 = vector.multi_reduction <maximumf>, %284, %cst_125 [1] : vector<16x4xf32> to vector<16xf32>
      %286 = vector.shape_cast %285 : vector<16xf32> to vector<16x1xf32>
      %287 = vector.broadcast %286 : vector<16x1xf32> to vector<16x4xf32>
      %288 = arith.subf %284, %287 : vector<16x4xf32>
      %289 = math.exp %288 : vector<16x4xf32>
      %cst_126 = arith.constant dense<0.000000e+00> : vector<16xf32>
      %290 = vector.multi_reduction <add>, %289, %cst_126 [1] : vector<16x4xf32> to vector<16xf32>
      %291 = vector.shape_cast %290 : vector<16xf32> to vector<16x1xf32>
      %292 = tpu.reciprocal %291 {approx = true} : vector<16x1xf32> -> vector<16x1xf32>
      %293 = vector.broadcast %292 : vector<16x1xf32> to vector<16x4xf32>
      %294 = arith.mulf %289, %293 : vector<16x4xf32>
      %295 = vector.extract_strided_slice %267 {offsets = [0, 0], sizes = [16, 4], strides = [1, 1]} : vector<16x16xf32> to vector<16x4xf32>
      %296 = arith.mulf %294, %295 : vector<16x4xf32>
      %c0_127 = arith.constant 0 : index
      %c0_128 = arith.constant 0 : index
      %297 = vector.load %arg24[%c0_127, %c0_128] : memref<16x64xf32, #tpu.memory_space<vmem>>, vector<16x4xf32>
      tpu.vector_store %arg24[%c0_127, %c0_128], %296 {strides = array<i32>} : memref<16x64xf32, #tpu.memory_space<vmem>>, vector<16x4xf32>,
      %298 = vector.extract_strided_slice %262 {offsets = [0, 0], sizes = [16, 4], strides = [1, 1]} : vector<16x16xi32> to vector<16x4xi32>
      %c0_129 = arith.constant 0 : index
      %c0_130 = arith.constant 0 : index
      %299 = vector.load %arg25[%c0_129, %c0_130] : memref<16x64xi32, #tpu.memory_space<vmem>>, vector<16x4xi32>
      tpu.vector_store %arg25[%c0_129, %c0_130], %298 {strides = array<i32>} : memref<16x64xi32, #tpu.memory_space<vmem>>, vector<16x4xi32>,
      %300 = vector.extract_strided_slice %273 {offsets = [0, 0], sizes = [16, 4], strides = [1, 1]} : vector<16x16xf32> to vector<16x4xf32>
      %301 = arith.mulf %294, %300 : vector<16x4xf32>
      %c0_131 = arith.constant 0 : index
      %c4 = arith.constant 4 : index
      %302 = vector.load %arg24[%c0_131, %c4] : memref<16x64xf32, #tpu.memory_space<vmem>>, vector<16x4xf32>
      tpu.vector_store %arg24[%c0_131, %c4], %301 {strides = array<i32>} : memref<16x64xf32, #tpu.memory_space<vmem>>, vector<16x4xf32>,
      %303 = vector.extract_strided_slice %270 {offsets = [0, 0], sizes = [16, 4], strides = [1, 1]} : vector<16x16xi32> to vector<16x4xi32>
      %c0_132 = arith.constant 0 : index
      %c4_133 = arith.constant 4 : index
      %304 = vector.load %arg25[%c0_132, %c4_133] : memref<16x64xi32, #tpu.memory_space<vmem>>, vector<16x4xi32>
      tpu.vector_store %arg25[%c0_132, %c4_133], %303 {strides = array<i32>} : memref<16x64xi32, #tpu.memory_space<vmem>>, vector<16x4xi32>,
      %305 = vector.extract_strided_slice %279 {offsets = [0, 0], sizes = [16, 4], strides = [1, 1]} : vector<16x16xf32> to vector<16x4xf32>
      %306 = arith.mulf %294, %305 : vector<16x4xf32>
      %c0_134 = arith.constant 0 : index
      %c8_135 = arith.constant 8 : index
      %307 = vector.load %arg24[%c0_134, %c8_135] : memref<16x64xf32, #tpu.memory_space<vmem>>, vector<16x4xf32>
      tpu.vector_store %arg24[%c0_134, %c8_135], %306 {strides = array<i32>} : memref<16x64xf32, #tpu.memory_space<vmem>>, vector<16x4xf32>,
      %308 = vector.extract_strided_slice %276 {offsets = [0, 0], sizes = [16, 4], strides = [1, 1]} : vector<16x16xi32> to vector<16x4xi32>
      %c0_136 = arith.constant 0 : index
      %c8_137 = arith.constant 8 : index
      %309 = vector.load %arg25[%c0_136, %c8_137] : memref<16x64xi32, #tpu.memory_space<vmem>>, vector<16x4xi32>
      tpu.vector_store %arg25[%c0_136, %c8_137], %308 {strides = array<i32>} : memref<16x64xi32, #tpu.memory_space<vmem>>, vector<16x4xi32>,
      %310 = vector.extract_strided_slice %283 {offsets = [0, 0], sizes = [16, 4], strides = [1, 1]} : vector<16x16xf32> to vector<16x4xf32>
      %311 = arith.mulf %294, %310 : vector<16x4xf32>
      %c0_138 = arith.constant 0 : index
      %c12 = arith.constant 12 : index
      %312 = vector.load %arg24[%c0_138, %c12] : memref<16x64xf32, #tpu.memory_space<vmem>>, vector<16x4xf32>
      tpu.vector_store %arg24[%c0_138, %c12], %311 {strides = array<i32>} : memref<16x64xf32, #tpu.memory_space<vmem>>, vector<16x4xf32>,
      %313 = vector.extract_strided_slice %282 {offsets = [0, 0], sizes = [16, 4], strides = [1, 1]} : vector<16x16xi32> to vector<16x4xi32>
      %c0_139 = arith.constant 0 : index
      %c12_140 = arith.constant 12 : index
      %314 = vector.load %arg25[%c0_139, %c12_140] : memref<16x64xi32, #tpu.memory_space<vmem>>, vector<16x4xi32>
      tpu.vector_store %arg25[%c0_139, %c12_140], %313 {strides = array<i32>} : memref<16x64xi32, #tpu.memory_space<vmem>>, vector<16x4xi32>,
      %315 = vector.extract_strided_slice %223 {offsets = [0, 4], sizes = [16, 4], strides = [1, 1]} : vector<16x16xf32> to vector<16x4xf32>
      %cst_141 = arith.constant dense<0xFF800000> : vector<16xf32>
      %316 = vector.multi_reduction <maximumf>, %315, %cst_141 [1] : vector<16x4xf32> to vector<16xf32>
      %317 = vector.shape_cast %316 : vector<16xf32> to vector<16x1xf32>
      %318 = vector.broadcast %317 : vector<16x1xf32> to vector<16x4xf32>
      %319 = arith.subf %315, %318 : vector<16x4xf32>
      %320 = math.exp %319 : vector<16x4xf32>
      %cst_142 = arith.constant dense<0.000000e+00> : vector<16xf32>
      %321 = vector.multi_reduction <add>, %320, %cst_142 [1] : vector<16x4xf32> to vector<16xf32>
      %322 = vector.shape_cast %321 : vector<16xf32> to vector<16x1xf32>
      %323 = tpu.reciprocal %322 {approx = true} : vector<16x1xf32> -> vector<16x1xf32>
      %324 = vector.broadcast %323 : vector<16x1xf32> to vector<16x4xf32>
      %325 = arith.mulf %320, %324 : vector<16x4xf32>
      %326 = vector.extract_strided_slice %267 {offsets = [0, 4], sizes = [16, 4], strides = [1, 1]} : vector<16x16xf32> to vector<16x4xf32>
      %327 = arith.mulf %325, %326 : vector<16x4xf32>
      %c0_143 = arith.constant 0 : index
      %c16_144 = arith.constant 16 : index
      %328 = vector.load %arg24[%c0_143, %c16_144] : memref<16x64xf32, #tpu.memory_space<vmem>>, vector<16x4xf32>
      tpu.vector_store %arg24[%c0_143, %c16_144], %327 {strides = array<i32>} : memref<16x64xf32, #tpu.memory_space<vmem>>, vector<16x4xf32>,
      %329 = vector.extract_strided_slice %262 {offsets = [0, 4], sizes = [16, 4], strides = [1, 1]} : vector<16x16xi32> to vector<16x4xi32>
      %c0_145 = arith.constant 0 : index
      %c16_146 = arith.constant 16 : index
      %330 = vector.load %arg25[%c0_145, %c16_146] : memref<16x64xi32, #tpu.memory_space<vmem>>, vector<16x4xi32>
      tpu.vector_store %arg25[%c0_145, %c16_146], %329 {strides = array<i32>} : memref<16x64xi32, #tpu.memory_space<vmem>>, vector<16x4xi32>,
      %331 = vector.extract_strided_slice %273 {offsets = [0, 4], sizes = [16, 4], strides = [1, 1]} : vector<16x16xf32> to vector<16x4xf32>
      %332 = arith.mulf %325, %331 : vector<16x4xf32>
      %c0_147 = arith.constant 0 : index
      %c20 = arith.constant 20 : index
      %333 = vector.load %arg24[%c0_147, %c20] : memref<16x64xf32, #tpu.memory_space<vmem>>, vector<16x4xf32>
      tpu.vector_store %arg24[%c0_147, %c20], %332 {strides = array<i32>} : memref<16x64xf32, #tpu.memory_space<vmem>>, vector<16x4xf32>,
      %334 = vector.extract_strided_slice %270 {offsets = [0, 4], sizes = [16, 4], strides = [1, 1]} : vector<16x16xi32> to vector<16x4xi32>
      %c0_148 = arith.constant 0 : index
      %c20_149 = arith.constant 20 : index
      %335 = vector.load %arg25[%c0_148, %c20_149] : memref<16x64xi32, #tpu.memory_space<vmem>>, vector<16x4xi32>
      tpu.vector_store %arg25[%c0_148, %c20_149], %334 {strides = array<i32>} : memref<16x64xi32, #tpu.memory_space<vmem>>, vector<16x4xi32>,
      %336 = vector.extract_strided_slice %279 {offsets = [0, 4], sizes = [16, 4], strides = [1, 1]} : vector<16x16xf32> to vector<16x4xf32>
      %337 = arith.mulf %325, %336 : vector<16x4xf32>
      %c0_150 = arith.constant 0 : index
      %c24_151 = arith.constant 24 : index
      %338 = vector.load %arg24[%c0_150, %c24_151] : memref<16x64xf32, #tpu.memory_space<vmem>>, vector<16x4xf32>
      tpu.vector_store %arg24[%c0_150, %c24_151], %337 {strides = array<i32>} : memref<16x64xf32, #tpu.memory_space<vmem>>, vector<16x4xf32>,
      %339 = vector.extract_strided_slice %276 {offsets = [0, 4], sizes = [16, 4], strides = [1, 1]} : vector<16x16xi32> to vector<16x4xi32>
      %c0_152 = arith.constant 0 : index
      %c24_153 = arith.constant 24 : index
      %340 = vector.load %arg25[%c0_152, %c24_153] : memref<16x64xi32, #tpu.memory_space<vmem>>, vector<16x4xi32>
      tpu.vector_store %arg25[%c0_152, %c24_153], %339 {strides = array<i32>} : memref<16x64xi32, #tpu.memory_space<vmem>>, vector<16x4xi32>,
      %341 = vector.extract_strided_slice %283 {offsets = [0, 4], sizes = [16, 4], strides = [1, 1]} : vector<16x16xf32> to vector<16x4xf32>
      %342 = arith.mulf %325, %341 : vector<16x4xf32>
      %c0_154 = arith.constant 0 : index
      %c28 = arith.constant 28 : index
      %343 = vector.load %arg24[%c0_154, %c28] : memref<16x64xf32, #tpu.memory_space<vmem>>, vector<16x4xf32>
      tpu.vector_store %arg24[%c0_154, %c28], %342 {strides = array<i32>} : memref<16x64xf32, #tpu.memory_space<vmem>>, vector<16x4xf32>,
      %344 = vector.extract_strided_slice %282 {offsets = [0, 4], sizes = [16, 4], strides = [1, 1]} : vector<16x16xi32> to vector<16x4xi32>
      %c0_155 = arith.constant 0 : index
      %c28_156 = arith.constant 28 : index
      %345 = vector.load %arg25[%c0_155, %c28_156] : memref<16x64xi32, #tpu.memory_space<vmem>>, vector<16x4xi32>
      tpu.vector_store %arg25[%c0_155, %c28_156], %344 {strides = array<i32>} : memref<16x64xi32, #tpu.memory_space<vmem>>, vector<16x4xi32>,
      %346 = vector.extract_strided_slice %223 {offsets = [0, 8], sizes = [16, 4], strides = [1, 1]} : vector<16x16xf32> to vector<16x4xf32>
      %cst_157 = arith.constant dense<0xFF800000> : vector<16xf32>
      %347 = vector.multi_reduction <maximumf>, %346, %cst_157 [1] : vector<16x4xf32> to vector<16xf32>
      %348 = vector.shape_cast %347 : vector<16xf32> to vector<16x1xf32>
      %349 = vector.broadcast %348 : vector<16x1xf32> to vector<16x4xf32>
      %350 = arith.subf %346, %349 : vector<16x4xf32>
      %351 = math.exp %350 : vector<16x4xf32>
      %cst_158 = arith.constant dense<0.000000e+00> : vector<16xf32>
      %352 = vector.multi_reduction <add>, %351, %cst_158 [1] : vector<16x4xf32> to vector<16xf32>
      %353 = vector.shape_cast %352 : vector<16xf32> to vector<16x1xf32>
      %354 = tpu.reciprocal %353 {approx = true} : vector<16x1xf32> -> vector<16x1xf32>
      %355 = vector.broadcast %354 : vector<16x1xf32> to vector<16x4xf32>
      %356 = arith.mulf %351, %355 : vector<16x4xf32>
      %357 = vector.extract_strided_slice %267 {offsets = [0, 8], sizes = [16, 4], strides = [1, 1]} : vector<16x16xf32> to vector<16x4xf32>
      %358 = arith.mulf %356, %357 : vector<16x4xf32>
      %c0_159 = arith.constant 0 : index
      %c32_160 = arith.constant 32 : index
      %359 = vector.load %arg24[%c0_159, %c32_160] : memref<16x64xf32, #tpu.memory_space<vmem>>, vector<16x4xf32>
      tpu.vector_store %arg24[%c0_159, %c32_160], %358 {strides = array<i32>} : memref<16x64xf32, #tpu.memory_space<vmem>>, vector<16x4xf32>,
      %360 = vector.extract_strided_slice %262 {offsets = [0, 8], sizes = [16, 4], strides = [1, 1]} : vector<16x16xi32> to vector<16x4xi32>
      %c0_161 = arith.constant 0 : index
      %c32_162 = arith.constant 32 : index
      %361 = vector.load %arg25[%c0_161, %c32_162] : memref<16x64xi32, #tpu.memory_space<vmem>>, vector<16x4xi32>
      tpu.vector_store %arg25[%c0_161, %c32_162], %360 {strides = array<i32>} : memref<16x64xi32, #tpu.memory_space<vmem>>, vector<16x4xi32>,
      %362 = vector.extract_strided_slice %273 {offsets = [0, 8], sizes = [16, 4], strides = [1, 1]} : vector<16x16xf32> to vector<16x4xf32>
      %363 = arith.mulf %356, %362 : vector<16x4xf32>
      %c0_163 = arith.constant 0 : index
      %c36 = arith.constant 36 : index
      %364 = vector.load %arg24[%c0_163, %c36] : memref<16x64xf32, #tpu.memory_space<vmem>>, vector<16x4xf32>
      tpu.vector_store %arg24[%c0_163, %c36], %363 {strides = array<i32>} : memref<16x64xf32, #tpu.memory_space<vmem>>, vector<16x4xf32>,
      %365 = vector.extract_strided_slice %270 {offsets = [0, 8], sizes = [16, 4], strides = [1, 1]} : vector<16x16xi32> to vector<16x4xi32>
      %c0_164 = arith.constant 0 : index
      %c36_165 = arith.constant 36 : index
      %366 = vector.load %arg25[%c0_164, %c36_165] : memref<16x64xi32, #tpu.memory_space<vmem>>, vector<16x4xi32>
      tpu.vector_store %arg25[%c0_164, %c36_165], %365 {strides = array<i32>} : memref<16x64xi32, #tpu.memory_space<vmem>>, vector<16x4xi32>,
      %367 = vector.extract_strided_slice %279 {offsets = [0, 8], sizes = [16, 4], strides = [1, 1]} : vector<16x16xf32> to vector<16x4xf32>
      %368 = arith.mulf %356, %367 : vector<16x4xf32>
      %c0_166 = arith.constant 0 : index
      %c40 = arith.constant 40 : index
      %369 = vector.load %arg24[%c0_166, %c40] : memref<16x64xf32, #tpu.memory_space<vmem>>, vector<16x4xf32>
      tpu.vector_store %arg24[%c0_166, %c40], %368 {strides = array<i32>} : memref<16x64xf32, #tpu.memory_space<vmem>>, vector<16x4xf32>,
      %370 = vector.extract_strided_slice %276 {offsets = [0, 8], sizes = [16, 4], strides = [1, 1]} : vector<16x16xi32> to vector<16x4xi32>
      %c0_167 = arith.constant 0 : index
      %c40_168 = arith.constant 40 : index
      %371 = vector.load %arg25[%c0_167, %c40_168] : memref<16x64xi32, #tpu.memory_space<vmem>>, vector<16x4xi32>
      tpu.vector_store %arg25[%c0_167, %c40_168], %370 {strides = array<i32>} : memref<16x64xi32, #tpu.memory_space<vmem>>, vector<16x4xi32>,
      %372 = vector.extract_strided_slice %283 {offsets = [0, 8], sizes = [16, 4], strides = [1, 1]} : vector<16x16xf32> to vector<16x4xf32>
      %373 = arith.mulf %356, %372 : vector<16x4xf32>
      %c0_169 = arith.constant 0 : index
      %c44 = arith.constant 44 : index
      %374 = vector.load %arg24[%c0_169, %c44] : memref<16x64xf32, #tpu.memory_space<vmem>>, vector<16x4xf32>
      tpu.vector_store %arg24[%c0_169, %c44], %373 {strides = array<i32>} : memref<16x64xf32, #tpu.memory_space<vmem>>, vector<16x4xf32>,
      %375 = vector.extract_strided_slice %282 {offsets = [0, 8], sizes = [16, 4], strides = [1, 1]} : vector<16x16xi32> to vector<16x4xi32>
      %c0_170 = arith.constant 0 : index
      %c44_171 = arith.constant 44 : index
      %376 = vector.load %arg25[%c0_170, %c44_171] : memref<16x64xi32, #tpu.memory_space<vmem>>, vector<16x4xi32>
      tpu.vector_store %arg25[%c0_170, %c44_171], %375 {strides = array<i32>} : memref<16x64xi32, #tpu.memory_space<vmem>>, vector<16x4xi32>,
      %377 = vector.extract_strided_slice %223 {offsets = [0, 12], sizes = [16, 4], strides = [1, 1]} : vector<16x16xf32> to vector<16x4xf32>
      %cst_172 = arith.constant dense<0xFF800000> : vector<16xf32>
      %378 = vector.multi_reduction <maximumf>, %377, %cst_172 [1] : vector<16x4xf32> to vector<16xf32>
      %379 = vector.shape_cast %378 : vector<16xf32> to vector<16x1xf32>
      %380 = vector.broadcast %379 : vector<16x1xf32> to vector<16x4xf32>
      %381 = arith.subf %377, %380 : vector<16x4xf32>
      %382 = math.exp %381 : vector<16x4xf32>
      %cst_173 = arith.constant dense<0.000000e+00> : vector<16xf32>
      %383 = vector.multi_reduction <add>, %382, %cst_173 [1] : vector<16x4xf32> to vector<16xf32>
      %384 = vector.shape_cast %383 : vector<16xf32> to vector<16x1xf32>
      %385 = tpu.reciprocal %384 {approx = true} : vector<16x1xf32> -> vector<16x1xf32>
      %386 = vector.broadcast %385 : vector<16x1xf32> to vector<16x4xf32>
      %387 = arith.mulf %382, %386 : vector<16x4xf32>
      %388 = vector.extract_strided_slice %267 {offsets = [0, 12], sizes = [16, 4], strides = [1, 1]} : vector<16x16xf32> to vector<16x4xf32>
      %389 = arith.mulf %387, %388 : vector<16x4xf32>
      %c0_174 = arith.constant 0 : index
      %c48_175 = arith.constant 48 : index
      %390 = vector.load %arg24[%c0_174, %c48_175] : memref<16x64xf32, #tpu.memory_space<vmem>>, vector<16x4xf32>
      tpu.vector_store %arg24[%c0_174, %c48_175], %389 {strides = array<i32>} : memref<16x64xf32, #tpu.memory_space<vmem>>, vector<16x4xf32>,
      %391 = vector.extract_strided_slice %262 {offsets = [0, 12], sizes = [16, 4], strides = [1, 1]} : vector<16x16xi32> to vector<16x4xi32>
      %c0_176 = arith.constant 0 : index
      %c48_177 = arith.constant 48 : index
      %392 = vector.load %arg25[%c0_176, %c48_177] : memref<16x64xi32, #tpu.memory_space<vmem>>, vector<16x4xi32>
      tpu.vector_store %arg25[%c0_176, %c48_177], %391 {strides = array<i32>} : memref<16x64xi32, #tpu.memory_space<vmem>>, vector<16x4xi32>,
      %393 = vector.extract_strided_slice %273 {offsets = [0, 12], sizes = [16, 4], strides = [1, 1]} : vector<16x16xf32> to vector<16x4xf32>
      %394 = arith.mulf %387, %393 : vector<16x4xf32>
      %c0_178 = arith.constant 0 : index
      %c52 = arith.constant 52 : index
      %395 = vector.load %arg24[%c0_178, %c52] : memref<16x64xf32, #tpu.memory_space<vmem>>, vector<16x4xf32>
      tpu.vector_store %arg24[%c0_178, %c52], %394 {strides = array<i32>} : memref<16x64xf32, #tpu.memory_space<vmem>>, vector<16x4xf32>,
      %396 = vector.extract_strided_slice %270 {offsets = [0, 12], sizes = [16, 4], strides = [1, 1]} : vector<16x16xi32> to vector<16x4xi32>
      %c0_179 = arith.constant 0 : index
      %c52_180 = arith.constant 52 : index
      %397 = vector.load %arg25[%c0_179, %c52_180] : memref<16x64xi32, #tpu.memory_space<vmem>>, vector<16x4xi32>
      tpu.vector_store %arg25[%c0_179, %c52_180], %396 {strides = array<i32>} : memref<16x64xi32, #tpu.memory_space<vmem>>, vector<16x4xi32>,
      %398 = vector.extract_strided_slice %279 {offsets = [0, 12], sizes = [16, 4], strides = [1, 1]} : vector<16x16xf32> to vector<16x4xf32>
      %399 = arith.mulf %387, %398 : vector<16x4xf32>
      %c0_181 = arith.constant 0 : index
      %c56 = arith.constant 56 : index
      %400 = vector.load %arg24[%c0_181, %c56] : memref<16x64xf32, #tpu.memory_space<vmem>>, vector<16x4xf32>
      tpu.vector_store %arg24[%c0_181, %c56], %399 {strides = array<i32>} : memref<16x64xf32, #tpu.memory_space<vmem>>, vector<16x4xf32>,
      %401 = vector.extract_strided_slice %276 {offsets = [0, 12], sizes = [16, 4], strides = [1, 1]} : vector<16x16xi32> to vector<16x4xi32>
      %c0_182 = arith.constant 0 : index
      %c56_183 = arith.constant 56 : index
      %402 = vector.load %arg25[%c0_182, %c56_183] : memref<16x64xi32, #tpu.memory_space<vmem>>, vector<16x4xi32>
      tpu.vector_store %arg25[%c0_182, %c56_183], %401 {strides = array<i32>} : memref<16x64xi32, #tpu.memory_space<vmem>>, vector<16x4xi32>,
      %403 = vector.extract_strided_slice %283 {offsets = [0, 12], sizes = [16, 4], strides = [1, 1]} : vector<16x16xf32> to vector<16x4xf32>
      %404 = arith.mulf %387, %403 : vector<16x4xf32>
      %c0_184 = arith.constant 0 : index
      %c60 = arith.constant 60 : index
      %405 = vector.load %arg24[%c0_184, %c60] : memref<16x64xf32, #tpu.memory_space<vmem>>, vector<16x4xf32>
      tpu.vector_store %arg24[%c0_184, %c60], %404 {strides = array<i32>} : memref<16x64xf32, #tpu.memory_space<vmem>>, vector<16x4xf32>,
      %406 = vector.extract_strided_slice %282 {offsets = [0, 12], sizes = [16, 4], strides = [1, 1]} : vector<16x16xi32> to vector<16x4xi32>
      %c0_185 = arith.constant 0 : index
      %c60_186 = arith.constant 60 : index
      %407 = vector.load %arg25[%c0_185, %c60_186] : memref<16x64xi32, #tpu.memory_space<vmem>>, vector<16x4xi32>
      tpu.vector_store %arg25[%c0_185, %c60_186], %406 {strides = array<i32>} : memref<16x64xi32, #tpu.memory_space<vmem>>, vector<16x4xi32>,
      %cst_187 = arith.constant 0.000000e+00 : f32
      %408 = vector.broadcast %cst_187 : f32 to vector<16x32xf32>
      %c0_188 = arith.constant 0 : index
      %c0_189 = arith.constant 0 : index
      %409 = vector.load %arg23[%c0_188, %c0_189] : memref<16x32xf32, #tpu.memory_space<vmem>>, vector<16x32xf32>
      tpu.vector_store %arg23[%c0_188, %c0_189], %408 {strides = array<i32>} : memref<16x32xf32, #tpu.memory_space<vmem>>, vector<16x32xf32>,
    } else {
    }
    %c0 = arith.constant 0 : index
    %c0_1 = arith.constant 0 : index
    %c0_2 = arith.constant 0 : index
    %3 = vector.load %arg3[%c0, %c0_1, %c0_2] : memref<1x128x32xbf16, #tpu.memory_space<vmem>>, vector<1x128x32xbf16>
    %4 = vector.shape_cast %3 : vector<1x128x32xbf16> to vector<128x32xbf16>
    %c0_3 = arith.constant 0 : index
    %c0_4 = arith.constant 0 : index
    %5 = vector.load %arg9[%c0_3, %c0_4] : memref<32x32xbf16, #tpu.memory_space<vmem>>, vector<32x32xbf16>
    %cst = arith.constant dense<0.000000e+00> : vector<128x32xf32>
    %6 = tpu.matmul %4, %5, %cst {dimension_numbers = #tpu.dot_dimension_numbers<[1], [0], [0], [1], [0, 0, 1, 1], [], []>} : vector<128x32xbf16>, vector<32x32xbf16>, vector<128x32xf32> -> vector<128x32xf32>
    %c0_5 = arith.constant 0 : index
    %c0_6 = arith.constant 0 : index
    %7 = vector.load %arg10[%c0_5, %c0_6] : memref<1x32xf32, #tpu.memory_space<vmem>>, vector<1x32xf32>
    %8 = vector.broadcast %7 : vector<1x32xf32> to vector<128x32xf32>
    %9 = arith.addf %6, %8 : vector<128x32xf32>
    %10 = arith.truncf %9 : vector<128x32xf32> to vector<128x32xbf16>
    %c128_i32 = arith.constant 128 : i32
    %11 = arith.muli %arg1, %c128_i32 : i32
    %12 = tpu.iota {dimensions = array<i32: 2>} : vector<16x16x128xi32>
    %13 = vector.broadcast %11 : i32 to vector<16x16x128xi32>
    %14 = arith.addi %12, %13 : vector<16x16x128xi32>
    %c0_7 = arith.constant 0 : index
    %c0_8 = arith.constant 0 : index
    %15 = vector.load %arg24[%c0_7, %c0_8] : memref<16x64xf32, #tpu.memory_space<vmem>>, vector<16x16xf32>
    %c0_9 = arith.constant 0 : index
    %c0_10 = arith.constant 0 : index
    %16 = vector.load %arg25[%c0_9, %c0_10] : memref<16x64xi32, #tpu.memory_space<vmem>>, vector<16x16xi32>
    %17 = vector.shape_cast %16 : vector<16x16xi32> to vector<16x16x1xi32>
    %18 = vector.broadcast %17 : vector<16x16x1xi32> to vector<16x16x128xi32>
    %19 = arith.cmpi eq, %14, %18 : vector<16x16x128xi32>
    %20 = vector.shape_cast %15 : vector<16x16xf32> to vector<16x16x1xf32>
    %cst_11 = arith.constant 0.000000e+00 : f32
    %21 = vector.shape_cast %20 : vector<16x16x1xf32> to vector<16x16x1xf32>
    %22 = vector.broadcast %21 : vector<16x16x1xf32> to vector<16x16x128xf32>
    %23 = vector.broadcast %cst_11 : f32 to vector<16x16x128xf32>
    %24 = arith.select %19, %22, %23 : vector<16x16x128xi1>, vector<16x16x128xf32>
    %cst_12 = arith.constant dense<0.000000e+00> : vector<16x128xf32>
    %25 = vector.multi_reduction <add>, %24, %cst_12 [1] : vector<16x16x128xf32> to vector<16x128xf32>
    %c0_13 = arith.constant 0 : index
    %c0_14 = arith.constant 0 : index
    %26 = vector.load %arg23[%c0_13, %c0_14] : memref<16x32xf32, #tpu.memory_space<vmem>>, vector<16x8xf32>
    %27 = arith.truncf %25 : vector<16x128xf32> to vector<16x128xbf16>
    %28 = vector.extract_strided_slice %10 {offsets = [0, 0], sizes = [128, 8], strides = [1, 1]} : vector<128x32xbf16> to vector<128x8xbf16>
    %cst_15 = arith.constant dense<0.000000e+00> : vector<16x8xf32>
    %29 = tpu.matmul %27, %28, %cst_15 {dimension_numbers = #tpu.dot_dimension_numbers<[1], [0], [0], [1], [0, 0, 1, 1], [], []>} : vector<16x128xbf16>, vector<128x8xbf16>, vector<16x8xf32> -> vector<16x8xf32>
    %30 = arith.addf %26, %29 : vector<16x8xf32>
    %c0_16 = arith.constant 0 : index
    %c0_17 = arith.constant 0 : index
    %31 = vector.load %arg23[%c0_16, %c0_17] : memref<16x32xf32, #tpu.memory_space<vmem>>, vector<16x8xf32>
    tpu.vector_store %arg23[%c0_16, %c0_17], %30 {strides = array<i32>} : memref<16x32xf32, #tpu.memory_space<vmem>>, vector<16x8xf32>,
    %c0_18 = arith.constant 0 : index
    %c16 = arith.constant 16 : index
    %32 = vector.load %arg24[%c0_18, %c16] : memref<16x64xf32, #tpu.memory_space<vmem>>, vector<16x16xf32>
    %c0_19 = arith.constant 0 : index
    %c16_20 = arith.constant 16 : index
    %33 = vector.load %arg25[%c0_19, %c16_20] : memref<16x64xi32, #tpu.memory_space<vmem>>, vector<16x16xi32>
    %34 = vector.shape_cast %33 : vector<16x16xi32> to vector<16x16x1xi32>
    %35 = vector.broadcast %34 : vector<16x16x1xi32> to vector<16x16x128xi32>
    %36 = arith.cmpi eq, %14, %35 : vector<16x16x128xi32>
    %37 = vector.shape_cast %32 : vector<16x16xf32> to vector<16x16x1xf32>
    %cst_21 = arith.constant 0.000000e+00 : f32
    %38 = vector.shape_cast %37 : vector<16x16x1xf32> to vector<16x16x1xf32>
    %39 = vector.broadcast %38 : vector<16x16x1xf32> to vector<16x16x128xf32>
    %40 = vector.broadcast %cst_21 : f32 to vector<16x16x128xf32>
    %41 = arith.select %36, %39, %40 : vector<16x16x128xi1>, vector<16x16x128xf32>
    %cst_22 = arith.constant dense<0.000000e+00> : vector<16x128xf32>
    %42 = vector.multi_reduction <add>, %41, %cst_22 [1] : vector<16x16x128xf32> to vector<16x128xf32>
    %c0_23 = arith.constant 0 : index
    %c8 = arith.constant 8 : index
    %43 = vector.load %arg23[%c0_23, %c8] : memref<16x32xf32, #tpu.memory_space<vmem>>, vector<16x8xf32>
    %44 = arith.truncf %42 : vector<16x128xf32> to vector<16x128xbf16>
    %45 = vector.extract_strided_slice %10 {offsets = [0, 8], sizes = [128, 8], strides = [1, 1]} : vector<128x32xbf16> to vector<128x8xbf16>
    %cst_24 = arith.constant dense<0.000000e+00> : vector<16x8xf32>
    %46 = tpu.matmul %44, %45, %cst_24 {dimension_numbers = #tpu.dot_dimension_numbers<[1], [0], [0], [1], [0, 0, 1, 1], [], []>} : vector<16x128xbf16>, vector<128x8xbf16>, vector<16x8xf32> -> vector<16x8xf32>
    %47 = arith.addf %43, %46 : vector<16x8xf32>
    %c0_25 = arith.constant 0 : index
    %c8_26 = arith.constant 8 : index
    %48 = vector.load %arg23[%c0_25, %c8_26] : memref<16x32xf32, #tpu.memory_space<vmem>>, vector<16x8xf32>
    tpu.vector_store %arg23[%c0_25, %c8_26], %47 {strides = array<i32>} : memref<16x32xf32, #tpu.memory_space<vmem>>, vector<16x8xf32>,
    %c0_27 = arith.constant 0 : index
    %c32 = arith.constant 32 : index
    %49 = vector.load %arg24[%c0_27, %c32] : memref<16x64xf32, #tpu.memory_space<vmem>>, vector<16x16xf32>
    %c0_28 = arith.constant 0 : index
    %c32_29 = arith.constant 32 : index
    %50 = vector.load %arg25[%c0_28, %c32_29] : memref<16x64xi32, #tpu.memory_space<vmem>>, vector<16x16xi32>
    %51 = vector.shape_cast %50 : vector<16x16xi32> to vector<16x16x1xi32>
    %52 = vector.broadcast %51 : vector<16x16x1xi32> to vector<16x16x128xi32>
    %53 = arith.cmpi eq, %14, %52 : vector<16x16x128xi32>
    %54 = vector.shape_cast %49 : vector<16x16xf32> to vector<16x16x1xf32>
    %cst_30 = arith.constant 0.000000e+00 : f32
    %55 = vector.shape_cast %54 : vector<16x16x1xf32> to vector<16x16x1xf32>
    %56 = vector.broadcast %55 : vector<16x16x1xf32> to vector<16x16x128xf32>
    %57 = vector.broadcast %cst_30 : f32 to vector<16x16x128xf32>
    %58 = arith.select %53, %56, %57 : vector<16x16x128xi1>, vector<16x16x128xf32>
    %cst_31 = arith.constant dense<0.000000e+00> : vector<16x128xf32>
    %59 = vector.multi_reduction <add>, %58, %cst_31 [1] : vector<16x16x128xf32> to vector<16x128xf32>
    %c0_32 = arith.constant 0 : index
    %c16_33 = arith.constant 16 : index
    %60 = vector.load %arg23[%c0_32, %c16_33] : memref<16x32xf32, #tpu.memory_space<vmem>>, vector<16x8xf32>
    %61 = arith.truncf %59 : vector<16x128xf32> to vector<16x128xbf16>
    %62 = vector.extract_strided_slice %10 {offsets = [0, 16], sizes = [128, 8], strides = [1, 1]} : vector<128x32xbf16> to vector<128x8xbf16>
    %cst_34 = arith.constant dense<0.000000e+00> : vector<16x8xf32>
    %63 = tpu.matmul %61, %62, %cst_34 {dimension_numbers = #tpu.dot_dimension_numbers<[1], [0], [0], [1], [0, 0, 1, 1], [], []>} : vector<16x128xbf16>, vector<128x8xbf16>, vector<16x8xf32> -> vector<16x8xf32>
    %64 = arith.addf %60, %63 : vector<16x8xf32>
    %c0_35 = arith.constant 0 : index
    %c16_36 = arith.constant 16 : index
    %65 = vector.load %arg23[%c0_35, %c16_36] : memref<16x32xf32, #tpu.memory_space<vmem>>, vector<16x8xf32>
    tpu.vector_store %arg23[%c0_35, %c16_36], %64 {strides = array<i32>} : memref<16x32xf32, #tpu.memory_space<vmem>>, vector<16x8xf32>,
    %c0_37 = arith.constant 0 : index
    %c48 = arith.constant 48 : index
    %66 = vector.load %arg24[%c0_37, %c48] : memref<16x64xf32, #tpu.memory_space<vmem>>, vector<16x16xf32>
    %c0_38 = arith.constant 0 : index
    %c48_39 = arith.constant 48 : index
    %67 = vector.load %arg25[%c0_38, %c48_39] : memref<16x64xi32, #tpu.memory_space<vmem>>, vector<16x16xi32>
    %68 = vector.shape_cast %67 : vector<16x16xi32> to vector<16x16x1xi32>
    %69 = vector.broadcast %68 : vector<16x16x1xi32> to vector<16x16x128xi32>
    %70 = arith.cmpi eq, %14, %69 : vector<16x16x128xi32>
    %71 = vector.shape_cast %66 : vector<16x16xf32> to vector<16x16x1xf32>
    %cst_40 = arith.constant 0.000000e+00 : f32
    %72 = vector.shape_cast %71 : vector<16x16x1xf32> to vector<16x16x1xf32>
    %73 = vector.broadcast %72 : vector<16x16x1xf32> to vector<16x16x128xf32>
    %74 = vector.broadcast %cst_40 : f32 to vector<16x16x128xf32>
    %75 = arith.select %70, %73, %74 : vector<16x16x128xi1>, vector<16x16x128xf32>
    %cst_41 = arith.constant dense<0.000000e+00> : vector<16x128xf32>
    %76 = vector.multi_reduction <add>, %75, %cst_41 [1] : vector<16x16x128xf32> to vector<16x128xf32>
    %c0_42 = arith.constant 0 : index
    %c24 = arith.constant 24 : index
    %77 = vector.load %arg23[%c0_42, %c24] : memref<16x32xf32, #tpu.memory_space<vmem>>, vector<16x8xf32>
    %78 = arith.truncf %76 : vector<16x128xf32> to vector<16x128xbf16>
    %79 = vector.extract_strided_slice %10 {offsets = [0, 24], sizes = [128, 8], strides = [1, 1]} : vector<128x32xbf16> to vector<128x8xbf16>
    %cst_43 = arith.constant dense<0.000000e+00> : vector<16x8xf32>
    %80 = tpu.matmul %78, %79, %cst_43 {dimension_numbers = #tpu.dot_dimension_numbers<[1], [0], [0], [1], [0, 0, 1, 1], [], []>} : vector<16x128xbf16>, vector<128x8xbf16>, vector<16x8xf32> -> vector<16x8xf32>
    %81 = arith.addf %77, %80 : vector<16x8xf32>
    %c0_44 = arith.constant 0 : index
    %c24_45 = arith.constant 24 : index
    %82 = vector.load %arg23[%c0_44, %c24_45] : memref<16x32xf32, #tpu.memory_space<vmem>>, vector<16x8xf32>
    tpu.vector_store %arg23[%c0_44, %c24_45], %81 {strides = array<i32>} : memref<16x32xf32, #tpu.memory_space<vmem>>, vector<16x8xf32>,
    %c1_i32 = arith.constant 1 : i32
    %83 = arith.cmpi eq, %arg1, %c1_i32 : i32
    %84 = arith.extui %83 : i1 to i32
    %c0_i32_46 = arith.constant 0 : i32
    %85 = arith.cmpi ne, %84, %c0_i32_46 : i32
    scf.if %85 {
      %c0_47 = arith.constant 0 : index
      %c0_48 = arith.constant 0 : index
      %86 = vector.load %arg21[%c0_47, %c0_48] : memref<16x32xf32, #tpu.memory_space<vmem>>, vector<16x32xf32>
      %c0_49 = arith.constant 0 : index
      %c0_50 = arith.constant 0 : index
      %87 = vector.load %arg23[%c0_49, %c0_50] : memref<16x32xf32, #tpu.memory_space<vmem>>, vector<16x32xf32>
      %88 = arith.truncf %87 : vector<16x32xf32> to vector<16x32xbf16>
      %c0_51 = arith.constant 0 : index
      %c0_52 = arith.constant 0 : index
      %89 = vector.load %arg13[%c0_51, %c0_52] : memref<32x32xbf16, #tpu.memory_space<vmem>>, vector<32x32xbf16>
      %cst_53 = arith.constant dense<0.000000e+00> : vector<16x32xf32>
      %90 = tpu.matmul %88, %89, %cst_53 {dimension_numbers = #tpu.dot_dimension_numbers<[1], [0], [0], [1], [0, 0, 1, 1], [], []>} : vector<16x32xbf16>, vector<32x32xbf16>, vector<16x32xf32> -> vector<16x32xf32>
      %c0_54 = arith.constant 0 : index
      %c0_55 = arith.constant 0 : index
      %91 = vector.load %arg14[%c0_54, %c0_55] : memref<1x32xf32, #tpu.memory_space<vmem>>, vector<1x32xf32>
      %92 = vector.broadcast %91 : vector<1x32xf32> to vector<16x32xf32>
      %93 = arith.addf %90, %92 : vector<16x32xf32>
      %94 = arith.addf %86, %93 : vector<16x32xf32>
      %c2 = arith.constant 2 : index
      %c0_56 = arith.constant 0 : index
      %95 = vector.load %arg19[%c2, %c0_56] : memref<6x32xf32, #tpu.memory_space<vmem>>, vector<1x32xf32>
      %c3 = arith.constant 3 : index
      %c0_57 = arith.constant 0 : index
      %96 = vector.load %arg19[%c3, %c0_57] : memref<6x32xf32, #tpu.memory_space<vmem>>, vector<1x32xf32>
      %cst_58 = arith.constant dense<0.000000e+00> : vector<16xf32>
      %97 = vector.multi_reduction <add>, %94, %cst_58 [1] : vector<16x32xf32> to vector<16xf32>
      %98 = vector.shape_cast %97 : vector<16xf32> to vector<16x1xf32>
      %cst_59 = arith.constant 3.200000e+01 : f32
      %99 = vector.broadcast %cst_59 : f32 to vector<16x1xf32>
      %100 = arith.divf %98, %99 : vector<16x1xf32>
      %101 = vector.broadcast %100 : vector<16x1xf32> to vector<16x32xf32>
      %102 = arith.subf %94, %101 : vector<16x32xf32>
      %103 = arith.mulf %102, %102 : vector<16x32xf32>
      %cst_60 = arith.constant dense<0.000000e+00> : vector<16xf32>
      %104 = vector.multi_reduction <add>, %103, %cst_60 [1] : vector<16x32xf32> to vector<16xf32>
      %105 = vector.shape_cast %104 : vector<16xf32> to vector<16x1xf32>
      %cst_61 = arith.constant 3.200000e+01 : f32
      %106 = vector.broadcast %cst_61 : f32 to vector<16x1xf32>
      %107 = arith.divf %105, %106 : vector<16x1xf32>
      %108 = vector.broadcast %100 : vector<16x1xf32> to vector<16x32xf32>
      %109 = arith.subf %94, %108 : vector<16x32xf32>
      %cst_62 = arith.constant 9.99999974E-6 : f32
      %110 = vector.broadcast %cst_62 : f32 to vector<16x1xf32>
      %111 = arith.addf %107, %110 : vector<16x1xf32>
      %112 = math.rsqrt %111 : vector<16x1xf32>
      %113 = vector.broadcast %112 : vector<16x1xf32> to vector<16x32xf32>
      %114 = arith.mulf %109, %113 : vector<16x32xf32>
      %115 = vector.broadcast %95 : vector<1x32xf32> to vector<16x32xf32>
      %116 = arith.mulf %114, %115 : vector<16x32xf32>
      %117 = vector.broadcast %96 : vector<1x32xf32> to vector<16x32xf32>
      %118 = arith.addf %116, %117 : vector<16x32xf32>
      %119 = arith.truncf %118 : vector<16x32xf32> to vector<16x32xbf16>
      %c0_63 = arith.constant 0 : index
      %c0_64 = arith.constant 0 : index
      %120 = vector.load %arg15[%c0_63, %c0_64] : memref<32x64xbf16, #tpu.memory_space<vmem>>, vector<32x64xbf16>
      %cst_65 = arith.constant dense<0.000000e+00> : vector<16x64xf32>
      %121 = tpu.matmul %119, %120, %cst_65 {dimension_numbers = #tpu.dot_dimension_numbers<[1], [0], [0], [1], [0, 0, 1, 1], [], []>} : vector<16x32xbf16>, vector<32x64xbf16>, vector<16x64xf32> -> vector<16x64xf32>
      %c0_66 = arith.constant 0 : index
      %c0_67 = arith.constant 0 : index
      %122 = vector.load %arg16[%c0_66, %c0_67] : memref<1x64xf32, #tpu.memory_space<vmem>>, vector<1x64xf32>
      %123 = vector.broadcast %122 : vector<1x64xf32> to vector<16x64xf32>
      %124 = arith.addf %121, %123 : vector<16x64xf32>
      %cst_68 = arith.constant 0.000000e+00 : f32
      %125 = vector.broadcast %cst_68 : f32 to vector<16x64xf32>
      %126 = arith.maximumf %124, %125 : vector<16x64xf32>
      %127 = arith.truncf %126 : vector<16x64xf32> to vector<16x64xbf16>
      %c0_69 = arith.constant 0 : index
      %c0_70 = arith.constant 0 : index
      %128 = vector.load %arg17[%c0_69, %c0_70] : memref<64x32xbf16, #tpu.memory_space<vmem>>, vector<64x32xbf16>
      %cst_71 = arith.constant dense<0.000000e+00> : vector<16x32xf32>
      %129 = tpu.matmul %127, %128, %cst_71 {dimension_numbers = #tpu.dot_dimension_numbers<[1], [0], [0], [1], [0, 0, 1, 1], [], []>} : vector<16x64xbf16>, vector<64x32xbf16>, vector<16x32xf32> -> vector<16x32xf32>
      %c0_72 = arith.constant 0 : index
      %c0_73 = arith.constant 0 : index
      %130 = vector.load %arg18[%c0_72, %c0_73] : memref<1x32xf32, #tpu.memory_space<vmem>>, vector<1x32xf32>
      %131 = vector.broadcast %130 : vector<1x32xf32> to vector<16x32xf32>
      %132 = arith.addf %129, %131 : vector<16x32xf32>
      %133 = arith.addf %118, %132 : vector<16x32xf32>
      %c4 = arith.constant 4 : index
      %c0_74 = arith.constant 0 : index
      %134 = vector.load %arg19[%c4, %c0_74] : memref<6x32xf32, #tpu.memory_space<vmem>>, vector<1x32xf32>
      %c5 = arith.constant 5 : index
      %c0_75 = arith.constant 0 : index
      %135 = vector.load %arg19[%c5, %c0_75] : memref<6x32xf32, #tpu.memory_space<vmem>>, vector<1x32xf32>
      %cst_76 = arith.constant dense<0.000000e+00> : vector<16xf32>
      %136 = vector.multi_reduction <add>, %133, %cst_76 [1] : vector<16x32xf32> to vector<16xf32>
      %137 = vector.shape_cast %136 : vector<16xf32> to vector<16x1xf32>
      %cst_77 = arith.constant 3.200000e+01 : f32
      %138 = vector.broadcast %cst_77 : f32 to vector<16x1xf32>
      %139 = arith.divf %137, %138 : vector<16x1xf32>
      %140 = vector.broadcast %139 : vector<16x1xf32> to vector<16x32xf32>
      %141 = arith.subf %133, %140 : vector<16x32xf32>
      %142 = arith.mulf %141, %141 : vector<16x32xf32>
      %cst_78 = arith.constant dense<0.000000e+00> : vector<16xf32>
      %143 = vector.multi_reduction <add>, %142, %cst_78 [1] : vector<16x32xf32> to vector<16xf32>
      %144 = vector.shape_cast %143 : vector<16xf32> to vector<16x1xf32>
      %cst_79 = arith.constant 3.200000e+01 : f32
      %145 = vector.broadcast %cst_79 : f32 to vector<16x1xf32>
      %146 = arith.divf %144, %145 : vector<16x1xf32>
      %147 = vector.broadcast %139 : vector<16x1xf32> to vector<16x32xf32>
      %148 = arith.subf %133, %147 : vector<16x32xf32>
      %cst_80 = arith.constant 9.99999974E-6 : f32
      %149 = vector.broadcast %cst_80 : f32 to vector<16x1xf32>
      %150 = arith.addf %146, %149 : vector<16x1xf32>
      %151 = math.rsqrt %150 : vector<16x1xf32>
      %152 = vector.broadcast %151 : vector<16x1xf32> to vector<16x32xf32>
      %153 = arith.mulf %148, %152 : vector<16x32xf32>
      %154 = vector.broadcast %134 : vector<1x32xf32> to vector<16x32xf32>
      %155 = arith.mulf %153, %154 : vector<16x32xf32>
      %156 = vector.broadcast %135 : vector<1x32xf32> to vector<16x32xf32>
      %157 = arith.addf %155, %156 : vector<16x32xf32>
      %c0_81 = arith.constant 0 : index
      %c0_82 = arith.constant 0 : index
      %c0_83 = arith.constant 0 : index
      %158 = vector.load %arg20[%c0_81, %c0_82, %c0_83] : memref<1x16x32xf32, #tpu.memory_space<vmem>>, vector<1x16x32xf32>
      %159 = vector.shape_cast %158 : vector<1x16x32xf32> to vector<16x32xf32>
      %160 = vector.shape_cast %157 : vector<16x32xf32> to vector<1x16x32xf32>
      tpu.vector_store %arg20[%c0_81, %c0_82, %c0_83], %160 {strides = array<i32>} : memref<1x16x32xf32, #tpu.memory_space<vmem>>, vector<1x16x32xf32>,
    } else {
    }
    return
  }
  func.func @transform_0(%arg0: i32, %arg1: i32) -> (i32, i32, i32) {
    %c0_i32 = arith.constant 0 : i32
    %c0_i32_0 = arith.constant 0 : i32
    %c0_i32_1 = arith.constant 0 : i32
    return %arg0, %c0_i32, %c0_i32_0 : i32, i32, i32
  }
  func.func @transform_1(%arg0: i32, %arg1: i32) -> (i32, i32, i32) {
    %c0_i32 = arith.constant 0 : i32
    %c0_i32_0 = arith.constant 0 : i32
    return %arg0, %arg1, %c0_i32 : i32, i32, i32
  }
  func.func @transform_2(%arg0: i32, %arg1: i32) -> (i32, i32, i32) {
    %c0_i32 = arith.constant 0 : i32
    %c0_i32_0 = arith.constant 0 : i32
    %c0_i32_1 = arith.constant 0 : i32
    return %arg0, %c0_i32, %c0_i32_0 : i32, i32, i32
  }
  func.func @transform_3(%arg0: i32, %arg1: i32) -> (i32, i32) {
    %c0_i32 = arith.constant 0 : i32
    %c0_i32_0 = arith.constant 0 : i32
    %c0_i32_1 = arith.constant 0 : i32
    return %c0_i32, %c0_i32_0 : i32, i32
  }
  func.func @transform_4(%arg0: i32, %arg1: i32) -> (i32, i32) {
    %c0_i32 = arith.constant 0 : i32
    %c0_i32_0 = arith.constant 0 : i32
    %c0_i32_1 = arith.constant 0 : i32
    return %c0_i32, %c0_i32_0 : i32, i32
  }
  func.func @transform_5(%arg0: i32, %arg1: i32) -> (i32, i32) {
    %c0_i32 = arith.constant 0 : i32
    %c0_i32_0 = arith.constant 0 : i32
    %c0_i32_1 = arith.constant 0 : i32
    return %c0_i32, %c0_i32_0 : i32, i32
  }
  func.func @transform_6(%arg0: i32, %arg1: i32) -> (i32, i32) {
    %c0_i32 = arith.constant 0 : i32
    %c0_i32_0 = arith.constant 0 : i32
    %c0_i32_1 = arith.constant 0 : i32
    return %c0_i32, %c0_i32_0 : i32, i32
  }
  func.func @transform_7(%arg0: i32, %arg1: i32) -> (i32, i32) {
    %c0_i32 = arith.constant 0 : i32
    %c0_i32_0 = arith.constant 0 : i32
    %c0_i32_1 = arith.constant 0 : i32
    return %c0_i32, %c0_i32_0 : i32, i32
  }
  func.func @transform_8(%arg0: i32, %arg1: i32) -> (i32, i32) {
    %c0_i32 = arith.constant 0 : i32
    %c0_i32_0 = arith.constant 0 : i32
    %c0_i32_1 = arith.constant 0 : i32
    return %c0_i32, %c0_i32_0 : i32, i32
  }
  func.func @transform_9(%arg0: i32, %arg1: i32) -> (i32, i32) {
    %c0_i32 = arith.constant 0 : i32
    %c0_i32_0 = arith.constant 0 : i32
    %c0_i32_1 = arith.constant 0 : i32
    return %c0_i32, %c0_i32_0 : i32, i32
  }
  func.func @transform_10(%arg0: i32, %arg1: i32) -> (i32, i32) {
    %c0_i32 = arith.constant 0 : i32
    %c0_i32_0 = arith.constant 0 : i32
    %c0_i32_1 = arith.constant 0 : i32
    return %c0_i32, %c0_i32_0 : i32, i32
  }
  func.func @transform_11(%arg0: i32, %arg1: i32) -> (i32, i32) {
    %c0_i32 = arith.constant 0 : i32
    %c0_i32_0 = arith.constant 0 : i32
    %c0_i32_1 = arith.constant 0 : i32
    return %c0_i32, %c0_i32_0 : i32, i32
  }
  func.func @transform_12(%arg0: i32, %arg1: i32) -> (i32, i32) {
    %c0_i32 = arith.constant 0 : i32
    %c0_i32_0 = arith.constant 0 : i32
    %c0_i32_1 = arith.constant 0 : i32
    return %c0_i32, %c0_i32_0 : i32, i32
  }
  func.func @transform_13(%arg0: i32, %arg1: i32) -> (i32, i32) {
    %c0_i32 = arith.constant 0 : i32
    %c0_i32_0 = arith.constant 0 : i32
    %c0_i32_1 = arith.constant 0 : i32
    return %c0_i32, %c0_i32_0 : i32, i32
  }
  func.func @transform_14(%arg0: i32, %arg1: i32) -> (i32, i32) {
    %c0_i32 = arith.constant 0 : i32
    %c0_i32_0 = arith.constant 0 : i32
    %c0_i32_1 = arith.constant 0 : i32
    return %c0_i32, %c0_i32_0 : i32, i32
  }
  func.func @transform_15(%arg0: i32, %arg1: i32) -> (i32, i32) {
    %c0_i32 = arith.constant 0 : i32
    %c0_i32_0 = arith.constant 0 : i32
    %c0_i32_1 = arith.constant 0 : i32
    return %c0_i32, %c0_i32_0 : i32, i32
  }
  func.func @transform_16(%arg0: i32, %arg1: i32) -> (i32, i32) {
    %c0_i32 = arith.constant 0 : i32
    %c0_i32_0 = arith.constant 0 : i32
    %c0_i32_1 = arith.constant 0 : i32
    return %c0_i32, %c0_i32_0 : i32, i32
  }
  func.func @transform_17(%arg0: i32, %arg1: i32) -> (i32, i32) {
    %c0_i32 = arith.constant 0 : i32
    %c0_i32_0 = arith.constant 0 : i32
    %c0_i32_1 = arith.constant 0 : i32
    return %c0_i32, %c0_i32_0 : i32, i32
  }
  func.func @transform_18(%arg0: i32, %arg1: i32) -> (i32, i32, i32) {
    %c0_i32 = arith.constant 0 : i32
    %c0_i32_0 = arith.constant 0 : i32
    %c0_i32_1 = arith.constant 0 : i32
    return %arg0, %c0_i32, %c0_i32_0 : i32, i32, i32
  }
}

</mosaic_0001>

<bundles_post_ra>
// kernel: trackformer_forward.2
= control target key start
LH: loop header
LB: loop body
LE: loop exit
PB: predicated region body
PF: predicated region fallthrough
CT: control target
= control target key end

     0   :  { %s6129_s27 = smov 0   ;;  %s6131_s28 = smov 0   ;;  %s8385_s0 = inlined_call_operand.vmem [shape: f32[2,16,32], index: 0, kind: input, shape index: {}]   ;;  %s8386_s1 = inlined_call_operand.vmem [shape: bf16[2,256,32], index: 1, kind: input, shape index: {}]   ;;  %s8387_s2 = inlined_call_operand.vmem [shape: f32[2,16,2], index: 2, kind: input, shape index: {}]   ;;  %s8388_s3 = inlined_call_operand.vmem [shape: bf16[32,96], index: 3, kind: input, shape index: {}]   ;;  %s8389_s4 = inlined_call_operand.vmem [shape: f32[1,96], index: 4, kind: input, shape index: {}]   ;;  %s8390_s5 = inlined_call_operand.vmem [shape: bf16[32,32], index: 5, kind: input, shape index: {}]   ;;  %s8391_s6 = inlined_call_operand.vmem [shape: f32[1,32], index: 6, kind: input, shape index: {}, may-alias: {6,8,12,16}]   ;;  %s8392_s7 = inlined_call_operand.vmem [shape: bf16[32,32], index: 7, kind: input, shape index: {}]   ;;  %s8393_s8 = inlined_call_operand.vmem [shape: f32[1,32], index: 8, kind: input, shape index: {}, may-alias: {6,8,12,16}]   ;;  %s8394_s9 = inlined_call_operand.vmem [shape: bf16[32,48], index: 9, kind: input, shape index: {}]   ;;  %s8395_s10 = inlined_call_operand.vmem [shape: f32[1,48], index: 10, kind: input, shape index: {}]   ;;  %s8396_s11 = inlined_call_operand.vmem [shape: bf16[32,32], index: 11, kind: input, shape index: {}]   ;;  %s8397_s12 = inlined_call_operand.vmem [shape: f32[1,32], index: 12, kind: input, shape index: {}, may-alias: {6,8,12,16}]   ;;  %s8398_s13 = inlined_call_operand.vmem [shape: bf16[32,64], index: 13, kind: input, shape index: {}]   ;;  %s8399_s14 = inlined_call_operand.vmem [shape: f32[1,64], index: 14, kind: input, shape index: {}]   ;;  %s8400_s15 = inlined_call_operand.vmem [shape: bf16[64,32], index: 15, kind: input, shape index: {}]   ;;  %s8401_s16 = inlined_call_operand.vmem [shape: f32[1,32], index: 16, kind: input, shape index: {}, may-alias: {6,8,12,16}]   ;;  %s8402_s17 = inlined_call_operand.vmem [shape: f32[6,32], index: 17, kind: input, shape index: {}]   ;;  %s8403_s18 = inlined_call_operand.vmem [shape: f32[2,16,32], index: 18, kind: output, shape index: {}]  }
   0x1   :  { %8519 = sst [smem:[#allocation70_spill]] %s8385_s0  ;;  %s6133_s29 = smov 0  }
   0x2   :  { %8520 = sst [smem:[#allocation71_spill]] %s8386_s1  ;;  %s6135_s30 = smov 0  }
   0x3   :  { %8521 = sst [smem:[#allocation72_spill]] %s8387_s2  ;;  %s6137_s0 = smov 0  }
   0x4   :  { %8522 = sst [smem:[#allocation73_spill]] %s8396_s11 }
   0x5   :  { %8523 = sst [smem:[#allocation74_spill]] %s8397_s12 }
   0x6   :  { %8524 = sst [smem:[#allocation75_spill]] %s8398_s13 }
   0x7   :  { %8525 = sst [smem:[#allocation76_spill]] %s8399_s14 }
   0x8   :  { %8526 = sst [smem:[#allocation77_spill]] %s8400_s15 }
   0x9   :  { %8527 = sst [smem:[#allocation78_spill]] %s8401_s16 }
   0xa LB: > { %8528 = sst [smem:[#allocation7_spill]] %s5985_s29  ;;  %s37_s19 = sadd.s32 1, %s5985_s29  ;;  %s5993_s0 = sphi %s6137_s0, %s28_s0   ;;  %s5989_s30 = sphi %s6135_s30, %s8763_s30   ;;  %s5985_s29 = sphi %s6133_s29, %s8762_s29   ;;  %s5981_s28 = sphi %s6131_s28, %s8761_s28   ;;  %s5977_s27 = sphi %s6129_s27, %s8760_s27  }
   0xb   : > { %8529 = sst [smem:[#allocation8_spill]] %s5989_s30  ;;  %s40_s1 = sadd.s32 1, %s5989_s30 }
   0xc   : > { %8530 = sst [smem:[#allocation9_spill]] %s5993_s0  ;;  %p38_p0 = scmp.ge.s32.totalorder %s37_s19, 2 }
   0xd   : > { %p5397_p1 = scmp.ge.s32.totalorder %s5993_s0, 1  ;;  %p551_p2 = scmp.lt.s32.totalorder %s5993_s0, 5 }
   0xe   : > { %s8765_s19 = smov (%p38_p0, %s37_s19), 0  ;;  %s8767_s1 = smov (!%p38_p0, %s40_s1), %s5989_s30 }
   0xf   : > { %8531 = sst [smem:[#allocation10_spill]] %s8765_s19  ;;  %p552_p3 = pnand %p5397_p1, %p551_p2 }
  0x10   : > { %p42_p4 = scmp.ge.s32.totalorder %s8767_s1, 2 }
  0x11   : > { %555 = sbr.rel (%p552_p3) target bundleno = 4901 (0x1325), region = 92 }
  0x12   : > { %s8769_s1 = smov (%p42_p4, %s8767_s1), 0 }
  0x13   : > { %8532 = sst [smem:[#allocation11_spill]] %s8769_s1 }
  0x16   : > { %p619_p5 = scmp.lt.s32.totalorder %s5981_s28, 1  ;;  %s5400_s20 = sshll.u32 %s5977_s27, 4 }
  0x17   : > { %p627_p6 = scmp.lt.s32.totalorder %s5400_s20, 31  ;;  %s8533_s24 = sld [smem:[#allocation70_spill]] }
  0x18   : > { %s8771_s28 = smov (!%p619_p5, %s5981_s28), 1  ;;  %s8534_s0 = sld [smem:[#allocation72_spill]] }
  0x19   : > { %s8773_s20 = smov (!%p627_p6, %s5400_s20), 31  ;;  %s5471_s21 = sshll.u32 %s8771_s28, 4 }
  0x1a   : > { %s5401_s22 = sshll.u32 %s8771_s28, 5  ;;  %s8535_s15 = sld [smem:[#allocation71_spill]] }
  0x1b   : > { %s630_s26 = sadd.s32 %s5401_s22, %s8773_s20  ;;  %s6178_s28 = scalar_lea.vmem %s8403_s18, %s5471_s21 }
  0x1c   : > { %s5402_s19 = sshll.u32 %s630_s26, 2  ;;  %p5407_p7 = scmp.ne.s32.totalorder %s5977_s27, 0 }
  0x1d   : > { %s623_s25 = scalar_lea.vmem %s8533_s24, %s5471_s21  ;;  %s5997_s29 = smov (!%p5407_p7), 120  }
  0x1e   : > { %s6168_s16 = scalar_lea.vmem %s8534_s0, %s5471_s21  ;;  %648 = sbr.rel (%p5407_p7) target bundleno = 2664 (0xa68), region = 96 }
  0x1f   : > { %s5998_s30 = smov (!%p5407_p7), 96   ;;  %s5999_s0 = smov (!%p5407_p7), 80  }
  0x20   : > { %s6173_s13 = scalar_lea.vmem %s8535_s15, %s5402_s19  ;;  %s6000_s19 = smov (!%p5407_p7), 88  }
  0x21   : > { %s6001_s1 = smov (!%p5407_p7), 72   ;;  %s6002_s21 = smov (!%p5407_p7), 112  }
  0x22   : > { %s6003_s2 = smov (!%p5407_p7), 104   ;;  %s6004_s23 = smov (!%p5407_p7), 56  }
  0x23   : > { %v5855_v0 = vld [vmem:[%s8388_s3 + $0x8] sm:$0xff]   ;;  %v5995_v1 = vmov 0.0   ;;  %v5856_v2 = vld [vmem:[%s8388_s3] sm:$0xff]   ;;  %vm5996_vm0 = vmmov 0   ;;  %vm675_vm1 = vcmask 261120   ;;  %vm724_vm2 = vcmask 64512  }
  0x24   : > { %5556 = vmatprep.subr.bf16.mxu0 %v5995_v1  ;;  %5564 = vmatprep.subr.bf16.mxu1 %v5995_v1  ;;  %v6191_v3 = vld [vmem:[%s623_s25] sm:$0xff]  ;;  %v6193_v4 = vld [vmem:[%s623_s25 + $0x8] sm:$0xff]  ;;  %1980 = vst.msk [vmem:[#allocation4] sm:$0xff] %vm675_vm1, %v5995_v1  ;;  %1981 = vst.msk [vmem:[#allocation4 + $0x8] sm:$0xff] %vm675_vm1, %v5995_v1  ;;  %vm774_vm3 = vcmask 130048   ;;  %s6005_s24 = smov 64  }
  0x25   : > { %5557 = vmatpush3.bf16.msra.mxu0 %v5855_v0  ;;  %5560 = vmatprep.mubr.msk.bf16.mxu0 %vm5996_vm0, %v5995_v1  ;;  %v651_v5 = vpack.c.bf16 %v6193_v4, %v6191_v3  ;;  %v5408_v7 = vld [vmem:[%s8389_s4] ss:$0 sm:$0xff]  ;;  %s6006_s25 = smov 48   ;;  %s6007_s26 = smov 40   ;;  %vm978_vm4 = vcmask 130112   ;;  %vm1112_vm5 = vcmask 195712  }
  0x26   : > { %5558 = vmatprep.subr.bf16.mxu0 %v5995_v1  ;;  %5566 = vmatprep.mubr.msk.bf16.mxu1 %vm5996_vm0, %v5995_v1  ;;  %s6008_s20 = smov 8   ;;  %s6009_s15 = smov 16   ;;  %vm1246_vm6 = vcmask 261312   ;;  %vm1865_vm7 = vcmask 392544   ;;  %vm1536_vm8 = vcmask 294144   ;;  %vm1675_vm9 = vcmask 326944  }
  0x27   : > { %vm1778_vm10 = vcmask 359744   ;;  %s6016_s22 = smov 116   ;;  %s6018_s14 = smov 84   ;;  %vm1557_vm11 = vcmask 31744   ;;  %vm1612_vm12 = vcmask 64544   ;;  %vm1639_vm13 = vcmask 97344  }
  0x28   : > { %s6019_s11 = smov 12   ;;  %vm1666_vm14 = vcmask 130144   ;;  %vm1716_vm15 = vcmask 162944   ;;  %s6021_s12 = smov 28  }
  0x29   : > { %5559 = vmatpush3.bf16.msra.mxu0 %v5856_v2 }
  0x2a   : > { %5570 = vmatprep.subr.bf16.mxu0 %v5995_v1 }
  0x2c   : > { %5561 = vmatmul.mubr.msk.bf16.vlgmr.msra.gmra.mxu0 %vm675_vm1, %v651_v5 }
  0x2d   : > { %5572 = vmatprep.mubr.msk.bf16.mxu0 %vm5996_vm0, %v5995_v1 }
  0xec   : > { %v713_v6 = vpop.f32.mrf.mxu0 }
  0xed   : > { %v714_v10 = vadd.f32 %v5408_v7, %v713_v6 }
  0xee   : > { %v5562_v8 = vpop.f32.mrf.mxu0 }
  0xf0   : > { %v716_v9 = vpop.f32.mrf.mxu0 }
  0xf1   : > { %v717_v11 = vadd.f32 %v5408_v7, %v716_v9 }
  0xf2   : > { %v5563_v12 = vpop.f32.mrf.mxu0 }
  0xf3   : > { %v6211_v13 = vpack.c.bf16 %v717_v11, %v714_v10 }
  0xf5   : > { %847 = vrot.lane.b32.xlu1 %v6211_v13, %s5997_s29  ;;  %722 = vrot.lane.b32.xlu0 %v6211_v13, %s5998_s30 }
  0xf9   : > { %983 = vrot.lane.b32.xlu1 %v6211_v13, %s5999_s0  ;;  %849 = vrot.lane.b32.xlu0 %v6211_v13, %s6000_s19  ;;  %s6010_s0 = smov 24  }
  0xfd   : > { %1117 = vrot.lane.b32.xlu1 %v6211_v13, %s6001_s1  ;;  %981 = vrot.lane.b32.xlu0 %v6211_v13, %s6002_s21  ;;  %s6023_s1 = smov 108  }
 0x101   : > { %1115 = vrot.lane.b32.xlu0 %v6211_v13, %s6003_s2 }
 0x167   : > { %v723_v14 = vpop.permute.xlu0 %722  ;;  %v848_v17 = vpop.permute.xlu1 %847 }
 0x168   : > { %v729_v15 = vsel %vm724_vm2, %v723_v14, 0 }
 0x169   : > { %5565 = vmatpush3.bf16.xpose.msra.mxu1 %v729_v15 }
 0x16a   : > { %5576 = vmatprep.subr.bf16.mxu1 %v5995_v1 }
 0x16b   : > { %v850_v16 = vpop.permute.xlu0 %849  ;;  %v984_v19 = vpop.permute.xlu1 %983 }
 0x16c   : > { %v855_v18 = vsel %vm724_vm2, %v850_v16, 0  ;;  %v989_v20 = vsel %vm724_vm2, %v984_v19, 0 }
 0x16f   : > { %v1118_v21 = vpop.permute.xlu1 %1117  ;;  %v982_v22 = vpop.permute.xlu0 %981 }
 0x170   : > { %5567 = vmatmul.mubr.msk.bf16.vlgmr.msra.gmra.mxu1 %vm724_vm2, %v6211_v13  ;;  %v1123_v23 = vsel %vm724_vm2, %v1118_v21, 0 }
 0x171   : > { %5577 = vmatpush3.bf16.xpose.msra.mxu1 %v855_v18  ;;  %5578 = vmatprep.mubr.msk.bf16.mxu1 %vm5996_vm0, %v5995_v1 }
 0x172   : > { %5588 = vmatprep.subr.bf16.mxu1 %v5995_v1 }
 0x173   : > { %v1116_v24 = vpop.permute.xlu0 %1115 }
 0x178   : > { %5579 = vmatmul.mubr.msk.bf16.vlgmr.msra.gmra.mxu1 %vm724_vm2, %v848_v17 }
 0x179   : > { %5589 = vmatpush3.bf16.xpose.msra.mxu1 %v989_v20  ;;  %5590 = vmatprep.mubr.msk.bf16.mxu1 %vm5996_vm0, %v5995_v1 }
 0x17a   : > { %5600 = vmatprep.subr.bf16.mxu1 %v5995_v1 }
 0x180   : > { %5591 = vmatmul.mubr.msk.bf16.vlgmr.msra.gmra.mxu1 %vm724_vm2, %v982_v22 }
 0x181   : > { %5601 = vmatpush3.bf16.xpose.msra.mxu1 %v1123_v23  ;;  %5602 = vmatprep.mubr.msk.bf16.mxu1 %vm5996_vm0, %v5995_v1 }
 0x182   : > { %5612 = vmatprep.subr.bf16.mxu1 %v5995_v1 }
 0x188   : > { %5603 = vmatmul.mubr.msk.bf16.vlgmr.msra.gmra.mxu1 %vm724_vm2, %v1116_v24 }
 0x189   : > { %5616 = vmatprep.mubr.msk.bf16.mxu1 %vm5996_vm0, %v5995_v1 }
 0x230   : > { %v765_v25 = vpop.f32.mrf.mxu1 }
 0x231   : > { %v772_v26 = vmul.f32 0.35355338, %v765_v25 }
 0x232   : > { %v5568_v27 = vpop.f32.mrf.mxu1 }
 0x233   : > { %v775_v28 = vsel %vm774_vm3, %v772_v26, -inf }
 0x234   : > { %776 = vmax.xlane.f32.xlu1 %v775_v28  ;;  %v768_v29 = vpop.f32.mrf.mxu1 }
 0x235   : > { %v773_v30 = vmul.f32 0.35355338, %v768_v29 }
 0x236   : > { %v5569_v31 = vpop.f32.mrf.mxu1 }
 0x237   : > { %v778_v32 = vsel %vm774_vm3, %v773_v30, -inf }
 0x238   : > { %779 = vmax.xlane.f32.xlu0 %v778_v32  ;;  %v891_v33 = vpop.f32.mrf.mxu1 }
 0x239   : > { %v898_v34 = vmul.f32 0.35355338, %v891_v33 }
 0x23a   : > { %v5580_v35 = vpop.f32.mrf.mxu1 }
 0x23b   : > { %v900_v36 = vsel %vm774_vm3, %v898_v34, -inf }
 0x23c   : > { %901 = vmax.xlane.f32.xlu0 %v900_v36  ;;  %v894_v37 = vpop.f32.mrf.mxu1 }
 0x23d   : > { %v899_v38 = vmul.f32 0.35355338, %v894_v37 }
 0x23e   : > { %v5581_v39 = vpop.f32.mrf.mxu1 }
 0x23f   : > { %v903_v40 = vsel %vm774_vm3, %v899_v38, -inf }
 0x240   : > { %904 = vmax.xlane.f32.xlu1 %v903_v40  ;;  %v1025_v41 = vpop.f32.mrf.mxu1 }
 0x241   : > { %v1032_v42 = vmul.f32 0.35355338, %v1025_v41 }
 0x242   : > { %v5592_v43 = vpop.f32.mrf.mxu1 }
 0x243   : > { %v1034_v44 = vsel %vm774_vm3, %v1032_v42, -inf }
 0x244   : > { %1035 = vmax.xlane.f32.xlu0 %v1034_v44  ;;  %v1028_v45 = vpop.f32.mrf.mxu1 }
 0x245   : > { %v1033_v46 = vmul.f32 0.35355338, %v1028_v45 }
 0x246   : > { %v5593_v47 = vpop.f32.mrf.mxu1 }
 0x247   : > { %v1037_v48 = vsel %vm774_vm3, %v1033_v46, -inf }
 0x248   : > { %1038 = vmax.xlane.f32.xlu1 %v1037_v48  ;;  %v1159_v49 = vpop.f32.mrf.mxu1 }
 0x249   : > { %v1166_v50 = vmul.f32 0.35355338, %v1159_v49 }
 0x24a   : > { %v5604_v51 = vpop.f32.mrf.mxu1 }
 0x24b   : > { %v1168_v52 = vsel %vm774_vm3, %v1166_v50, -inf }
 0x24c   : > { %1169 = vmax.xlane.f32.xlu0 %v1168_v52  ;;  %v1162_v53 = vpop.f32.mrf.mxu1 }
 0x24d   : > { %v1167_v54 = vmul.f32 0.35355338, %v1162_v53 }
 0x24e   : > { %v5605_v55 = vpop.f32.mrf.mxu1 }
 0x24f   : > { %v1171_v56 = vsel %vm774_vm3, %v1167_v54, -inf }
 0x250   : > { %1172 = vmax.xlane.f32.xlu1 %v1171_v56 }
 0x2bd   : > { %v777_v57 = vpop.xlane.xlu1 %776 }
 0x2be   : > { %v781_v58 = vsub.f32 %v772_v26, %v777_v57 }
 0x2c0   : > { %v783_v59 = vmul.f32 1.442695, %v781_v58 }
 0x2c1   : > { %v780_v60 = vpop.xlane.xlu0 %779 }
 0x2c2   : > { %5861 = vpow2.f32 %v783_v59  ;;  %v782_v61 = vsub.f32 %v773_v30, %v780_v60 }
 0x2c4   : > { %v785_v62 = vmul.f32 1.442695, %v782_v61 }
 0x2c5   : > { %v902_v63 = vpop.xlane.xlu0 %901 }
 0x2c6   : > { %5863 = vpow2.f32 %v785_v62  ;;  %v906_v0 = vsub.f32 %v898_v34, %v902_v63 }
 0x2c8   : > { %v908_v2 = vmul.f32 1.442695, %v906_v0 }
 0x2c9   : > { %v905_v11 = vpop.xlane.xlu1 %904 }
 0x2ca   : > { %5865 = vpow2.f32 %v908_v2  ;;  %v907_v12 = vsub.f32 %v899_v38, %v905_v11 }
 0x2cc   : > { %v910_v17 = vmul.f32 1.442695, %v907_v12 }
 0x2cd   : > { %v1036_v14 = vpop.xlane.xlu0 %1035 }
 0x2ce   : > { %v1040_v16 = vsub.f32 %v1032_v42, %v1036_v14  ;;  %5867 = vpow2.f32 %v910_v17  ;;  %v5857_v17 = vld [vmem:[%s8390_s5 + $0x8] sm:$0xff]  }
 0x2cf   : > { %v5862_v5 = vpop.eup %5861  ;;  %5613 = vmatpush3.bf16.msra.mxu1 %v5857_v17 }
 0x2d0   : > { %v787_v6 = vsel %vm774_vm3, %v5862_v5, 0.0  ;;  %v1042_v21 = vmul.f32 1.442695, %v1040_v16  ;;  %5614 = vmatprep.subr.bf16.mxu1 %v5995_v1 }
 0x2d1   : > { %788 = vadd.xlane.f32.xlu0 %v787_v6  ;;  %v1039_v15 = vpop.xlane.xlu1 %1038 }
 0x2d2   : > { %v1041_v18 = vsub.f32 %v1033_v46, %v1039_v15  ;;  %5869 = vpow2.f32 %v1042_v21 }
 0x2d3   : > { %v5864_v7 = vpop.eup %5863 }
 0x2d4   : > { %v790_v8 = vsel %vm774_vm3, %v5864_v7, 0.0  ;;  %v1044_v23 = vmul.f32 1.442695, %v1041_v18 }
 0x2d5   : > { %791 = vadd.xlane.f32.xlu1 %v790_v8  ;;  %v1170_v19 = vpop.xlane.xlu0 %1169 }
 0x2d6   : > { %v1174_v22 = vsub.f32 %v1166_v50, %v1170_v19  ;;  %5871 = vpow2.f32 %v1044_v23  ;;  %v5858_v19 = vld [vmem:[%s8390_s5] sm:$0xff]  }
 0x2d7   : > { %v6256_v9 = vpop.eup %5865  ;;  %5615 = vmatpush3.bf16.msra.mxu1 %v5858_v19 }
 0x2d8   : > { %v912_v10 = vsel %vm774_vm3, %v6256_v9, 0.0  ;;  %v1176_v25 = vmul.f32 1.442695, %v1174_v22 }
 0x2d9   : > { %913 = vadd.xlane.f32.xlu0 %v912_v10  ;;  %v1173_v20 = vpop.xlane.xlu1 %1172 }
 0x2da   : > { %v1175_v24 = vsub.f32 %v1167_v54, %v1173_v20  ;;  %5873 = vpow2.f32 %v1176_v25 }
 0x2db   : > { %v5868_v27 = vpop.eup %5867 }
 0x2dc   : > { %v1178_v26 = vmul.f32 1.442695, %v1175_v24  ;;  %v915_v29 = vsel %vm774_vm3, %v5868_v27, 0.0 }
 0x2de   : > { %5875 = vpow2.f32 %v1178_v26 }
 0x2df   : > { %v5870_v28 = vpop.eup %5869 }
 0x2e0   : > { %v1046_v33 = vsel %vm774_vm3, %v5870_v28, 0.0 }
 0x2e3   : > { %v5872_v30 = vpop.eup %5871 }
 0x2e4   : > { %v1049_v32 = vsel %vm774_vm3, %v5872_v30, 0.0 }
 0x2e6   : > { %923 = vrot.lane.b32.xlu1 %v6211_v13, %s6004_s23 }
 0x2e7   : > { %v6263_v31 = vpop.eup %5873 }
 0x2e8   : > { %v1180_v36 = vsel %vm774_vm3, %v6263_v31, 0.0 }
 0x2eb   : > { %v5876_v34 = vpop.eup %5875 }
 0x2ec   : > { %v1183_v35 = vsel %vm774_vm3, %v5876_v34, 0.0 }
 0x2ef   : > { %798 = vrot.lane.b32.xlu0 %v6211_v13, %s6005_s24  ;;  %s6013_s24 = smov 32  }
 0x30a   : > { %916 = vadd.xlane.f32.xlu1 %v915_v29 }
 0x30e   : > { %1050 = vadd.xlane.f32.xlu1 %v1049_v32  ;;  %1047 = vadd.xlane.f32.xlu0 %v1046_v33 }
 0x312   : > { %1184 = vadd.xlane.f32.xlu1 %v1183_v35  ;;  %1181 = vadd.xlane.f32.xlu0 %v1180_v36  ;;  %v5420_v35 = vld [vmem:[%s8391_s6] ss:$0 sm:$0xff] }
 0x323   : > { %1057 = vrot.lane.b32.xlu1 %v6211_v13, %s6006_s25  ;;  %s6014_s25 = smov 124  }
 0x328   : > { %1191 = vrot.lane.b32.xlu0 %v6211_v13, %s6007_s26  ;;  %s6015_s26 = smov 4  }
 0x35a   : > { %v789_v37 = vpop.xlane.xlu0 %788 }
 0x35b   : > { %5877 = vrcp.f32 %v789_v37 }
 0x35e   : > { %v792_v38 = vpop.xlane.xlu1 %791 }
 0x35f   : > { %5879 = vrcp.f32 %v792_v38 }
 0x362   : > { %v914_v39 = vpop.xlane.xlu0 %913  ;;  %v924_v46 = vpop.permute.xlu1 %923 }
 0x363   : > { %5881 = vrcp.f32 %v914_v39 }
 0x366   : > { %v799_v40 = vpop.permute.xlu0 %798 }
 0x367   : > { %5571 = vmatpush3.bf16.msra.mxu0 %v799_v40 }
 0x368   : > { %5582 = vmatprep.subr.bf16.mxu0 %v5995_v1  ;;  %v5878_v41 = vpop.eup %5877 }
 0x369   : > { %v795_v43 = vmul.f32 %v5878_v41, %v5862_v5 }
 0x36c   : > { %v5880_v42 = vpop.eup %5879 }
 0x36d   : > { %v796_v44 = vmul.f32 %v5880_v42, %v5864_v7 }
 0x36f   : > { %v797_v45 = vpack.c.bf16 %v796_v44, %v795_v43 }
 0x370   : > { %v5882_v51 = vpop.eup %5881 }
 0x371   : > { %5573 = vmatmul.mubr.msk.bf16.vlgmr.msra.gmra.mxu0 %vm774_vm3, %v797_v45  ;;  %v920_v53 = vmul.f32 %v5882_v51, %v6256_v9 }
 0x372   : > { %5583 = vmatpush3.bf16.msra.mxu0 %v924_v46  ;;  %5584 = vmatprep.mubr.msk.bf16.mxu0 %vm5996_vm0, %v5995_v1 }
 0x373   : > { %5594 = vmatprep.subr.bf16.mxu0 %v5995_v1 }
 0x393   : > { %v917_v13 = vpop.xlane.xlu1 %916 }
 0x394   : > { %5883 = vrcp.f32 %v917_v13 }
 0x397   : > { %v1051_v47 = vpop.xlane.xlu1 %1050  ;;  %v1048_v48 = vpop.xlane.xlu0 %1047 }
 0x398   : > { %5885 = vrcp.f32 %v1051_v47 }
 0x399   : > { %5887 = vrcp.f32 %v1048_v48 }
 0x39b   : > { %v1185_v49 = vpop.xlane.xlu1 %1184  ;;  %v1182_v50 = vpop.xlane.xlu0 %1181 }
 0x39c   : > { %5889 = vrcp.f32 %v1185_v49 }
 0x39d   : > { %5891 = vrcp.f32 %v1182_v50 }
 0x39f   : > { %v1058_v58 = vpop.permute.xlu1 %1057  ;;  %v1192_v0 = vpop.permute.xlu0 %1191 }
 0x3a1   : > { %v5884_v52 = vpop.eup %5883 }
 0x3a2   : > { %v921_v54 = vmul.f32 %v5884_v52, %v5868_v27 }
 0x3a4   : > { %v922_v55 = vpack.c.bf16 %v921_v54, %v920_v53  ;;  %v5860_v54 = vld [vmem:[%s8394_s9] sm:$0xff]  }
 0x3a5   : > { %v5886_v56 = vpop.eup %5885 }
 0x3a6   : > { %v5888_v57 = vpop.eup %5887  ;;  %5585 = vmatmul.mubr.msk.bf16.vlgmr.msra.gmra.mxu0 %vm774_vm3, %v922_v55  ;;  %v1055_v60 = vmul.f32 %v5886_v56, %v5872_v30  ;;  %v1433_v55 = vld [vmem:[%s6168_s16 + $0x8] sm:$0xff]  ;;  %v1432_v56 = vld [vmem:[%s6168_s16] sm:$0xff]  ;;  %s6017_s16 = smov 92  }
 0x3a7   : > { %5595 = vmatpush3.bf16.msra.mxu0 %v1058_v58  ;;  %5596 = vmatprep.mubr.msk.bf16.mxu0 %vm5996_vm0, %v5995_v1  ;;  %v1054_v59 = vmul.f32 %v5888_v57, %v5870_v28  ;;  %v6011_v57 = vmov 0   ;;  %v6012_v58 = vmov 1  }
 0x3a8   : > { %5606 = vmatprep.subr.bf16.mxu0 %v5995_v1  ;;  %5852 = vset.pattern.permute.xlu1 %v6011_v57 }
 0x3a9   : > { %v5890_v61 = vpop.eup %5889  ;;  %v1056_v62 = vpack.c.bf16 %v1055_v60, %v1054_v59  ;;  %5851 = vset.pattern.permute.xlu0 %v6011_v57 }
 0x3aa   : > { %v5892_v63 = vpop.eup %5891  ;;  %v1189_v5 = vmul.f32 %v5890_v61, %v5876_v34 }
 0x3ab   : > { %v1188_v2 = vmul.f32 %v5892_v63, %v6263_v31 }
 0x3ad   : > { %v1190_v6 = vpack.c.bf16 %v1189_v5, %v1188_v2  ;;  %v5424_v2 = vld [vmem:[%s8402_s17] ss:$0 sm:$0xff] }
 0x3ae   : > { %5597 = vmatmul.mubr.msk.bf16.vlgmr.msra.gmra.mxu0 %vm774_vm3, %v1056_v62 }
 0x3af   : > { %5607 = vmatpush3.bf16.msra.mxu0 %v1192_v0  ;;  %5608 = vmatprep.mubr.msk.bf16.mxu0 %vm5996_vm0, %v5995_v1 }
 0x3b0   : > { %5620 = vmatprep.subr.bf16.mxu0 %v5995_v1 }
 0x3b6   : > { %5609 = vmatmul.mubr.msk.bf16.vlgmr.msra.gmra.mxu0 %vm774_vm3, %v1190_v6  ;;  %v5425_v6 = vld [vmem:[%s8402_s17 + $0x1] ss:$0 sm:$0xff]  ;;  %vm1914_vm3 = vcmask 425344  }
 0x3b7   : > { %5624 = vmatprep.mubr.msk.bf16.mxu0 %vm5996_vm0, %v5995_v1  ;;  %vm1735_vm0 = vcmask 195744  }
 0x431   : > { %v838_v7 = vpop.f32.mrf.mxu0 }
 0x432   : > { %845 = vst.msk [vmem:[#allocation3] sm:$0xff] %vm724_vm2, %v838_v7 }
 0x433   : > { %v5574_v8 = vpop.f32.mrf.mxu0 }
 0x435   : > { %v841_v9 = vpop.f32.mrf.mxu0 }
 0x436   : > { %846 = vst.msk [vmem:[#allocation3 + $0x8] sm:$0xff] %vm724_vm2, %v841_v9  ;;  %vm1769_vm2 = vcmask 261344  }
 0x437   : > { %v5575_v10 = vpop.f32.mrf.mxu0 }
 0x466   : > { %v963_v11 = vpop.f32.mrf.mxu0 }
 0x467   : > { %972 = vrot.lane.b32.xlu1 %v963_v11, %s6008_s20 }
 0x468   : > { %v5586_v12 = vpop.f32.mrf.mxu0 }
 0x46a   : > { %v966_v14 = vpop.f32.mrf.mxu0 }
 0x46b   : > { %974 = vrot.lane.b32.xlu0 %v966_v14, %s6008_s20 }
 0x46c   : > { %v5587_v15 = vpop.f32.mrf.mxu0 }
 0x46d   : > { %v5426_v15 = vld [vmem:[%s8395_s10] ss:$0 sm:$0xff] }
 0x46e   : > { %v1097_v16 = vpop.f32.mrf.mxu0 }
 0x46f   : > { %1106 = vrot.lane.b32.xlu1 %v1097_v16, %s6009_s15 }
 0x470   : > { %v5598_v18 = vpop.f32.mrf.mxu0 }
 0x472   : > { %v1100_v20 = vpop.f32.mrf.mxu0 }
 0x473   : > { %1108 = vrot.lane.b32.xlu0 %v1100_v20, %s6009_s15 }
 0x474   : > { %v5599_v21 = vpop.f32.mrf.mxu0 }
 0x476   : > { %v1231_v22 = vpop.f32.mrf.mxu0 }
 0x477   : > { %1240 = vrot.lane.b32.xlu1 %v1231_v22, %s6010_s0 }
 0x478   : > { %v5610_v23 = vpop.f32.mrf.mxu0 }
 0x47a   : > { %v1234_v24 = vpop.f32.mrf.mxu0 }
 0x47b   : > { %1242 = vrot.lane.b32.xlu0 %v1234_v24, %s6010_s0 }
 0x47c   : > { %v5611_v25 = vpop.f32.mrf.mxu0 }
 0x4d9   : > { %v973_v26 = vpop.permute.xlu1 %972 }
 0x4da   : > { %979 = vst.msk [vmem:[#allocation3] sm:$0xff] %vm978_vm4, %v973_v26 }
 0x4dd   : > { %v975_v27 = vpop.permute.xlu0 %974 }
 0x4de   : > { %980 = vst.msk [vmem:[#allocation3 + $0x8] sm:$0xff] %vm978_vm4, %v975_v27  ;;  %vm1933_vm4 = vcmask 458144  }
 0x4e1   : > { %v1107_v28 = vpop.permute.xlu1 %1106 }
 0x4e2   : > { %1113 = vst.msk [vmem:[#allocation3] sm:$0xff] %vm1112_vm5, %v1107_v28 }
 0x4e5   : > { %v1109_v29 = vpop.permute.xlu0 %1108 }
 0x4e6   : > { %1114 = vst.msk [vmem:[#allocation3 + $0x8] sm:$0xff] %vm1112_vm5, %v1109_v29  ;;  %vm1952_vm5 = vcmask 490944  }
 0x4e9   : > { %v1241_v30 = vpop.permute.xlu1 %1240 }
 0x4ea   : > { %1247 = vst.msk [vmem:[#allocation3] sm:$0xff] %vm1246_vm6, %v1241_v30 }
 0x4ed   : > { %v1243_v31 = vpop.permute.xlu0 %1242 }
 0x4ee   : > { %1248 = vst.msk [vmem:[#allocation3 + $0x8] sm:$0xff] %vm1246_vm6, %v1243_v31  ;;  %vm1971_vm6 = vcmask 523744  }
 0x4f1   : > { %v1249_v32 = vld [vmem:[#allocation3] sm:$0xff] }
 0x4f5   : > { %v1250_v33 = vld [vmem:[#allocation3 + $0x8] sm:$0xff] }
 0x4f6   : > { %v1251_v34 = vpack.c.bf16 %v1250_v33, %v1249_v32 }
 0x4f8   : > { %5617 = vmatmul.mubr.msk.bf16.vlgmr.msra.gmra.mxu1 %vm675_vm1, %v1251_v34 }
 0x5b8   : > { %v1312_v36 = vpop.f32.mrf.mxu1 }
 0x5b9   : > { %v1313_v37 = vadd.f32 %v5420_v35, %v1312_v36 }
 0x5ba   : > { %v5618_v38 = vpop.f32.mrf.mxu1 }
 0x5bb   : > { %v1319_v39 = vadd.f32 %v1313_v37, %v6191_v3 }
 0x5bc   : > { %v1315_v40 = vpop.f32.mrf.mxu1 }
 0x5bd   : > { %v1316_v41 = vadd.f32 %v5420_v35, %v1315_v40  ;;  %v1323_v42 = vsel %vm675_vm1, %v1319_v39, 0.0 }
 0x5be   : > { %1324 = vadd.xlane.f32.xlu1 %v1323_v42  ;;  %v5619_v43 = vpop.f32.mrf.mxu1 }
 0x5bf   : > { %v1320_v44 = vadd.f32 %v1316_v41, %v6193_v4  ;;  %v5859_v4 = vld [vmem:[%s8394_s9 + $0x8] sm:$0xff]  }
 0x5c0   : > { %5621 = vmatpush3.bf16.msra.mxu0 %v5859_v4 }
 0x5c1   : > { %v1326_v45 = vsel %vm675_vm1, %v1320_v44, 0.0  ;;  %5622 = vmatprep.subr.bf16.mxu0 %v5995_v1 }
 0x5c2   : > { %1327 = vadd.xlane.f32.xlu0 %v1326_v45 }
 0x5c4   : > { %5623 = vmatpush3.bf16.msra.mxu0 %v5860_v54 }
 0x647   : > { %v1325_v46 = vpop.xlane.xlu1 %1324 }
 0x648   : > { %v1330_v13 = vmul.f32 0.03125, %v1325_v46 }
 0x64a   : > { %v1332_v47 = vsub.f32 %v1319_v39, %v1330_v13 }
 0x64b   : > { %v1328_v48 = vpop.xlane.xlu0 %1327 }
 0x64c   : > { %v1331_v49 = vmul.f32 0.03125, %v1328_v48  ;;  %v1334_v50 = vmul.f32 %v1332_v47, %v1332_v47 }
 0x64e   : > { %v1333_v3 = vsub.f32 %v1320_v44, %v1331_v49  ;;  %v1336_v51 = vsel %vm675_vm1, %v1334_v50, 0.0 }
 0x64f   : > { %1337 = vadd.xlane.f32.xlu0 %v1336_v51 }
 0x650   : > { %v1335_v52 = vmul.f32 %v1333_v3, %v1333_v3 }
 0x652   : > { %v1339_v53 = vsel %vm675_vm1, %v1335_v52, 0.0 }
 0x653   : > { %1340 = vadd.xlane.f32.xlu1 %v1339_v53 }
 0x664   : > { %1441 = vperm.xlu1 %5852, %v1433_v55  }
 0x665   : > { %1436 = vperm.xlu0 %5851, %v1432_v56  }
 0x668   : > { %5853 = vset.pattern.permute.xlu1 %v6012_v58 }
 0x669   : > { %5854 = vset.pattern.permute.xlu0 %v6012_v58  ;;  %1451 = vperm.xlu1 %5853, %v1432_v56  }
 0x66d   : > { %1455 = vperm.xlu1 %5853, %v1433_v55  }
 0x6d8   : > { %v1338_v59 = vpop.xlane.xlu0 %1337 }
 0x6d9   : > { %v1342_v60 = vmul.f32 0.03125, %v1338_v59 }
 0x6db   : > { %v1344_v61 = vadd.f32 1e-05, %v1342_v60 }
 0x6dc   : > { %v1341_v62 = vpop.xlane.xlu1 %1340 }
 0x6dd   : > { %5893 = vrsqrt.f32 %v1344_v61  ;;  %v1343_v63 = vmul.f32 0.03125, %v1341_v62 }
 0x6df   : > { %v1345_v1 = vadd.f32 1e-05, %v1343_v63 }
 0x6e0   : > { %v1437_v17 = vpop.permute.xlu0 %1436  ;;  %v1442_v24 = vpop.permute.xlu1 %1441 }
 0x6e1   : > { %5895 = vrsqrt.f32 %v1345_v1 }
 0x6e4   : > { %v1452_v34 = vpop.permute.xlu1 %1451 }
 0x6e8   : > { %v1456_v44 = vpop.permute.xlu1 %1455 }
 0x6ea   : > { %v5894_v0 = vpop.eup %5893 }
 0x6eb   : > { %v1348_v5 = vmul.f32 %v5894_v0, %v1332_v47 }
 0x6ed   : > { %v1354_v7 = vmul.f32 %v5424_v2, %v1348_v5 }
 0x6ee   : > { %v5896_v8 = vpop.eup %5895 }
 0x6ef   : > { %v1349_v9 = vmul.f32 %v5896_v8, %v1333_v3  ;;  %v1360_v10 = vadd.f32 %v5425_v6, %v1354_v7 }
 0x6f1   : > { %v1355_v11 = vmul.f32 %v5424_v2, %v1349_v9  ;;  %1362 = vst.msk [vmem:[#allocation2] sm:$0xff] %vm675_vm1, %v1360_v10 }
 0x6f3   : > { %v1361_v12 = vadd.f32 %v5425_v6, %v1355_v11 }
 0x6f5   : > { %1363 = vst.msk [vmem:[#allocation2 + $0x8] sm:$0xff] %vm675_vm1, %v1361_v12  ;;  %v1364_v14 = vpack.c.bf16 %v1361_v12, %v1360_v10 }
 0x6f7   : > { %5625 = vmatmul.mubr.msk.bf16.vlgmr.msra.gmra.mxu0 %vm675_vm1, %v1364_v14  ;;  %vm1750_vm1 = vcmask 228544  }
 0x7b7   : > { %v1425_v16 = vpop.f32.mrf.mxu0 }
 0x7b8   : > { %v6336_v18 = vadd.f32 %v5426_v15, %v1425_v16 }
 0x7b9   : > { %v5626_v19 = vpop.f32.mrf.mxu0 }
 0x7ba   : > { %v1444_v20 = vadd.f32 %v1437_v17, %v6336_v18  ;;  %v1874_v21 = vsel %vm1865_vm7, %v6336_v18, -inf  ;;  %v1537_v22 = vsel %vm1536_vm8, %v6336_v18, -inf  ;;  %v1676_v29 = vsel %vm1675_vm9, %v6336_v18, -inf }
 0x7bb   : > { %1875 = vmax.xlane.f32.xlu0 %v1874_v21  ;;  %1538 = vmax.xlane.f32.xlu1 %v1537_v22  ;;  %v1428_v23 = vpop.f32.mrf.mxu0  ;;  %v1779_v36 = vsel %vm1778_vm10, %v6336_v18, -inf  ;;  %v1458_v40 = vadd.f32 %v1452_v34, %v6336_v18 }
 0x7bc   : > { %v1446_v25 = vmax.f32 %v1444_v20, 0.0  ;;  %v6343_v26 = vadd.f32 %v5426_v15, %v1428_v23 }
 0x7bd   : > { %v5627_v27 = vpop.f32.mrf.mxu0  ;;  %v1460_v45 = vmax.f32 %v1458_v40, 0.0 }
 0x7be   : > { %v1448_v28 = vmin.f32 %v1446_v25, 15.0  ;;  %v1540_v30 = vsel %vm1536_vm8, %v6343_v26, -inf  ;;  %v1445_v31 = vadd.f32 %v1442_v24, %v6343_v26  ;;  %v1679_v37 = vsel %vm1675_vm9, %v6343_v26, -inf }
 0x7bf   : > { %1677 = vmax.xlane.f32.xlu1 %v1676_v29  ;;  %1541 = vmax.xlane.f32.xlu0 %v1540_v30  ;;  %v1877_v41 = vsel %vm1865_vm7, %v6343_v26, -inf  ;;  %v1782_v42 = vsel %vm1778_vm10, %v6343_v26, -inf  ;;  %v1459_v46 = vadd.f32 %v1456_v44, %v6343_v26  ;;  %v1462_v13 = vmin.f32 %v1460_v45, 15.0 }
 0x7c0   : > { %v1464_v32 = vfloor.f32 %v1448_v28  ;;  %v1447_v33 = vmax.f32 %v1445_v31, 0.0 }
 0x7c1   : > { %v1461_v47 = vmax.f32 %v1459_v46, 0.0  ;;  %v1466_v48 = vfloor.f32 %v1462_v13 }
 0x7c2   : > { %v6350_v35 = vsub.f32 %v1448_v28, %v1464_v32  ;;  %v1449_v38 = vmin.f32 %v1447_v33, 15.0  ;;  %v5756_v51 = vtrunc.f32 %v1464_v32  ;;  %v1468_v58 = vadd.f32 1.0, %v1464_v32 }
 0x7c3   : > { %1780 = vmax.xlane.f32.xlu1 %v1779_v36  ;;  %1680 = vmax.xlane.f32.xlu0 %v1679_v37  ;;  %v1463_v49 = vmin.f32 %v1461_v47, 15.0  ;;  %v1478_v3 = vsub.f32 %v1462_v13, %v1466_v48  ;;  %v1472_v11 = vadd.f32 1.0, %v1466_v48  ;;  %v5764_v12 = vtrunc.f32 %v1466_v48 }
 0x7c4   : > { %v1465_v39 = vfloor.f32 %v1449_v38  ;;  %v5757_v4 = vcvt.f32.s32 %v5756_v51  ;;  %v1470_v61 = vmin.f32 %v1468_v58, 15.0  ;;  %v1496_v10 = vsub.f32 1.0, %v6350_v35 }
 0x7c5   : > { %v1467_v52 = vfloor.f32 %v1463_v49  ;;  %v1498_v56 = vsub.f32 1.0, %v1478_v3  ;;  %v1474_v16 = vmin.f32 %v1472_v11, 15.0  ;;  %v5765_v17 = vcvt.f32.s32 %v5764_v12 }
 0x7c6   : > { %v6361_v43 = vsub.f32 %v1449_v38, %v1465_v39  ;;  %v1469_v50 = vadd.f32 1.0, %v1465_v39  ;;  %v5758_v57 = vtrunc.f32 %v1465_v39  ;;  %v5760_v63 = vtrunc.f32 %v1470_v61 }
 0x7c7   : > { %1878 = vmax.xlane.f32.xlu1 %v1877_v41  ;;  %1783 = vmax.xlane.f32.xlu0 %v1782_v42  ;;  %v1479_v54 = vsub.f32 %v1463_v49, %v1467_v52  ;;  %v5768_v22 = vtrunc.f32 %v1474_v16  ;;  %v1488_v23 = vmul.u32 16, %v5765_v17  ;;  %v1473_v31 = vadd.f32 1.0, %v1467_v52 }
 0x7c8   : > { %v1471_v53 = vmin.f32 %v1469_v50, 15.0  ;;  %v5759_v60 = vcvt.f32.s32 %v5758_v57  ;;  %v5761_v1 = vcvt.f32.s32 %v5760_v63  ;;  %v1497_v29 = vsub.f32 1.0, %v6361_v43 }
 0x7c9   : > { %v1499_v62 = vsub.f32 1.0, %v1479_v54  ;;  %v5769_v30 = vcvt.f32.s32 %v5768_v22  ;;  %v5766_v32 = vtrunc.f32 %v1467_v52  ;;  %v1475_v37 = vmin.f32 %v1473_v31, 15.0 }
 0x7ca   : > { %v5762_v55 = vtrunc.f32 %v1471_v53 }
 0x7cb   : > { %v1518_v36 = vmul.u32 16, %v5769_v30  ;;  %v5767_v38 = vcvt.f32.s32 %v5766_v32  ;;  %v5770_v42 = vtrunc.f32 %v1475_v37 }
 0x7cc   : > { %v5763_v59 = vcvt.f32.s32 %v5762_v55 }
 0x7cd   : > { %v1489_v44 = vmul.u32 16, %v5767_v38  ;;  %v5771_v46 = vcvt.f32.s32 %v5770_v42 }
 0x7cf   : > { %v1519_v48 = vmul.u32 16, %v5771_v46 }
 0x7d8   : > { %1524 = vrot.lane.b32.xlu1 %v1478_v3, %s6002_s21 }
 0x7dc   : > { %1490 = vrot.lane.b32.xlu1 %v5757_v4, %s6009_s15 }
 0x7dd   : > { %1526 = vrot.lane.b32.xlu0 %v1479_v54, %s6002_s21 }
 0x7e0   : > { %1502 = vrot.lane.b32.xlu1 %v1498_v56, %s6002_s21 }
 0x7e1   : > { %1512 = vrot.lane.b32.xlu0 %v5763_v59, %s6009_s15 }
 0x7e4   : > { %1492 = vrot.lane.b32.xlu1 %v5759_v60, %s6009_s15 }
 0x7e8   : > { %1504 = vrot.lane.b32.xlu1 %v1499_v62, %s6002_s21 }
 0x7ec   : > { %1510 = vrot.lane.b32.xlu1 %v5761_v1, %s6009_s15 }
 0x844   : > { %v6372_v0 = vpop.xlane.xlu1 %1538  ;;  %v6374_v2 = vpop.xlane.xlu0 %1875 }
 0x845   : > { %v1880_v55 = vsub.f32 %v6336_v18, %v6374_v2 }
 0x847   : > { %v1882_v61 = vmul.f32 1.442695, %v1880_v55 }
 0x848   : > { %v6376_v5 = vpop.xlane.xlu1 %1677  ;;  %v6378_v6 = vpop.xlane.xlu0 %1541 }
 0x849   : > { %v1544_v49 = vsub.f32 %v6343_v26, %v6378_v6  ;;  %v1682_v57 = vsub.f32 %v6336_v18, %v6376_v5 }
 0x84b   : > { %v1547_v53 = vmul.f32 1.442695, %v1544_v49  ;;  %v1684_v63 = vmul.f32 1.442695, %v1682_v57 }
 0x84c   : > { %v1781_v7 = vpop.xlane.xlu1 %1780  ;;  %v6382_v9 = vpop.xlane.xlu0 %1680 }
 0x84d   : > { %v1785_v13 = vsub.f32 %v6336_v18, %v1781_v7  ;;  %v1683_v4 = vsub.f32 %v6343_v26, %v6382_v9 }
 0x84f   : > { %v1787_v50 = vmul.f32 1.442695, %v1785_v13  ;;  %v1686_v58 = vmul.f32 1.442695, %v1683_v4 }
 0x850   : > { %v6380_v8 = vpop.xlane.xlu1 %1878  ;;  %v6386_v19 = vpop.xlane.xlu0 %1783 }
 0x851   : > { %5897 = vpow2.f32 %v1787_v50  ;;  %v1881_v62 = vsub.f32 %v6343_v26, %v6380_v8 }
 0x852   : > { %5899 = vpow2.f32 %v1547_v53 }
 0x854   : > { %v1525_v14 = vpop.permute.xlu1 %1524  ;;  %v1527_v28 = vpop.permute.xlu0 %1526 }
 0x855   : > { %v1530_v15 = vmul.f32 %v1525_v14, %v1496_v10  ;;  %v1534_v21 = vmul.f32 %v1525_v14, %v6350_v35  ;;  %v1531_v33 = vmul.f32 %v1527_v28, %v1497_v29  ;;  %v1535_v40 = vmul.f32 %v1527_v28, %v6361_v43 }
 0x857   : > { %1623 = vrot.lane.b32.xlu1 %v1530_v15, %s6013_s24 }
 0x858   : > { %v1491_v20 = vpop.permute.xlu1 %1490  ;;  %v1513_v60 = vpop.permute.xlu0 %1512 }
 0x859   : > { %v6390_v25 = vadd.s32 %v1491_v20, %v1488_v23  ;;  %v6400_v41 = vadd.s32 %v1518_v36, %v1491_v20  ;;  %v6447_v1 = vadd.s32 %v1513_v60, %v1489_v44  ;;  %v6453_v5 = vadd.s32 %v1519_v48, %v1513_v60 }
 0x85b   : > { %1650 = vrot.lane.b32.xlu1 %v1534_v21, %s6013_s24 }
 0x85c   : > { %v1503_v24 = vpop.permute.xlu1 %1502 }
 0x85d   : > { %v1508_v27 = vmul.f32 %v1503_v24, %v1496_v10  ;;  %v1516_v34 = vmul.f32 %v1503_v24, %v6350_v35 }
 0x85e   : > { %v6455_v6 = vpop.eup %5897 }
 0x85f   : > { %1588 = vrot.lane.b32.xlu1 %v6390_v25, %s6002_s21  ;;  %1570 = vrot.lane.b32.xlu0 %v1508_v27, %s6013_s24 }
 0x860   : > { %v1493_v39 = vpop.permute.xlu1 %1492 }
 0x861   : > { %v6405_v35 = vadd.s32 %v1493_v39, %v1489_v44  ;;  %v6418_v3 = vadd.s32 %v1519_v48, %v1493_v39 }
 0x863   : > { %1596 = vrot.lane.b32.xlu1 %v1516_v34, %s6013_s24  ;;  %1625 = vrot.lane.b32.xlu0 %v1531_v33, %s6013_s24 }
 0x864   : > { %v1505_v45 = vpop.permute.xlu1 %1504 }
 0x865   : > { %v1517_v47 = vmul.f32 %v1505_v45, %v6361_v43  ;;  %v1509_v51 = vmul.f32 %v1505_v45, %v1497_v29  ;;  %v1543_v43 = vsub.f32 %v6336_v18, %v6372_v0  ;;  %v1786_v18 = vsub.f32 %v6343_v26, %v6386_v19  ;;  %v6461_v26 = vpop.eup %5899 }
 0x866   : > { %v1884_v0 = vmul.f32 1.442695, %v1881_v62 }
 0x867   : > { %1642 = vrot.lane.b32.xlu1 %v6400_v41, %s5997_s29  ;;  %1652 = vrot.lane.b32.xlu0 %v1535_v40, %s6013_s24  ;;  %v1545_v56 = vmul.f32 1.442695, %v1543_v43  ;;  %v1789_v2 = vmul.f32 1.442695, %v1786_v18 }
 0x868   : > { %v1511_v52 = vpop.permute.xlu1 %1510 }
 0x869   : > { %v6427_v54 = vadd.s32 %v1511_v52, %v1488_v23  ;;  %v6437_v59 = vadd.s32 %v1518_v36, %v1511_v52  ;;  %5901 = vpow2.f32 %v1545_v56 }
 0x86a   : > { %5903 = vpow2.f32 %v1686_v58 }
 0x86b   : > { %1719 = vrot.lane.b32.xlu1 %v6390_v25, %s6014_s25  ;;  %1590 = vrot.lane.b32.xlu0 %v6405_v35, %s6002_s21  ;;  %5905 = vpow2.f32 %v1882_v61 }
 0x86c   : > { %5907 = vpow2.f32 %v1684_v63 }
 0x86d   : > { %5909 = vpow2.f32 %v1884_v0 }
 0x86e   : > { %5911 = vpow2.f32 %v1789_v2 }
 0x86f   : > { %1753 = vrot.lane.b32.xlu1 %v6400_v41, %s6015_s26  ;;  %1598 = vrot.lane.b32.xlu0 %v1517_v47, %s6013_s24 }
 0x873   : > { %1572 = vrot.lane.b32.xlu1 %v1509_v51, %s6013_s24  ;;  %1644 = vrot.lane.b32.xlu0 %v6418_v3, %s5997_s29 }
 0x876   : > { %v6467_v7 = vpop.eup %5901 }
 0x877   : > { %1615 = vrot.lane.b32.xlu1 %v6427_v54, %s6016_s22  ;;  %1721 = vrot.lane.b32.xlu0 %v6405_v35, %s6014_s25  ;;  %v6469_v8 = vpop.eup %5903 }
 0x878   : > { %v6474_v9 = vpop.eup %5905 }
 0x879   : > { %v6476_v10 = vpop.eup %5907 }
 0x87a   : > { %v6480_v11 = vpop.eup %5909 }
 0x87b   : > { %1669 = vrot.lane.b32.xlu1 %v6437_v59, %s6014_s25  ;;  %1755 = vrot.lane.b32.xlu0 %v6418_v3, %s6015_s26  ;;  %v6482_v12 = vpop.eup %5911 }
 0x87f   : > { %1772 = vrot.lane.b32.xlu1 %v6437_v59, %s6008_s20  ;;  %1617 = vrot.lane.b32.xlu0 %v6447_v1, %s6016_s22 }
 0x883   : > { %1793 = vrot.lane.b32.xlu1 %v6455_v6, %s6000_s19  ;;  %1671 = vrot.lane.b32.xlu0 %v6453_v5, %s6014_s25 }
 0x887   : > { %1553 = vrot.lane.b32.xlu1 %v6461_v26, %s5998_s30  ;;  %1774 = vrot.lane.b32.xlu0 %v6453_v5, %s6008_s20 }
 0x88b   : > { %1692 = vrot.lane.b32.xlu1 %v6469_v8, %s6017_s16  ;;  %1551 = vrot.lane.b32.xlu0 %v6467_v7, %s5998_s30 }
 0x88f   : > { %1888 = vrot.lane.b32.xlu1 %v6474_v9, %s6018_s14  ;;  %1690 = vrot.lane.b32.xlu0 %v6476_v10, %s6017_s16 }
 0x893   : > { %1890 = vrot.lane.b32.xlu1 %v6480_v11, %s6018_s14  ;;  %1795 = vrot.lane.b32.xlu0 %v6482_v12, %s6000_s19  ;;  %s6020_s19 = smov 20  }
 0x897   : > { %1821 = vrot.lane.b32.xlu1 %v6390_v25, %s6008_s20  ;;  %1823 = vrot.lane.b32.xlu0 %v6405_v35, %s6008_s20 }
 0x89b   : > { %1839 = vrot.lane.b32.xlu1 %v6427_v54, %s6019_s11  ;;  %1841 = vrot.lane.b32.xlu0 %v6447_v1, %s6019_s11 }
 0x89f   : > { %1849 = vrot.lane.b32.xlu1 %v6400_v41, %s6009_s15  ;;  %1851 = vrot.lane.b32.xlu0 %v6418_v3, %s6009_s15 }
 0x8a3   : > { %1868 = vrot.lane.b32.xlu1 %v6437_v59, %s6020_s19  ;;  %1870 = vrot.lane.b32.xlu0 %v6453_v5, %s6020_s19 }
 0x8a7   : > { %1917 = vrot.lane.b32.xlu1 %v6390_v25, %s6020_s19  ;;  %1919 = vrot.lane.b32.xlu0 %v6405_v35, %s6020_s19 }
 0x8c9   : > { %v6503_v14 = vpop.permute.xlu1 %1623 }
 0x8cd   : > { %v6505_v15 = vpop.permute.xlu1 %1650 }
 0x8d1   : > { %v1589_v16 = vpop.permute.xlu1 %1588  ;;  %v6507_v17 = vpop.permute.xlu0 %1570 }
 0x8d2   : > { %1592 = vst.msk [vmem:[#allocation6] sm:$0xff] %vm1557_vm11, %v1589_v16 }
 0x8d5   : > { %v6510_v19 = vpop.permute.xlu1 %1596  ;;  %v6512_v20 = vpop.permute.xlu0 %1625 }
 0x8d9   : > { %v1643_v21 = vpop.permute.xlu1 %1642  ;;  %v6514_v22 = vpop.permute.xlu0 %1652 }
 0x8dd   : > { %v1720_v23 = vpop.permute.xlu1 %1719  ;;  %v1591_v24 = vpop.permute.xlu0 %1590 }
 0x8de   : > { %1593 = vst.msk [vmem:[#allocation6 + $0x8] sm:$0xff] %vm1557_vm11, %v1591_v24 }
 0x8e1   : > { %v1754_v25 = vpop.permute.xlu1 %1753  ;;  %v6517_v27 = vpop.permute.xlu0 %1598 }
 0x8e5   : > { %v6519_v28 = vpop.permute.xlu1 %1572  ;;  %v1645_v29 = vpop.permute.xlu0 %1644 }
 0x8e9   : > { %v1616_v30 = vpop.permute.xlu1 %1615  ;;  %v1722_v31 = vpop.permute.xlu0 %1721 }
 0x8ea   : > { %1619 = vst.msk [vmem:[#allocation6] sm:$0xff] %vm1612_vm12, %v1616_v30 }
 0x8eb   : > { %1646 = vst.msk [vmem:[#allocation6] sm:$0xff] %vm1639_vm13, %v1643_v21 }
 0x8ed   : > { %v1670_v32 = vpop.permute.xlu1 %1669  ;;  %v1756_v33 = vpop.permute.xlu0 %1755 }
 0x8ee   : > { %1673 = vst.msk [vmem:[#allocation6] sm:$0xff] %vm1666_vm14, %v1670_v32 }
 0x8ef   : > { %1723 = vst.msk [vmem:[#allocation6] sm:$0xff] %vm1716_vm15, %v1720_v23 }
 0x8f0   : > { %1738 = vst.msk [vmem:[#allocation6] sm:$0xff] %vm1735_vm0, %v6427_v54 }
 0x8f1   : > { %1757 = vst.msk [vmem:[#allocation6] sm:$0xff] %vm1750_vm1, %v1754_v25  ;;  %v1773_v34 = vpop.permute.xlu1 %1772  ;;  %v1618_v36 = vpop.permute.xlu0 %1617 }
 0x8f2   : > { %1776 = vst.msk [vmem:[#allocation6] sm:$0xff] %vm1769_vm2, %v1773_v34 }
 0x8f3   : > { %1620 = vst.msk [vmem:[#allocation6 + $0x8] sm:$0xff] %vm1612_vm12, %v1618_v36 }
 0x8f4   : > { %1647 = vst.msk [vmem:[#allocation6 + $0x8] sm:$0xff] %vm1639_vm13, %v1645_v29 }
 0x8f5   : > { %v1794_v37 = vpop.permute.xlu1 %1793  ;;  %v1672_v38 = vpop.permute.xlu0 %1671 }
 0x8f6   : > { %1674 = vst.msk [vmem:[#allocation6 + $0x8] sm:$0xff] %vm1666_vm14, %v1672_v38  ;;  %v1799_v13 = vsel %vm1557_vm11, %v1794_v37, 0.0 }
 0x8f7   : > { %1724 = vst.msk [vmem:[#allocation6 + $0x8] sm:$0xff] %vm1716_vm15, %v1722_v31 }
 0x8f8   : > { %1739 = vst.msk [vmem:[#allocation6 + $0x8] sm:$0xff] %vm1735_vm0, %v6447_v1 }
 0x8f9   : > { %v1554_v39 = vpop.permute.xlu1 %1553  ;;  %1758 = vst.msk [vmem:[#allocation6 + $0x8] sm:$0xff] %vm1750_vm1, %v1756_v33  ;;  %v1775_v40 = vpop.permute.xlu0 %1774 }
 0x8fa   : > { %1777 = vst.msk [vmem:[#allocation6 + $0x8] sm:$0xff] %vm1769_vm2, %v1775_v40  ;;  %v1561_v51 = vsel %vm1557_vm11, %v1554_v39, 0.0 }
 0x8fd   : > { %v1693_v42 = vpop.permute.xlu1 %1692  ;;  %v1552_v44 = vpop.permute.xlu0 %1551 }
 0x8fe   : > { %v1558_v35 = vsel %vm1557_vm11, %v1552_v44, 0.0  ;;  %v1699_v53 = vsel %vm1557_vm11, %v1693_v42, 0.0 }
 0x8ff   : > { %1559 = vadd.xlane.f32.xlu1 %v1558_v35 }
 0x901   : > { %v1889_v45 = vpop.permute.xlu1 %1888  ;;  %v1691_v46 = vpop.permute.xlu0 %1690 }
 0x902   : > { %v1696_v47 = vsel %vm1557_vm11, %v1691_v46, 0.0  ;;  %v1894_v50 = vsel %vm1557_vm11, %v1889_v45, 0.0 }
 0x903   : > { %1800 = vadd.xlane.f32.xlu1 %v1799_v13  ;;  %1697 = vadd.xlane.f32.xlu0 %v1696_v47 }
 0x905   : > { %v1891_v48 = vpop.permute.xlu1 %1890  ;;  %v1796_v49 = vpop.permute.xlu0 %1795 }
 0x906   : > { %v1802_v63 = vsel %vm1557_vm11, %v1796_v49, 0.0  ;;  %v1897_v18 = vsel %vm1557_vm11, %v1891_v48, 0.0 }
 0x907   : > { %1895 = vadd.xlane.f32.xlu1 %v1894_v50  ;;  %1562 = vadd.xlane.f32.xlu0 %v1561_v51 }
 0x909   : > { %v1822_v52 = vpop.permute.xlu1 %1821  ;;  %v1824_v43 = vpop.permute.xlu0 %1823 }
 0x90a   : > { %1825 = vst.msk [vmem:[#allocation6] sm:$0xff] %vm1536_vm8, %v1822_v52  ;;  %1826 = vst.msk [vmem:[#allocation6 + $0x8] sm:$0xff] %vm1536_vm8, %v1824_v43 }
 0x90b   : > { %1700 = vadd.xlane.f32.xlu1 %v1699_v53 }
 0x90d   : > { %v1840_v4 = vpop.permute.xlu1 %1839  ;;  %v1842_v55 = vpop.permute.xlu0 %1841 }
 0x90e   : > { %1843 = vst.msk [vmem:[#allocation6] sm:$0xff] %vm1675_vm9, %v1840_v4  ;;  %1844 = vst.msk [vmem:[#allocation6 + $0x8] sm:$0xff] %vm1675_vm9, %v1842_v55 }
 0x911   : > { %v1850_v56 = vpop.permute.xlu1 %1849  ;;  %v1852_v57 = vpop.permute.xlu0 %1851 }
 0x912   : > { %1853 = vst.msk [vmem:[#allocation6] sm:$0xff] %vm1778_vm10, %v1850_v56  ;;  %1854 = vst.msk [vmem:[#allocation6 + $0x8] sm:$0xff] %vm1778_vm10, %v1852_v57 }
 0x915   : > { %v1869_v58 = vpop.permute.xlu1 %1868  ;;  %v1871_v60 = vpop.permute.xlu0 %1870 }
 0x916   : > { %1872 = vst.msk [vmem:[#allocation6] sm:$0xff] %vm1865_vm7, %v1869_v58  ;;  %1873 = vst.msk [vmem:[#allocation6 + $0x8] sm:$0xff] %vm1865_vm7, %v1871_v60 }
 0x919   : > { %v1918_v61 = vpop.permute.xlu1 %1917  ;;  %v1920_v62 = vpop.permute.xlu0 %1919 }
 0x91a   : > { %1921 = vst.msk [vmem:[#allocation6] sm:$0xff] %vm1914_vm3, %v1918_v61  ;;  %1922 = vst.msk [vmem:[#allocation6 + $0x8] sm:$0xff] %vm1914_vm3, %v1920_v62 }
 0x91c   : > { %1936 = vrot.lane.b32.xlu1 %v6427_v54, %s6010_s0 }
 0x91d   : > { %1938 = vrot.lane.b32.xlu0 %v6447_v1, %s6010_s0  ;;  %s6022_s0 = smov 100  }
 0x920   : > { %1955 = vrot.lane.b32.xlu1 %v6400_v41, %s6021_s12 }
 0x921   : > { %1957 = vrot.lane.b32.xlu0 %v6418_v3, %s6021_s12 }
 0x940   : > { %1803 = vadd.xlane.f32.xlu0 %v1802_v63 }
 0x944   : > { %1898 = vadd.xlane.f32.xlu0 %v1897_v18 }
 0x988   : > { %v1560_v0 = vpop.xlane.xlu1 %1559 }
 0x989   : > { %5913 = vrcp.f32 %v1560_v0 }
 0x98c   : > { %v1801_v2 = vpop.xlane.xlu1 %1800  ;;  %v1698_v16 = vpop.xlane.xlu0 %1697 }
 0x98d   : > { %5915 = vrcp.f32 %v1801_v2 }
 0x98e   : > { %5917 = vrcp.f32 %v1698_v16 }
 0x990   : > { %v1896_v54 = vpop.xlane.xlu1 %1895  ;;  %v1563_v21 = vpop.xlane.xlu0 %1562 }
 0x991   : > { %5919 = vrcp.f32 %v1896_v54 }
 0x992   : > { %5921 = vrcp.f32 %v1563_v21 }
 0x994   : > { %v1701_v1 = vpop.xlane.xlu1 %1700  ;;  %v1939_v41 = vpop.permute.xlu0 %1938 }
 0x995   : > { %1941 = vst.msk [vmem:[#allocation6 + $0x8] sm:$0xff] %vm1933_vm4, %v1939_v41  ;;  %5923 = vrcp.f32 %v1701_v1 }
 0x996   : > { %v5914_v3 = vpop.eup %5913 }
 0x997   : > { %v1566_v23 = vmul.f32 %v5914_v3, %v6467_v7 }
 0x998   : > { %v1937_v24 = vpop.permute.xlu1 %1936  ;;  %v1958_v25 = vpop.permute.xlu0 %1957 }
 0x999   : > { %1940 = vst.msk [vmem:[#allocation6] sm:$0xff] %vm1933_vm4, %v1937_v24  ;;  %v1576_v29 = vmul.f32 %v6507_v17, %v1566_v23  ;;  %v1602_v34 = vmul.f32 %v6510_v19, %v1566_v23  ;;  %v1629_v38 = vmul.f32 %v6503_v14, %v1566_v23 }
 0x99a   : > { %1960 = vst.msk [vmem:[#allocation6 + $0x8] sm:$0xff] %vm1952_vm5, %v1958_v25  ;;  %v5916_v30 = vpop.eup %5915 }
 0x99b   : > { %v5918_v31 = vpop.eup %5917  ;;  %1580 = vrot.lane.b32.xlu1 %v1576_v29, %s5998_s30  ;;  %v6571_v7 = vmul.f32 %v5916_v30, %v6455_v6  ;;  %v1656_v6 = vmul.f32 %v6505_v15, %v1566_v23 }
 0x99c   : > { %v1704_v32 = vmul.f32 %v5918_v31, %v6476_v10  ;;  %v1956_v33 = vpop.permute.xlu1 %1955 }
 0x99d   : > { %1959 = vst.msk [vmem:[#allocation6] sm:$0xff] %vm1952_vm5, %v1956_v33  ;;  %v1809_v39 = vmul.f32 %v6571_v7, %v6507_v17  ;;  %v1827_v47 = vmul.f32 %v6571_v7, %v6510_v19  ;;  %v1855_v50 = vmul.f32 %v6571_v7, %v6505_v15  ;;  %v1845_v25 = vmul.f32 %v6571_v7, %v6503_v14 }
 0x99e   : > { %v1706_v36 = vmul.f32 %v1704_v32, %v6507_v17  ;;  %v5920_v37 = vpop.eup %5919  ;;  %v1740_v45 = vmul.f32 %v1704_v32, %v6503_v14 }
 0x99f   : > { %1606 = vrot.lane.b32.xlu1 %v1602_v34, %s6022_s0  ;;  %v1902_v10 = vmul.f32 %v5920_v37, %v6474_v9  ;;  %v5922_v40 = vpop.eup %5921  ;;  %v1725_v9 = vmul.f32 %v1704_v32, %v6510_v19 }
 0x9a0   : > { %1710 = vrot.lane.b32.xlu0 %v1706_v36, %s6023_s1  ;;  %v1567_v42 = vmul.f32 %v5922_v40, %v6461_v26  ;;  %v1759_v26 = vmul.f32 %v1704_v32, %v6505_v15 }
 0x9a1   : > { %v1904_v44 = vmul.f32 %v1902_v10, %v6507_v17  ;;  %v1923_v52 = vmul.f32 %v1902_v10, %v6510_v19  ;;  %v1961_v19 = vmul.f32 %v1902_v10, %v6505_v15 }
 0x9a2   : > { %v1577_v35 = vmul.f32 %v6519_v28, %v1567_v42  ;;  %v1603_v46 = vmul.f32 %v6517_v27, %v1567_v42  ;;  %v1630_v17 = vmul.f32 %v6512_v20, %v1567_v42  ;;  %v5924_v13 = vpop.eup %5923  ;;  %v1657_v49 = vmul.f32 %v6514_v22, %v1567_v42 }
 0x9a3   : > { %1633 = vrot.lane.b32.xlu1 %v1629_v38, %s6003_s2  ;;  %v1705_v48 = vmul.f32 %v5924_v13, %v6469_v8  ;;  %v1942_v8 = vmul.f32 %v1902_v10, %v6503_v14 }
 0x9a4   : > { %1813 = vrot.lane.b32.xlu0 %v1809_v39, %s5997_s29 }
 0x9a5   : > { %v1726_v51 = vmul.f32 %v1705_v48, %v6517_v27  ;;  %v1741_v43 = vmul.f32 %v1705_v48, %v6512_v20  ;;  %v1760_v53 = vmul.f32 %v1705_v48, %v6514_v22  ;;  %v1707_v4 = vmul.f32 %v1705_v48, %v6519_v28 }
 0x9a7   : > { %1660 = vrot.lane.b32.xlu1 %v1656_v6, %s6023_s1 }
 0x9a8   : > { %1908 = vrot.lane.b32.xlu0 %v1904_v44, %s6015_s26 }
 0x9ab   : > { %1729 = vrot.lane.b32.xlu1 %v1725_v9, %s6002_s21 }
 0x9ac   : > { %1582 = vrot.lane.b32.xlu0 %v1577_v35, %s5998_s30 }
 0x9af   : > { %1744 = vrot.lane.b32.xlu1 %v1740_v45, %s6016_s22 }
 0x9b0   : > { %1608 = vrot.lane.b32.xlu0 %v1603_v46, %s6022_s0 }
 0x9b3   : > { %1763 = vrot.lane.b32.xlu1 %v1759_v26, %s5997_s29 }
 0x9b4   : > { %1635 = vrot.lane.b32.xlu0 %v1630_v17, %s6003_s2 }
 0x9b7   : > { %1831 = vrot.lane.b32.xlu1 %v1827_v47, %s6014_s25 }
 0x9b8   : > { %1662 = vrot.lane.b32.xlu0 %v1657_v49, %s6023_s1 }
 0x9bb   : > { %1859 = vrot.lane.b32.xlu1 %v1855_v50, %s6015_s26 }
 0x9bc   : > { %1731 = vrot.lane.b32.xlu0 %v1726_v51, %s6002_s21 }
 0x9bf   : > { %1927 = vrot.lane.b32.xlu1 %v1923_v52, %s6008_s20 }
 0x9c0   : > { %1746 = vrot.lane.b32.xlu0 %v1741_v43, %s6016_s22 }
 0x9c3   : > { %1946 = vrot.lane.b32.xlu1 %v1942_v8, %s6019_s11 }
 0x9c4   : > { %1765 = vrot.lane.b32.xlu0 %v1760_v53, %s5997_s29 }
 0x9c7   : > { %1712 = vrot.lane.b32.xlu1 %v1707_v4, %s6023_s1 }
 0x9c9   : > { %v1804_v55 = vpop.xlane.xlu0 %1803 }
 0x9ca   : > { %5925 = vrcp.f32 %v1804_v55 }
 0x9cb   : > { %1965 = vrot.lane.b32.xlu1 %v1961_v19, %s6009_s15 }
 0x9cd   : > { %v1899_v56 = vpop.xlane.xlu0 %1898 }
 0x9ce   : > { %5927 = vrcp.f32 %v1899_v56 }
 0x9d7   : > { %v5926_v57 = vpop.eup %5925 }
 0x9d8   : > { %v6621_v58 = vmul.f32 %v5926_v57, %v6482_v12 }
 0x9da   : > { %v1810_v60 = vmul.f32 %v6621_v58, %v6519_v28  ;;  %v1828_v15 = vmul.f32 %v6621_v58, %v6517_v27  ;;  %v1856_v12 = vmul.f32 %v6621_v58, %v6514_v22  ;;  %v1846_v39 = vmul.f32 %v6621_v58, %v6512_v20 }
 0x9db   : > { %v5928_v61 = vpop.eup %5927 }
 0x9dc   : > { %v1903_v62 = vmul.f32 %v5928_v61, %v6480_v11  ;;  %1815 = vrot.lane.b32.xlu0 %v1810_v60, %s5997_s29 }
 0x9de   : > { %v1905_v63 = vmul.f32 %v1903_v62, %v6519_v28  ;;  %v1924_v11 = vmul.f32 %v1903_v62, %v6517_v27  ;;  %v1943_v18 = vmul.f32 %v1903_v62, %v6512_v20  ;;  %v1962_v28 = vmul.f32 %v1903_v62, %v6514_v22 }
 0x9e0   : > { %1833 = vrot.lane.b32.xlu0 %v1828_v15, %s6014_s25  ;;  %1910 = vrot.lane.b32.xlu1 %v1905_v63, %s6015_s26 }
 0x9e4   : > { %1861 = vrot.lane.b32.xlu0 %v1856_v12, %s6015_s26  ;;  %1974 = vrot.lane.b32.xlu1 %v6437_v59, %s6013_s24 }
 0x9e8   : > { %1929 = vrot.lane.b32.xlu0 %v1924_v11, %s6008_s20 }
 0x9ec   : > { %1948 = vrot.lane.b32.xlu0 %v1943_v18, %s6019_s11 }
 0x9f0   : > { %1967 = vrot.lane.b32.xlu0 %v1962_v28, %s6009_s15 }
 0x9f4   : > { %1976 = vrot.lane.b32.xlu0 %v6453_v5, %s6013_s24 }
 0xa0d   : > { %v1581_v0 = vpop.permute.xlu1 %1580 }
 0xa0e   : > { %1586 = vst.msk [vmem:[#allocation5] sm:$0xff] %vm1557_vm11, %v1581_v0 }
 0xa11   : > { %v1607_v2 = vpop.permute.xlu1 %1606 }
 0xa12   : > { %1613 = vst.msk [vmem:[#allocation5] sm:$0xff] %vm1612_vm12, %v1607_v2  ;;  %v1711_v59 = vpop.permute.xlu0 %1710 }
 0xa15   : > { %v1634_v27 = vpop.permute.xlu1 %1633 }
 0xa16   : > { %1640 = vst.msk [vmem:[#allocation5] sm:$0xff] %vm1639_vm13, %v1634_v27  ;;  %v1814_v16 = vpop.permute.xlu0 %1813 }
 0xa19   : > { %v1661_v54 = vpop.permute.xlu1 %1660 }
 0xa1a   : > { %1667 = vst.msk [vmem:[#allocation5] sm:$0xff] %vm1666_vm14, %v1661_v54  ;;  %v1909_v22 = vpop.permute.xlu0 %1908 }
 0xa1b   : > { %1717 = vst.msk [vmem:[#allocation5] sm:$0xff] %vm1716_vm15, %v1711_v59 }
 0xa1d   : > { %v1730_v21 = vpop.permute.xlu1 %1729 }
 0xa1e   : > { %1736 = vst.msk [vmem:[#allocation5] sm:$0xff] %vm1735_vm0, %v1730_v21  ;;  %v1583_v5 = vpop.permute.xlu0 %1582 }
 0xa1f   : > { %1587 = vst.msk [vmem:[#allocation5 + $0x8] sm:$0xff] %vm1557_vm11, %v1583_v5 }
 0xa21   : > { %v1745_v1 = vpop.permute.xlu1 %1744 }
 0xa22   : > { %1751 = vst.msk [vmem:[#allocation5] sm:$0xff] %vm1750_vm1, %v1745_v1  ;;  %v1609_v41 = vpop.permute.xlu0 %1608 }
 0xa23   : > { %1614 = vst.msk [vmem:[#allocation5 + $0x8] sm:$0xff] %vm1612_vm12, %v1609_v41 }
 0xa25   : > { %v1764_v3 = vpop.permute.xlu1 %1763 }
 0xa26   : > { %1770 = vst.msk [vmem:[#allocation5] sm:$0xff] %vm1769_vm2, %v1764_v3  ;;  %v1636_v23 = vpop.permute.xlu0 %1635 }
 0xa27   : > { %1819 = vst.msk [vmem:[#allocation5] sm:$0xff] %vm1536_vm8, %v1814_v16 }
 0xa28   : > { %1641 = vst.msk [vmem:[#allocation5 + $0x8] sm:$0xff] %vm1639_vm13, %v1636_v23 }
 0xa29   : > { %v1832_v24 = vpop.permute.xlu1 %1831 }
 0xa2a   : > { %1837 = vst.msk [vmem:[#allocation5] sm:$0xff] %vm1675_vm9, %v1832_v24  ;;  %v1663_v29 = vpop.permute.xlu0 %1662 }
 0xa2b   : > { %1668 = vst.msk [vmem:[#allocation5 + $0x8] sm:$0xff] %vm1666_vm14, %v1663_v29 }
 0xa2c   : > { %1847 = vst.msk [vmem:[#allocation5] sm:$0xff] %vm1778_vm10, %v1845_v25 }
 0xa2d   : > { %v1860_v30 = vpop.permute.xlu1 %1859 }
 0xa2e   : > { %1866 = vst.msk [vmem:[#allocation5] sm:$0xff] %vm1865_vm7, %v1860_v30  ;;  %v1732_v31 = vpop.permute.xlu0 %1731 }
 0xa2f   : > { %1915 = vst.msk [vmem:[#allocation5] sm:$0xff] %vm1914_vm3, %v1909_v22 }
 0xa31   : > { %v1928_v32 = vpop.permute.xlu1 %1927 }
 0xa32   : > { %1934 = vst.msk [vmem:[#allocation5] sm:$0xff] %vm1933_vm4, %v1928_v32  ;;  %v1747_v34 = vpop.permute.xlu0 %1746 }
 0xa35   : > { %v1947_v33 = vpop.permute.xlu1 %1946 }
 0xa36   : > { %1953 = vst.msk [vmem:[#allocation5] sm:$0xff] %vm1952_vm5, %v1947_v33  ;;  %v1766_v7 = vpop.permute.xlu0 %1765 }
 0xa39   : > { %v1713_v14 = vpop.permute.xlu1 %1712 }
 0xa3a   : > { %1718 = vst.msk [vmem:[#allocation5 + $0x8] sm:$0xff] %vm1716_vm15, %v1713_v14 }
 0xa3b   : > { %1737 = vst.msk [vmem:[#allocation5 + $0x8] sm:$0xff] %vm1735_vm0, %v1732_v31 }
 0xa3c   : > { %1752 = vst.msk [vmem:[#allocation5 + $0x8] sm:$0xff] %vm1750_vm1, %v1747_v34 }
 0xa3d   : > { %v1966_v36 = vpop.permute.xlu1 %1965  ;;  %1771 = vst.msk [vmem:[#allocation5 + $0x8] sm:$0xff] %vm1769_vm2, %v1766_v7 }
 0xa3e   : > { %1972 = vst.msk [vmem:[#allocation5] sm:$0xff] %vm1971_vm6, %v1966_v36 }
 0xa4e   : > { %v1816_v37 = vpop.permute.xlu0 %1815 }
 0xa4f   : > { %1820 = vst.msk [vmem:[#allocation5 + $0x8] sm:$0xff] %vm1536_vm8, %v1816_v37 }
 0xa52   : > { %v1911_v38 = vpop.permute.xlu1 %1910  ;;  %v1834_v10 = vpop.permute.xlu0 %1833 }
 0xa53   : > { %1838 = vst.msk [vmem:[#allocation5 + $0x8] sm:$0xff] %vm1675_vm9, %v1834_v10 }
 0xa54   : > { %1848 = vst.msk [vmem:[#allocation5 + $0x8] sm:$0xff] %vm1778_vm10, %v1846_v39 }
 0xa56   : > { %v1975_v40 = vpop.permute.xlu1 %1974  ;;  %v1862_v6 = vpop.permute.xlu0 %1861 }
 0xa57   : > { %1978 = vst.msk [vmem:[#allocation6] sm:$0xff] %vm1971_vm6, %v1975_v40 }
 0xa58   : > { %1867 = vst.msk [vmem:[#allocation5 + $0x8] sm:$0xff] %vm1865_vm7, %v1862_v6 }
 0xa59   : > { %1916 = vst.msk [vmem:[#allocation5 + $0x8] sm:$0xff] %vm1914_vm3, %v1911_v38 }
 0xa5a   : > { %v1930_v42 = vpop.permute.xlu0 %1929 }
 0xa5b   : > { %1935 = vst.msk [vmem:[#allocation5 + $0x8] sm:$0xff] %vm1933_vm4, %v1930_v42 }
 0xa5e   : > { %v1949_v44 = vpop.permute.xlu0 %1948 }
 0xa5f   : > { %1954 = vst.msk [vmem:[#allocation5 + $0x8] sm:$0xff] %vm1952_vm5, %v1949_v44 }
 0xa62   : > { %v1968_v9 = vpop.permute.xlu0 %1967 }
 0xa63   : > { %1973 = vst.msk [vmem:[#allocation5 + $0x8] sm:$0xff] %vm1971_vm6, %v1968_v9 }
 0xa66   : > { %v1977_v20 = vpop.permute.xlu0 %1976 }
 0xa67   : > { %1979 = vst.msk [vmem:[#allocation6 + $0x8] sm:$0xff] %vm1971_vm6, %v1977_v20 }
 0xa68 PF: > { %v5929_v35 = vld [vmem:[%s8392_s7 + $0x8] sm:$0xff]   ;;  %v2192_v45 = vlaneseq  ;;  %v5930_v46 = vld [vmem:[%s8392_s7] sm:$0xff]   ;;  %vm8504_vm7 = vcmask 261120   ;;  %v5933_v52 = vld [vmem:[%s6173_s13 + $0x10] sm:$0xff]   ;;  %v8410_v34 = vmov 0.0   ;;  %vm8505_vm8 = vmmov 0  }
 0xa69   : > { %5628 = vmatprep.subr.bf16.mxu0 %v5929_v35  ;;  %v2198_v26 = vld [vmem:[#allocation6] sm:$0xff]  ;;  %v5932_v51 = vld [vmem:[%s6173_s13 + $0x8] sm:$0xff]   ;;  %v5934_v4 = vld [vmem:[%s6173_s13 + $0x18] sm:$0xff]   ;;  %5648 = vmatprep.subr.bf16.mxu1 %v8410_v34  ;;  %s6026_s23 = smov 120   ;;  %s6027_s24 = smov 112  }
 0xa6a   : > { %v2201_v17 = vshrl.u32 %v2192_v45, 7  ;;  %v5931_v13 = vld [vmem:[%s6173_s13] sm:$0xff]   ;;  %5629 = vmatpush3.bf16.msra.mxu0 %v5929_v35  ;;  %v5936_v60 = vld [vmem:[%s6173_s13 + $0x28] sm:$0xff]   ;;  %v5937_v61 = vld [vmem:[%s6173_s13 + $0x30] sm:$0xff]   ;;  %5664 = vmatprep.mubr.msk.bf16.mxu1 %vm8505_vm8, %v8410_v34  ;;  %s6028_s25 = smov 104   ;;  %s6029_s26 = smov 8  }
 0xa6b   : > { %5630 = vmatprep.subr.bf16.mxu0 %v5930_v46  ;;  %5632 = vmatprep.mubr.msk.bf16.mxu0 %vm8504_vm7, %v5931_v13  ;;  %v5935_v55 = vld [vmem:[%s6173_s13 + $0x20] sm:$0xff]   ;;  %v5938_v11 = vld [vmem:[%s6173_s13 + $0x38] sm:$0xff]   ;;  %v2196_v5 = vld [vmem:[#allocation5] sm:$0xff]  ;;  %s5449_s13 = sshll.u32 %s5977_s27, 7  ;;  %s6030_s22 = smov 16  }
 0xa6c   : > { %v6691_v47 = vsub.s32 1, %v2201_v17  ;;  %v6693_v48 = vsub.s32 0, %v2201_v17  ;;  %v6706_v43 = vsub.s32 2, %v2201_v17  ;;  %v6715_v53 = vsub.s32 3, %v2201_v17  ;;  %v2197_v31 = vld [vmem:[#allocation5 + $0x8] sm:$0xff]  ;;  %s6031_s16 = smov 24  }
 0xa6d   : > { %v6724_v56 = vsub.s32 4, %v2201_v17  ;;  %v6733_v58 = vsub.s32 5, %v2201_v17  ;;  %v6742_v15 = vsub.s32 6, %v2201_v17  ;;  %v6751_v12 = vsub.s32 7, %v2201_v17  ;;  %p5450_p8 = scmp.ne.s32.totalorder %s5977_s27, 1 }
 0xa6e   : > { %8536 = vst [vmem:[#allocation12_spill] sm:$0xff] %v6691_v47  ;;  %8537 = vst [vmem:[#allocation13_spill] sm:$0xff] %v6693_v48  ;;  %v6697_v49 = vrot.slane %v2198_v26, %v6691_v47  ;;  %v6700_v50 = vrot.slane %v2198_v26, %v6693_v48  ;;  %5631 = vmatpush3.bf16.msra.mxu0 %v5930_v46  ;;  %v6713_v8 = vrot.slane %v2198_v26, %v6706_v43  ;;  %v2199_v28 = vld [vmem:[#allocation6 + $0x8] sm:$0xff]  ;;  %s8741_s19 = sld [smem:[#allocation73_spill]] (!%p5450_p8) }
 0xa6f   : > { %8538 = vst [vmem:[#allocation14_spill] sm:$0xff] %v6706_v43  ;;  %8539 = vst [vmem:[#allocation15_spill] sm:$0xff] %v6715_v53  ;;  %v6722_v19 = vrot.slane %v2198_v26, %v6715_v53  ;;  %v6731_v57 = vrot.slane %v2198_v26, %v6724_v56  ;;  %v6740_v62 = vrot.slane %v2198_v26, %v6733_v58  ;;  %5668 = vmatprep.subr.bf16.mxu0 %v8410_v34  ;;  %s8743_s29 = sld [smem:[#allocation74_spill]] (!%p5450_p8) }
 0xa70   : > { %2216 = vbcast.lane.b32.xlu1 %v6697_v49, 256  ;;  %2205 = vbcast.lane.b32.xlu0 %v6700_v50, 256  ;;  %8540 = vst [vmem:[#allocation16_spill] sm:$0xff] %v6724_v56  ;;  %8541 = vst [vmem:[#allocation17_spill] sm:$0xff] %v6733_v58  ;;  %v6749_v63 = vrot.slane %v2198_v26, %v6742_v15  ;;  %v6757_v18 = vrot.slane %v2198_v26, %v6751_v12  ;;  %s8748_s2 = sld [smem:[#allocation75_spill]] (!%p5450_p8) }
 0xa71   : > { %5633 = vmatmul.mubr.msk.bf16.vlgmr.msra.gmra.mxu0 %vm8504_vm7, %v5932_v51  ;;  %8542 = vst [vmem:[#allocation18_spill] sm:$0xff] %v6742_v15  ;;  %8543 = vst [vmem:[#allocation19_spill] sm:$0xff] %v6751_v12  ;;  %v6763_v0 = vrot.slane %v2199_v28, %v6693_v48  ;;  %v6768_v2 = vrot.slane %v2199_v28, %v6691_v47  ;;  %v6773_v59 = vrot.slane %v2199_v28, %v6706_v43  ;;  %s8751_s21 = sld [smem:[#allocation76_spill]] (!%p5450_p8) }
 0xa72   : > { %5636 = vmatprep.mubr.msk.bf16.mxu0 %vm8504_vm7, %v5933_v52  ;;  %v6778_v27 = vrot.slane %v2199_v28, %v6715_v53  ;;  %v6783_v16 = vrot.slane %v2199_v28, %v6724_v56  ;;  %v6788_v54 = vrot.slane %v2199_v28, %v6733_v58  ;;  %v6793_v22 = vrot.slane %v2199_v28, %v6742_v15  ;;  %s8752_s15 = sld [smem:[#allocation78_spill]] (!%p5450_p8) }
 0xa73   : > { %v6798_v21 = vrot.slane %v2199_v28, %v6751_v12  ;;  %v6803_v1 = vrot.slane %v2196_v5, %v6693_v48  ;;  %v6808_v41 = vrot.slane %v2196_v5, %v6691_v47  ;;  %v6813_v3 = vrot.slane %v2196_v5, %v6706_v43 }
 0xa74   : > { %2220 = vbcast.lane.b32.xlu1 %v6697_v49, 264  ;;  %2209 = vbcast.lane.b32.xlu0 %v6700_v50, 264  ;;  %v6818_v23 = vrot.slane %v2196_v5, %v6715_v53  ;;  %v6823_v24 = vrot.slane %v2196_v5, %v6724_v56  ;;  %v6828_v25 = vrot.slane %v2196_v5, %v6733_v58 }
 0xa75   : > { %v6833_v29 = vrot.slane %v2196_v5, %v6742_v15  ;;  %v6838_v30 = vrot.slane %v2196_v5, %v6751_v12  ;;  %v6843_v32 = vrot.slane %v2197_v31, %v6693_v48  ;;  %v6848_v33 = vrot.slane %v2197_v31, %v6691_v47 }
 0xa76   : > { %v6855_v14 = vrot.slane %v2197_v31, %v6706_v43  ;;  %v6860_v7 = vrot.slane %v2197_v31, %v6715_v53  ;;  %v6865_v36 = vrot.slane %v2197_v31, %v6724_v56  ;;  %v6870_v37 = vrot.slane %v2197_v31, %v6733_v58 }
 0xa77   : > { %8544 = vst [vmem:[#allocation20_spill] sm:$0xff] %v6833_v29  ;;  %8545 = vst [vmem:[#allocation21_spill] sm:$0xff] %v6838_v30  ;;  %v6879_v39 = vrot.slane %v2197_v31, %v6742_v15  ;;  %v6888_v42 = vrot.slane %v2197_v31, %v6751_v12  ;;  %v2194_v12 = vstv %s5449_s13 }
 0xa78   : > { %2231 = vbcast.lane.b32.xlu1 %v6713_v8, 264  ;;  %2227 = vbcast.lane.b32.xlu0 %v6713_v8, 256 }
 0xa79   : > { %5637 = vmatmul.mubr.msk.bf16.gmra.mxu0 %vm8504_vm7, %v5934_v4  ;;  %8546 = vst [vmem:[#allocation22_spill] sm:$0xff] %v6879_v39  ;;  %8547 = vst [vmem:[#allocation23_spill] sm:$0xff] %v6888_v42 }
 0xa7a   : > { %5640 = vmatprep.mubr.msk.bf16.mxu0 %vm8504_vm7, %v5935_v55 }
 0xa7c   : > { %2242 = vbcast.lane.b32.xlu1 %v6722_v19, 264  ;;  %2238 = vbcast.lane.b32.xlu0 %v6722_v19, 256 }
 0xa80   : > { %2253 = vbcast.lane.b32.xlu1 %v6731_v57, 264  ;;  %2249 = vbcast.lane.b32.xlu0 %v6731_v57, 256 }
 0xa81   : > { %5641 = vmatmul.mubr.msk.bf16.gmra.mxu0 %vm8504_vm7, %v5936_v60 }
 0xa82   : > { %5644 = vmatprep.mubr.msk.bf16.mxu0 %vm8504_vm7, %v5937_v61 }
 0xa84   : > { %2264 = vbcast.lane.b32.xlu1 %v6740_v62, 264  ;;  %2260 = vbcast.lane.b32.xlu0 %v6740_v62, 256 }
 0xa88   : > { %2275 = vbcast.lane.b32.xlu1 %v6749_v63, 264  ;;  %2271 = vbcast.lane.b32.xlu0 %v6749_v63, 256 }
 0xa89   : > { %5645 = vmatmul.mubr.msk.bf16.gmra.mxu0 %vm8504_vm7, %v5938_v11 }
 0xa8a   : > { %5684 = vmatprep.mubr.msk.bf16.mxu0 %vm8505_vm8, %v8410_v34 }
 0xa8c   : > { %2286 = vbcast.lane.b32.xlu1 %v6757_v18, 264  ;;  %2282 = vbcast.lane.b32.xlu0 %v6757_v18, 256 }
 0xa90   : > { %2297 = vbcast.lane.b32.xlu1 %v6763_v0, 264  ;;  %2293 = vbcast.lane.b32.xlu0 %v6763_v0, 256 }
 0xa94   : > { %2308 = vbcast.lane.b32.xlu1 %v6768_v2, 264  ;;  %2304 = vbcast.lane.b32.xlu0 %v6768_v2, 256 }
 0xa98   : > { %2319 = vbcast.lane.b32.xlu1 %v6773_v59, 264  ;;  %2315 = vbcast.lane.b32.xlu0 %v6773_v59, 256 }
 0xa9c   : > { %2330 = vbcast.lane.b32.xlu1 %v6778_v27, 264  ;;  %2326 = vbcast.lane.b32.xlu0 %v6778_v27, 256 }
 0xaa0   : > { %2341 = vbcast.lane.b32.xlu1 %v6783_v16, 264  ;;  %2337 = vbcast.lane.b32.xlu0 %v6783_v16, 256 }
 0xaa4   : > { %2352 = vbcast.lane.b32.xlu1 %v6788_v54, 264  ;;  %2348 = vbcast.lane.b32.xlu0 %v6788_v54, 256 }
 0xaa8   : > { %2363 = vbcast.lane.b32.xlu1 %v6793_v22, 264  ;;  %2359 = vbcast.lane.b32.xlu0 %v6793_v22, 256 }
 0xaac   : > { %2374 = vbcast.lane.b32.xlu1 %v6798_v21, 264  ;;  %2370 = vbcast.lane.b32.xlu0 %v6798_v21, 256 }
 0xab0   : > { %2417 = vbcast.lane.b32.xlu1 %v6803_v1, 264  ;;  %2413 = vbcast.lane.b32.xlu0 %v6803_v1, 256 }
 0xab4   : > { %2428 = vbcast.lane.b32.xlu1 %v6808_v41, 264  ;;  %2424 = vbcast.lane.b32.xlu0 %v6808_v41, 256 }
 0xab8   : > { %2439 = vbcast.lane.b32.xlu1 %v6813_v3, 264  ;;  %2435 = vbcast.lane.b32.xlu0 %v6813_v3, 256 }
 0xabc   : > { %2450 = vbcast.lane.b32.xlu1 %v6818_v23, 264  ;;  %2446 = vbcast.lane.b32.xlu0 %v6818_v23, 256 }
 0xac0   : > { %2461 = vbcast.lane.b32.xlu1 %v6823_v24, 264  ;;  %2457 = vbcast.lane.b32.xlu0 %v6823_v24, 256 }
 0xac4   : > { %2472 = vbcast.lane.b32.xlu1 %v6828_v25, 264  ;;  %2468 = vbcast.lane.b32.xlu0 %v6828_v25, 256 }
 0xac8   : > { %2483 = vbcast.lane.b32.xlu1 %v6833_v29, 264  ;;  %2479 = vbcast.lane.b32.xlu0 %v6833_v29, 256 }
 0xacc   : > { %2494 = vbcast.lane.b32.xlu1 %v6838_v30, 264  ;;  %2490 = vbcast.lane.b32.xlu0 %v6838_v30, 256 }
 0xad0   : > { %2505 = vbcast.lane.b32.xlu1 %v6843_v32, 264  ;;  %2501 = vbcast.lane.b32.xlu0 %v6843_v32, 256 }
 0xad4   : > { %2516 = vbcast.lane.b32.xlu1 %v6848_v33, 264  ;;  %2512 = vbcast.lane.b32.xlu0 %v6848_v33, 256 }
 0xad8   : > { %2527 = vbcast.lane.b32.xlu1 %v6855_v14, 264  ;;  %2523 = vbcast.lane.b32.xlu0 %v6855_v14, 256 }
 0xadc   : > { %2538 = vbcast.lane.b32.xlu1 %v6860_v7, 264  ;;  %2534 = vbcast.lane.b32.xlu0 %v6860_v7, 256 }
 0xae0   : > { %2549 = vbcast.lane.b32.xlu1 %v6865_v36, 264  ;;  %2545 = vbcast.lane.b32.xlu0 %v6865_v36, 256 }
 0xae2   : > { %v6872_v38 = vpop.permute.xlu1 %2216  ;;  %v6874_v10 = vpop.permute.xlu0 %2205 }
 0xae4   : > { %2560 = vbcast.lane.b32.xlu1 %v6870_v37, 264  ;;  %2556 = vbcast.lane.b32.xlu0 %v6870_v37, 256 }
 0xae6   : > { %v6881_v40 = vpop.permute.xlu1 %2220  ;;  %v6883_v6 = vpop.permute.xlu0 %2209 }
 0xae8   : > { %2571 = vbcast.lane.b32.xlu1 %v6879_v39, 264  ;;  %2567 = vbcast.lane.b32.xlu0 %v6879_v39, 256 }
 0xaea   : > { %v6890_v44 = vpop.permute.xlu1 %2231  ;;  %v6892_v9 = vpop.permute.xlu0 %2227 }
 0xaec   : > { %2582 = vbcast.lane.b32.xlu1 %v6888_v42, 264  ;;  %2578 = vbcast.lane.b32.xlu0 %v6888_v42, 256 }
 0xaee   : > { %v6896_v20 = vpop.permute.xlu1 %2242  ;;  %v6898_v35 = vpop.permute.xlu0 %2238 }
 0xaf0   : > { %2861 = vbcast.lane.b32.xlu1 %v6700_v50, 280  ;;  %2857 = vbcast.lane.b32.xlu0 %v6700_v50, 272 }
 0xaf2   : > { %v6902_v46 = vpop.permute.xlu1 %2253  ;;  %v6904_v26 = vpop.permute.xlu0 %2249 }
 0xaf4   : > { %2873 = vbcast.lane.b32.xlu1 %v6697_v49, 280  ;;  %2869 = vbcast.lane.b32.xlu0 %v6697_v49, 272 }
 0xaf6   : > { %v6912_v17 = vpop.permute.xlu1 %2264  ;;  %v6914_v13 = vpop.permute.xlu0 %2260 }
 0xaf8   : > { %2885 = vbcast.lane.b32.xlu1 %v6713_v8, 280  ;;  %2881 = vbcast.lane.b32.xlu0 %v6713_v8, 272 }
 0xafa   : > { %v6918_v50 = vpop.permute.xlu1 %2275  ;;  %v6920_v51 = vpop.permute.xlu0 %2271 }
 0xafc   : > { %2897 = vbcast.lane.b32.xlu1 %v6722_v19, 280  ;;  %2893 = vbcast.lane.b32.xlu0 %v6722_v19, 272 }
 0xafe   : > { %v6924_v49 = vpop.permute.xlu1 %2286  ;;  %v6926_v52 = vpop.permute.xlu0 %2282 }
 0xb00   : > { %2909 = vbcast.lane.b32.xlu1 %v6731_v57, 280  ;;  %2905 = vbcast.lane.b32.xlu0 %v6731_v57, 272 }
 0xb02   : > { %v6930_v4 = vpop.permute.xlu1 %2297  ;;  %v6932_v55 = vpop.permute.xlu0 %2293 }
 0xb04   : > { %2921 = vbcast.lane.b32.xlu1 %v6740_v62, 280  ;;  %2917 = vbcast.lane.b32.xlu0 %v6740_v62, 272 }
 0xb06   : > { %v6936_v8 = vpop.permute.xlu1 %2308  ;;  %v6938_v60 = vpop.permute.xlu0 %2304 }
 0xb08   : > { %2933 = vbcast.lane.b32.xlu1 %v6749_v63, 280  ;;  %2929 = vbcast.lane.b32.xlu0 %v6749_v63, 272 }
 0xb0a   : > { %v6942_v19 = vpop.permute.xlu1 %2319  ;;  %v6944_v61 = vpop.permute.xlu0 %2315 }
 0xb0c   : > { %2945 = vbcast.lane.b32.xlu1 %v6757_v18, 280  ;;  %2941 = vbcast.lane.b32.xlu0 %v6757_v18, 272 }
 0xb0e   : > { %v6948_v57 = vpop.permute.xlu1 %2330  ;;  %v6950_v62 = vpop.permute.xlu0 %2326 }
 0xb10   : > { %2957 = vbcast.lane.b32.xlu1 %v6763_v0, 280  ;;  %2953 = vbcast.lane.b32.xlu0 %v6763_v0, 272  ;;  %v2193_v0 = vand.u32 127, %v2192_v45 }
 0xb12   : > { %v6954_v11 = vpop.permute.xlu1 %2341  ;;  %v6956_v63 = vpop.permute.xlu0 %2337 }
 0xb14   : > { %2969 = vbcast.lane.b32.xlu1 %v6768_v2, 280  ;;  %2965 = vbcast.lane.b32.xlu0 %v6768_v2, 272 }
 0xb16   : > { %v6960_v28 = vpop.permute.xlu1 %2352  ;;  %v6962_v5 = vpop.permute.xlu0 %2348 }
 0xb18   : > { %2981 = vbcast.lane.b32.xlu1 %v6773_v59, 280  ;;  %2977 = vbcast.lane.b32.xlu0 %v6773_v59, 272  ;;  %v6980_v59 = vadd.s32 %v2194_v12, %v2193_v0 }
 0xb1a   : > { %v6966_v18 = vpop.permute.xlu1 %2363  ;;  %v6968_v31 = vpop.permute.xlu0 %2359  ;;  %vm2376_vm9 = vcmp.eq.s32.totalorder %v6980_v59, %v6874_v10  ;;  %vm2377_vm10 = vcmp.eq.s32.totalorder %v6980_v59, %v6883_v6  ;;  %vm2378_vm11 = vcmp.eq.s32.totalorder %v6980_v59, %v6872_v38  ;;  %vm2379_vm12 = vcmp.eq.s32.totalorder %v6980_v59, %v6881_v40 }
 0xb1b   : > { %vm2381_vm13 = vcmp.eq.s32.totalorder %v6980_v59, %v6890_v44  ;;  %vm2380_vm14 = vcmp.eq.s32.totalorder %v6980_v59, %v6892_v9  ;;  %vm2383_vm15 = vcmp.eq.s32.totalorder %v6980_v59, %v6896_v20  ;;  %vm2382_vm0 = vcmp.eq.s32.totalorder %v6980_v59, %v6898_v35 }
 0xb1c   : > { %2993 = vbcast.lane.b32.xlu1 %v6778_v27, 280  ;;  %2989 = vbcast.lane.b32.xlu0 %v6778_v27, 272  ;;  %vm2385_vm1 = vcmp.eq.s32.totalorder %v6980_v59, %v6902_v46  ;;  %vm2384_vm2 = vcmp.eq.s32.totalorder %v6980_v59, %v6904_v26  ;;  %vm2387_vm3 = vcmp.eq.s32.totalorder %v6980_v59, %v6912_v17 }
 0xb1d   : > { %vm2386_vm4 = vcmp.eq.s32.totalorder %v6980_v59, %v6914_v13  ;;  %vm2389_vm5 = vcmp.eq.s32.totalorder %v6980_v59, %v6918_v50  ;;  %vm2388_vm6 = vcmp.eq.s32.totalorder %v6980_v59, %v6920_v51 }
 0xb1e   : > { %v6974_v2 = vpop.permute.xlu1 %2374  ;;  %v6976_v34 = vpop.permute.xlu0 %2370 }
 0xb20   : > { %3005 = vbcast.lane.b32.xlu1 %v6783_v16, 280  ;;  %3001 = vbcast.lane.b32.xlu0 %v6783_v16, 272 }
 0xb22   : > { %v2418_v15 = vpop.permute.xlu1 %2417  ;;  %v2414_v58 = vpop.permute.xlu0 %2413 }
 0xb23   : > { %v2585_v56 = vsel %vm2377_vm10, %v2418_v15, 0.0  ;;  %v2584_v53 = vsel %vm2376_vm9, %v2414_v58, 0.0  ;;  %vm2391_vm9 = vcmp.eq.s32.totalorder %v6980_v59, %v6924_v49  ;;  %vm2390_vm10 = vcmp.eq.s32.totalorder %v6980_v59, %v6926_v52 }
 0xb24   : > { %3017 = vbcast.lane.b32.xlu1 %v6788_v54, 280  ;;  %3013 = vbcast.lane.b32.xlu0 %v6788_v54, 272  ;;  %v2616_v12 = vadd.f32 %v2585_v56, %v2584_v53 }
 0xb26   : > { %v2429_v45 = vpop.permute.xlu1 %2428  ;;  %v2425_v27 = vpop.permute.xlu0 %2424  ;;  %v2617_v54 = vrot.slane %v2616_v12, 4 }
 0xb27   : > { %v2587_v58 = vsel %vm2379_vm12, %v2429_v45, 0.0  ;;  %v2586_v15 = vsel %vm2378_vm11, %v2425_v27, 0.0  ;;  %vm2393_vm11 = vcmp.eq.s32.totalorder %v6980_v59, %v6930_v4  ;;  %vm2392_vm12 = vcmp.eq.s32.totalorder %v6980_v59, %v6932_v55 }
 0xb28   : > { %3029 = vbcast.lane.b32.xlu1 %v6793_v22, 280  ;;  %3025 = vbcast.lane.b32.xlu0 %v6793_v22, 272  ;;  %v2623_v10 = vadd.f32 %v2587_v58, %v2586_v15  ;;  %v2618_v40 = vadd.f32 %v2617_v54, %v2616_v12 }
 0xb2a   : > { %v2440_v16 = vpop.permute.xlu1 %2439  ;;  %v2436_v0 = vpop.permute.xlu0 %2435  ;;  %v2624_v27 = vrot.slane %v2623_v10, 4  ;;  %v2619_v15 = vrot.slane %v2618_v40, 2 }
 0xb2b   : > { %v2589_v53 = vsel %vm2381_vm13, %v2440_v16, 0.0  ;;  %v2588_v56 = vsel %vm2380_vm14, %v2436_v0, 0.0  ;;  %vm2395_vm13 = vcmp.eq.s32.totalorder %v6980_v59, %v6936_v8  ;;  %vm2394_vm14 = vcmp.eq.s32.totalorder %v6980_v59, %v6938_v60 }
 0xb2c   : > { %3041 = vbcast.lane.b32.xlu1 %v6798_v21, 280  ;;  %3037 = vbcast.lane.b32.xlu0 %v6798_v21, 272  ;;  %v2630_v6 = vadd.f32 %v2589_v53, %v2588_v56  ;;  %v2625_v56 = vadd.f32 %v2624_v27, %v2623_v10 }
 0xb2e   : > { %v2451_v22 = vpop.permute.xlu1 %2450  ;;  %v2447_v38 = vpop.permute.xlu0 %2446  ;;  %v2631_v0 = vrot.slane %v2630_v6, 4 }
 0xb2f   : > { %v2591_v44 = vsel %vm2383_vm15, %v2451_v22, 0.0  ;;  %v2590_v21 = vsel %vm2382_vm0, %v2447_v38, 0.0  ;;  %vm2397_vm15 = vcmp.eq.s32.totalorder %v6980_v59, %v6942_v19  ;;  %vm2396_vm0 = vcmp.eq.s32.totalorder %v6980_v59, %v6944_v61 }
 0xb30   : > { %3093 = vbcast.lane.b32.xlu1 %v6808_v41, 272  ;;  %3081 = vbcast.lane.b32.xlu0 %v6803_v1, 272  ;;  %v2637_v58 = vadd.f32 %v2591_v44, %v2590_v21  ;;  %v2632_v54 = vadd.f32 %v2631_v0, %v2630_v6  ;;  %v2626_v21 = vrot.slane %v2625_v56, 2 }
 0xb31   : > { %v7006_v16 = vpop.f32.mrf.mxu0 }
 0xb32   : > { %v2462_v9 = vpop.permute.xlu1 %2461  ;;  %v2458_v45 = vpop.permute.xlu0 %2457  ;;  %v2638_v22 = vrot.slane %v2637_v58, 4  ;;  %v2633_v43 = vrot.slane %v2632_v54, 2  ;;  %v2627_v48 = vadd.f32 %v2626_v21, %v2625_v56 }
 0xb33   : > { %v7010_v20 = vpop.f32.mrf.mxu0  ;;  %v2593_v6 = vsel %vm2385_vm1, %v2462_v9, 0.0  ;;  %v2592_v27 = vsel %vm2384_vm2, %v2458_v45, 0.0  ;;  %vm2399_vm1 = vcmp.eq.s32.totalorder %v6980_v59, %v6948_v57  ;;  %vm2398_vm2 = vcmp.eq.s32.totalorder %v6980_v59, %v6950_v62 }
 0xb34   : > { %3177 = vbcast.lane.b32.xlu1 %v6843_v32, 272  ;;  %3085 = vbcast.lane.b32.xlu0 %v6803_v1, 280  ;;  %v2620_v1 = vadd.f32 %v2619_v15, %v2618_v40  ;;  %v2644_v26 = vadd.f32 %v2593_v6, %v2592_v27  ;;  %v2634_v30 = vadd.f32 %v2633_v43, %v2632_v54  ;;  %v2628_v13 = vrot.slane %v2627_v48, 1 }
 0xb35   : > { %v7012_v12 = vpop.f32.mrf.mxu0 }
 0xb36   : > { %v2473_v35 = vpop.permute.xlu1 %2472  ;;  %v2469_v53 = vpop.permute.xlu0 %2468  ;;  %v2621_v47 = vrot.slane %v2620_v1, 1  ;;  %v2645_v17 = vrot.slane %v2644_v26, 4  ;;  %v7081_v29 = vadd.f32 %v2628_v13, %v2627_v48 }
 0xb37   : > { %v7016_v38 = vpop.f32.mrf.mxu0  ;;  %v2595_v56 = vsel %vm2387_vm3, %v2473_v35, 0.0  ;;  %v2594_v54 = vsel %vm2386_vm4, %v2469_v53, 0.0  ;;  %vm2401_vm3 = vcmp.eq.s32.totalorder %v6980_v59, %v6954_v11  ;;  %vm2400_vm4 = vcmp.eq.s32.totalorder %v6980_v59, %v6956_v63 }
 0xb38   : > { %3189 = vbcast.lane.b32.xlu1 %v6848_v33, 272  ;;  %3097 = vbcast.lane.b32.xlu0 %v6808_v41, 280  ;;  %v2639_v41 = vadd.f32 %v2638_v22, %v2637_v58  ;;  %v7048_v43 = vadd.f32 %v2621_v47, %v2620_v1  ;;  %v2635_v47 = vrot.slane %v2634_v30, 1  ;;  %v7063_v22 = vld [vmem:[%s8393_s8] ss:$0 sm:$0xff]  ;;  %v2646_v21 = vadd.f32 %v2645_v17, %v2644_v26 }
 0xb39   : > { %v7026_v0 = vpop.f32.mrf.mxu0  ;;  %v2651_v6 = vadd.f32 %v2595_v56, %v2594_v54  ;;  %v2132_v26 = vadd.f32 %v7012_v12, %v7063_v22  ;;  %v7137_v52 = vadd.f32 %v7063_v22, %v7010_v20  ;;  %v8551_v11 = vmov 0.0  }
 0xb3a   : > { %v7022_v44 = vpop.permute.xlu1 %2483  ;;  %v7024_v10 = vpop.permute.xlu0 %2479  ;;  %v7093_v1 = vadd.f32 %v2635_v47, %v2634_v30  ;;  %v2647_v55 = vrot.slane %v2646_v21, 2 }
 0xb3b   : > { %v7030_v46 = vpop.f32.mrf.mxu0  ;;  %v2597_v30 = vsel %vm2389_vm5, %v7022_v44, 0.0  ;;  %v2652_v12 = vrot.slane %v2651_v6, 4  ;;  %vm2403_vm5 = vcmp.eq.s32.totalorder %v6980_v59, %v6960_v28 }
 0xb3c   : > { %3109 = vbcast.lane.b32.xlu1 %v6813_v3, 280  ;;  %3181 = vbcast.lane.b32.xlu0 %v6843_v32, 280  ;;  %v2640_v32 = vrot.slane %v2639_v41, 2  ;;  %v7149_v20 = vadd.f32 %v2647_v55, %v2646_v21 }
 0xb3d   : > { %v7032_v42 = vpop.f32.mrf.mxu0 }
 0xb3e   : > { %v2495_v40 = vpop.permute.xlu1 %2494  ;;  %v2491_v15 = vpop.permute.xlu0 %2490  ;;  %v2641_v35 = vadd.f32 %v2640_v32, %v2639_v41 }
 0xb3f   : > { %v7042_v9 = vpop.f32.mrf.mxu0  ;;  %v2599_v50 = vsel %vm2391_vm9, %v2495_v40, 0.0  ;;  %v2598_v51 = vsel %vm2390_vm10, %v2491_v15, 0.0  ;;  %v2732_v40 = vpack.c.bf16 %v7093_v1, %v7093_v1  ;;  %vm2405_vm9 = vcmp.eq.s32.totalorder %v6980_v59, %v6966_v18 }
 0xb40   : > { %3205 = vbcast.lane.b32.xlu1 %v6855_v14, 280  ;;  %3193 = vbcast.lane.b32.xlu0 %v6848_v33, 280  ;;  %8548 = vst [vmem:[#allocation24_spill] sm:$0xff] %v7042_v9  ;;  %v2665_v19 = vadd.f32 %v2599_v50, %v2598_v51  ;;  %vm2404_vm10 = vcmp.eq.s32.totalorder %v6980_v59, %v6968_v31 }
 0xb41   : > { %v7052_v33 = vpop.f32.mrf.mxu0 }
 0xb42   : > { %v2506_v45 = vpop.permute.xlu1 %2505  ;;  %v2502_v58 = vpop.permute.xlu0 %2501  ;;  %v2666_v57 = vrot.slane %v2665_v19, 4  ;;  %v2161_v63 = vadd.f32 %v7052_v33, %v7063_v22 }
 0xb43   : > { %v7073_v53 = vpop.f32.mrf.mxu0  ;;  %v2601_v48 = vsel %vm2393_vm11, %v2506_v45, 0.0  ;;  %v2600_v8 = vsel %vm2392_vm12, %v2502_v58, 0.0  ;;  %vm2407_vm11 = vcmp.eq.s32.totalorder %v6980_v59, %v6974_v2  ;;  %vm2406_vm12 = vcmp.eq.s32.totalorder %v6980_v59, %v6976_v34 }
 0xb44   : > { %3121 = vbcast.lane.b32.xlu1 %v6818_v23, 280  ;;  %3105 = vbcast.lane.b32.xlu0 %v6813_v3, 272  ;;  %v2129_v3 = vadd.f32 %v7006_v16, %v7063_v22  ;;  %v2642_v16 = vrot.slane %v2641_v35, 1  ;;  %v2672_v17 = vadd.f32 %v2601_v48, %v2600_v8  ;;  %v2153_v28 = vadd.f32 %v7063_v22, %v7073_v53 }
 0xb45   : > { %v7091_v9 = vpop.f32.mrf.mxu0 }
 0xb46   : > { %v2517_v27 = vpop.permute.xlu1 %2516  ;;  %v2513_v39 = vpop.permute.xlu0 %2512  ;;  %v7139_v15 = vpack.c.bf16 %v2132_v26, %v2129_v3  ;;  %v7142_v56 = vadd.f32 %v2642_v16, %v2641_v35  ;;  %v7153_v3 = vadd.f32 %v7063_v22, %v7016_v38  ;;  %v2673_v26 = vrot.slane %v2672_v17, 4 }
 0xb47   : > { %v2603_v41 = vsel %vm2395_vm13, %v2517_v27, 0.0  ;;  %v2602_v32 = vsel %vm2394_vm14, %v2513_v39, 0.0  ;;  %v2596_v39 = vsel %vm2388_vm6, %v7024_v10, 0.0  ;;  %v7113_v4 = vpop.f32.mrf.mxu0  ;;  %v2731_v10 = vpack.c.bf16 %v7081_v29, %v7081_v29  ;;  %v8556_v2 = vld [vmem:[#allocation24_spill] sm:$0xff] }
 0xb48   : > { %3217 = vbcast.lane.b32.xlu1 %v6860_v7, 280  ;;  %v2679_v60 = vadd.f32 %v2603_v41, %v2602_v32  ;;  %3201 = vbcast.lane.b32.xlu0 %v6855_v14, 272  ;;  %8549 = vst [vmem:[#allocation25_spill] sm:$0xff] %v7139_v15  ;;  %v2658_v13 = vadd.f32 %v2597_v30, %v2596_v39  ;;  %vm8512_vm13 = vcmask 1041409   ;;  %vm8511_vm14 = vcmask 1042434  }
 0xb49   : > { %v5646_v49 = vpop.f32.mrf.mxu0  ;;  %vm2402_vm6 = vcmp.eq.s32.totalorder %v6980_v59, %v6962_v5  ;;  %v2653_v27 = vadd.f32 %v2652_v12, %v2651_v6  ;;  %v7164_v38 = vadd.f32 %v7026_v0, %v7063_v22  ;;  %v2733_v39 = vpack.c.bf16 %v7142_v56, %v7142_v56 }
 0xb4a   : > { %v2528_v44 = vpop.permute.xlu1 %2527  ;;  %v2524_v14 = vpop.permute.xlu0 %2523  ;;  %v2680_v54 = vrot.slane %v2679_v60, 4  ;;  %v2177_v35 = vadd.f32 %v5646_v49, %v7063_v22  ;;  %v2659_v6 = vrot.slane %v2658_v13, 4  ;;  %v7178_v0 = vadd.f32 %v7063_v22, %v7030_v46 }
 0xb4b   : > { %v2605_v45 = vsel %vm2397_vm15, %v2528_v44, 0.0  ;;  %v2604_v58 = vsel %vm2396_vm0, %v2524_v14, 0.0  ;;  %v2168_v61 = vpop.f32.mrf.mxu0  ;;  %v2156_v5 = vadd.f32 %v7063_v22, %v7113_v4  ;;  %vm8510_vm15 = vcmask 1043459  }
 0xb4c   : > { %3133 = vbcast.lane.b32.xlu1 %v6823_v24, 280  ;;  %v2686_v47 = vadd.f32 %v2605_v45, %v2604_v58  ;;  %3117 = vbcast.lane.b32.xlu0 %v6818_v23, 272  ;;  %v2681_v55 = vadd.f32 %v2680_v54, %v2679_v60  ;;  %v2169_v12 = vadd.f32 %v7063_v22, %v2168_v61  ;;  %v2654_v54 = vrot.slane %v2653_v27, 2 }
 0xb4d   : > { %v5647_v8 = vpop.f32.mrf.mxu0  ;;  %v2674_v45 = vadd.f32 %v2673_v26, %v2672_v17  ;;  %v2660_v46 = vadd.f32 %v2659_v6, %v2658_v13  ;;  %v2649_v17 = vrot.slane %v7149_v20, 1  ;;  %v2164_v13 = vadd.f32 %v7091_v9, %v7063_v22 }
 0xb4e   : > { %v2539_v41 = vpop.permute.xlu1 %2538  ;;  %v2535_v32 = vpop.permute.xlu0 %2534  ;;  %v2687_v23 = vrot.slane %v2686_v47, 4  ;;  %v2180_v30 = vadd.f32 %v5647_v8, %v7063_v22  ;;  %v7236_v18 = vpack.c.bf16 %v2156_v5, %v2153_v28  ;;  %vm8509_vm0 = vcmask 1044484  }
 0xb4f   : > { %v2607_v48 = vsel %vm2399_vm1, %v2539_v41, 0.0  ;;  %v2606_v21 = vsel %vm2398_vm2, %v2535_v32, 0.0  ;;  %v2171_v62 = vpop.f32.mrf.mxu0  ;;  %v2682_v41 = vrot.slane %v2681_v55, 2  ;;  %v2661_v33 = vrot.slane %v2660_v46, 2 }
 0xb50   : > { %v2693_v16 = vadd.f32 %v2607_v48, %v2606_v21  ;;  %3229 = vbcast.lane.b32.xlu1 %v6865_v36, 280  ;;  %3213 = vbcast.lane.b32.xlu0 %v6860_v7, 272  ;;  %v2688_v50 = vadd.f32 %v2687_v23, %v2686_v47  ;;  %v7180_v44 = vpack.c.bf16 %v2180_v30, %v2177_v35  ;;  %v2675_v21 = vrot.slane %v2674_v45, 2 }
 0xb51   : > { %v2172_v7 = vadd.f32 %v7063_v22, %v2171_v62  ;;  %v2667_v35 = vadd.f32 %v2666_v57, %v2665_v19  ;;  %8553 = vst [vmem:[#allocation28_spill] sm:$0xff] %v7236_v18  ;;  %vm8508_vm1 = vcmask 1045509   ;;  %vm8507_vm2 = vcmask 1046534  }
 0xb52   : > { %v2694_v51 = vrot.slane %v2693_v16, 4  ;;  %v2550_v60 = vpop.permute.xlu1 %2549  ;;  %v2546_v14 = vpop.permute.xlu0 %2545  ;;  %5649 = vmatpush3.bf16.msra.mxu1 %v7180_v44  ;;  %v2689_v19 = vrot.slane %v2688_v50, 2  ;;  %v7300_v56 = vpack.c.bf16 %v7153_v3, %v7137_v52 }
 0xb53   : > { %v2609_v58 = vsel %vm2401_vm3, %v2550_v60, 0.0  ;;  %v2608_v49 = vsel %vm2400_vm4, %v2546_v14, 0.0  ;;  %v7192_v32 = vpack.c.bf16 %v2172_v7, %v2169_v12  ;;  %5650 = vmatprep.subr.bf16.mxu1 %v8551_v11  ;;  %v2668_v9 = vrot.slane %v2667_v35, 2 }
 0xb54   : > { %v2695_v61 = vadd.f32 %v2694_v51, %v2693_v16  ;;  %v2700_v47 = vadd.f32 %v2609_v58, %v2608_v49  ;;  %3145 = vbcast.lane.b32.xlu1 %v6828_v25, 280  ;;  %3129 = vbcast.lane.b32.xlu0 %v6823_v24, 272  ;;  %v7210_v16 = vadd.f32 %v2654_v54, %v2653_v27  ;;  %vm8506_vm3 = vcmask 1047559  }
 0xb55   : > { %8550 = vst [vmem:[#allocation26_spill] sm:$0xff] %v7192_v32  ;;  %v2683_v12 = vadd.f32 %v2682_v41, %v2681_v55  ;;  %v7221_v27 = vpack.c.bf16 %v2164_v13, %v2161_v63  ;;  %v2690_v62 = vadd.f32 %v2689_v19, %v2688_v50  ;;  %v2676_v58 = vadd.f32 %v2675_v21, %v2674_v45 }
 0xb56   : > { %v2701_v26 = vrot.slane %v2700_v47, 4  ;;  %v2561_v23 = vpop.permute.xlu1 %2560  ;;  %v2557_v48 = vpop.permute.xlu0 %2556  ;;  %v2696_v24 = vrot.slane %v2695_v61, 2  ;;  %5651 = vmatpush3.bf16.msra.mxu1 %v7192_v32  ;;  %v2656_v45 = vrot.slane %v7210_v16, 1 }
 0xb57   : > { %v2611_v8 = vsel %vm2403_vm5, %v2561_v23, 0.0  ;;  %v2610_v6 = vsel %vm2402_vm6, %v2557_v48, 0.0  ;;  %5652 = vmatprep.subr.bf16.mxu1 %v8551_v11  ;;  %8552 = vst [vmem:[#allocation27_spill] sm:$0xff] %v7221_v27  ;;  %v2684_v41 = vrot.slane %v2683_v12, 1  ;;  %v2691_v31 = vrot.slane %v2690_v62, 1 }
 0xb58   : > { %v2702_v30 = vadd.f32 %v2701_v26, %v2700_v47  ;;  %v2707_v57 = vadd.f32 %v2611_v8, %v2610_v6  ;;  %3499 = vrot.lane.b32.xlu1 %v7180_v44, %s6026_s23  ;;  %3225 = vbcast.lane.b32.xlu0 %v6865_v36, 272  ;;  %v2697_v49 = vadd.f32 %v2696_v24, %v2695_v61  ;;  %v2677_v26 = vrot.slane %v2676_v58, 1 }
 0xb59   : > { %v2148_v36 = vadd.f32 %v7032_v42, %v7063_v22  ;;  %v2662_v61 = vadd.f32 %v2661_v33, %v2660_v46  ;;  %v2669_v47 = vadd.f32 %v2668_v9, %v2667_v35  ;;  %v8555_v8 = vpack.c.bf16 %v7048_v43, %v7048_v43 }
 0xb5a   : > { %v2703_v51 = vrot.slane %v2702_v30, 2  ;;  %v2708_v60 = vrot.slane %v2707_v57, 4  ;;  %v2572_v14 = vpop.permute.xlu1 %2571  ;;  %v2568_v7 = vpop.permute.xlu0 %2567  ;;  %5653 = vmatpush3.bf16.msra.mxu1 %v7221_v27  ;;  %v2698_v23 = vrot.slane %v2697_v49, 1  ;;  %v2140_v33 = vadd.f32 %v7063_v22, %v8556_v2 }
 0xb5b   : > { %v2613_v53 = vsel %vm2405_vm9, %v2572_v14, 0.0  ;;  %v2612_v4 = vsel %vm2404_vm10, %v2568_v7, 0.0  ;;  %5654 = vmatprep.subr.bf16.mxu1 %v8551_v11  ;;  %v7246_v35 = vpack.c.bf16 %v2148_v36, %v7164_v38  ;;  %v7252_v6 = vunpack.c.l.b16 %v8555_v8 }
 0xb5c   : > { %v2704_v55 = vadd.f32 %v2703_v51, %v2702_v30  ;;  %v2709_v54 = vadd.f32 %v2708_v60, %v2707_v57  ;;  %v2714_v50 = vadd.f32 %v2613_v53, %v2612_v4  ;;  %3497 = vrot.lane.b32.xlu1 %v7192_v32, %s6026_s23  ;;  %3141 = vbcast.lane.b32.xlu0 %v6828_v25, 272  ;;  %v2663_v38 = vrot.slane %v2662_v61, 1  ;;  %v8557_v53 = vld [vmem:[#allocation20_spill] sm:$0xff] }
 0xb5d   : > { %8554 = vst [vmem:[#allocation29_spill] sm:$0xff] %v7246_v35  ;;  %v2685_v30 = vadd.f32 %v2684_v41, %v2683_v12  ;;  %v2692_v57 = vadd.f32 %v2691_v31, %v2690_v62  ;;  %v2670_v43 = vrot.slane %v2669_v47, 1  ;;  %v2678_v60 = vadd.f32 %v2677_v26, %v2676_v58  ;;  %8560 = vst [vmem:[#allocation20_spill] sm:$0xff] %v7300_v56 }
 0xb5e   : > { %v2710_v63 = vrot.slane %v2709_v54, 2  ;;  %v2715_v42 = vrot.slane %v2714_v50, 4  ;;  %v2583_v13 = vpop.permute.xlu1 %2582  ;;  %v2579_v19 = vpop.permute.xlu0 %2578  ;;  %v2705_v48 = vrot.slane %v2704_v55, 1  ;;  %5655 = vmatpush3.bf16.msra.mxu1 %v7236_v18  ;;  %v2699_v22 = vadd.f32 %v2698_v23, %v2697_v49 }
 0xb5f   : > { %v2615_v46 = vsel %vm2407_vm11, %v2583_v13, 0.0  ;;  %v2614_v25 = vsel %vm2406_vm12, %v2579_v19, 0.0  ;;  %5656 = vmatprep.subr.bf16.mxu1 %v8551_v11  ;;  %v2657_v14 = vadd.f32 %v2656_v45, %v7210_v16  ;;  %v2763_v4 = vunpack.c.l.b16 %v2731_v10 }
 0xb60   : > { %v2711_v21 = vadd.f32 %v2710_v63, %v2709_v54  ;;  %v2716_v24 = vadd.f32 %v2715_v42, %v2714_v50  ;;  %3241 = vbcast.lane.b32.xlu1 %v6870_v37, 280  ;;  %v2721_v34 = vadd.f32 %v2615_v46, %v2614_v25  ;;  %3237 = vbcast.lane.b32.xlu0 %v6870_v37, 272  ;;  %v8559_v42 = vld [vmem:[#allocation22_spill] sm:$0xff] }
 0xb61   : > { %v2650_v37 = vadd.f32 %v2649_v17, %v7149_v20  ;;  %v2706_v62 = vadd.f32 %v2705_v48, %v2704_v55  ;;  %v2739_v36 = vpack.c.bf16 %v2685_v30, %v2685_v30  ;;  %v2664_v20 = vadd.f32 %v2663_v38, %v2662_v61 }
 0xb62   : > { %v2712_v9 = vrot.slane %v2711_v21, 1  ;;  %v2717_v28 = vrot.slane %v2716_v24, 2  ;;  %v7258_v5 = vpop.permute.xlu1 %2861  ;;  %v7260_v51 = vpop.permute.xlu0 %2857  ;;  %v2722_v12 = vrot.slane %v2721_v34, 4  ;;  %5657 = vmatpush3.bf16.msra.mxu1 %v7246_v35  ;;  %v7275_v17 = vpack.c.bf16 %v2140_v33, %v7178_v0 }
 0xb63   : > { %v2740_v16 = vpack.c.bf16 %v2692_v57, %v2692_v57  ;;  %5658 = vmatprep.subr.bf16.mxu1 %v8551_v11  ;;  %v2671_v29 = vadd.f32 %v2670_v43, %v2669_v47  ;;  %v2738_v10 = vpack.c.bf16 %v2678_v60, %v2678_v60  ;;  %v2741_v45 = vpack.c.bf16 %v2699_v22, %v2699_v22 }
 0xb64   : > { %v2718_v7 = vadd.f32 %v2717_v28, %v2716_v24  ;;  %3153 = vbcast.lane.b32.xlu1 %v8557_v53, 272  ;;  %v2713_v54 = vadd.f32 %v2712_v9, %v2711_v21  ;;  %v2723_v58 = vadd.f32 %v2722_v12, %v2721_v34  ;;  %3495 = vrot.lane.b32.xlu0 %v7221_v27, %s6026_s23  ;;  %v2764_v61 = vunpack.c.l.b16 %v2732_v40  ;;  %v8561_v34 = vld [vmem:[#allocation21_spill] sm:$0xff] }
 0xb65   : > { %8558 = vst [vmem:[#allocation24_spill] sm:$0xff] %v7275_v17  ;;  %v2734_v0 = vpack.c.bf16 %v2650_v37, %v2650_v37  ;;  %v2742_v31 = vpack.c.bf16 %v2706_v62, %v2706_v62  ;;  %v2735_v13 = vpack.c.bf16 %v2657_v14, %v2657_v14  ;;  %v2771_v19 = vunpack.c.l.b16 %v2739_v36 }
 0xb66   : > { %v2719_v49 = vrot.slane %v2718_v7, 1  ;;  %v7277_v55 = vpop.permute.xlu1 %2873  ;;  %v7279_v50 = vpop.permute.xlu0 %2869  ;;  %v2724_v41 = vrot.slane %v2723_v58, 2  ;;  %v2743_v26 = vpack.c.bf16 %v2713_v54, %v2713_v54  ;;  %5659 = vmatpush3.bf16.msra.mxu1 %v7275_v17  ;;  %v2765_v47 = vunpack.c.l.b16 %v2733_v39 }
 0xb67   : > { %v2736_v46 = vpack.c.bf16 %v2664_v20, %v2664_v20  ;;  %v2772_v1 = vunpack.c.l.b16 %v2740_v16  ;;  %5660 = vmatprep.subr.bf16.mxu1 %v8551_v11  ;;  %v2737_v21 = vpack.c.bf16 %v2671_v29, %v2671_v29  ;;  %v2770_v24 = vunpack.c.l.b16 %v2738_v10 }
 0xb68   : > { %v2720_v63 = vadd.f32 %v2719_v49, %v2718_v7  ;;  %3249 = vbcast.lane.b32.xlu1 %v8559_v42, 272  ;;  %v2725_v23 = vadd.f32 %v2724_v41, %v2723_v58  ;;  %3157 = vbcast.lane.b32.xlu0 %v8557_v53, 280  ;;  %v2773_v8 = vunpack.c.l.b16 %v2741_v45  ;;  %v2779_v33 = vsel %vm8512_vm13, %v2763_v4, %v7252_v6  ;;  %v8562_v7 = vld [vmem:[#allocation23_spill] sm:$0xff] }
 0xb69   : > { %v2766_v30 = vunpack.c.l.b16 %v2734_v0  ;;  %v2774_v39 = vunpack.c.l.b16 %v2742_v31  ;;  %v2767_v38 = vunpack.c.l.b16 %v2735_v13  ;;  %v2792_v57 = vsel %vm8512_vm13, %v2771_v19, %v2770_v24  ;;  %v7344_v31 = vld [vmem:[#allocation6] sm:$0xff]  ;;  %v8563_v13 = vld [vmem:[#allocation13_spill] sm:$0xff] }
 0xb6a   : > { %v2744_v40 = vpack.c.bf16 %v2720_v63, %v2720_v63  ;;  %v7291_v25 = vpop.permute.xlu1 %2885  ;;  %v7293_v48 = vpop.permute.xlu0 %2881  ;;  %v2726_v2 = vrot.slane %v2725_v23, 1  ;;  %v2775_v9 = vunpack.c.l.b16 %v2743_v26  ;;  %5661 = vmatpush3.bf16.msra.mxu1 %v7139_v15  ;;  %v2781_v43 = vsel %vm8511_vm14, %v2764_v61, %v2779_v33 }
 0xb6b   : > { %v2768_v6 = vunpack.c.l.b16 %v2736_v46  ;;  %v2793_v60 = vsel %vm8511_vm14, %v2772_v1, %v2792_v57  ;;  %5662 = vmatprep.subr.bf16.mxu1 %v8551_v11  ;;  %v2769_v37 = vunpack.c.l.b16 %v2737_v21  ;;  %v2783_v14 = vsel %vm8510_vm15, %v2765_v47, %v2781_v43  ;;  %v8564_v47 = vld [vmem:[#allocation12_spill] sm:$0xff]  ;;  %v7368_v1 = vld [vmem:[#allocation6 + $0x8] sm:$0xff] }
 0xb6c   : > { %3165 = vbcast.lane.b32.xlu1 %v8561_v34, 272  ;;  %v2727_v28 = vadd.f32 %v2726_v2, %v2725_v23  ;;  %3253 = vbcast.lane.b32.xlu0 %v8559_v42, 280  ;;  %v2776_v22 = vunpack.c.l.b16 %v2744_v40  ;;  %v2794_v62 = vsel %vm8510_vm15, %v2773_v8, %v2793_v60  ;;  %v2785_v53 = vsel %vm8509_vm0, %v2766_v30, %v2783_v14  ;;  %v7410_v43 = vld [vmem:[#allocation5] sm:$0xff] }
 0xb6d   : > { %v2795_v4 = vsel %vm8509_vm0, %v2774_v39, %v2794_v62  ;;  %v2787_v54 = vsel %vm8508_vm1, %v2767_v38, %v2785_v53  ;;  %v7354_v19 = vrot.slane %v7344_v31, %v8563_v13  ;;  %v7365_v46 = vrot.slane %v7344_v31, %v8564_v47  ;;  %v7432_v62 = vld [vmem:[#allocation5 + $0x8] sm:$0xff] }
 0xb6e   : > { %v7308_v52 = vpop.permute.xlu1 %2897  ;;  %v7310_v3 = vpop.permute.xlu0 %2893  ;;  %v2745_v12 = vpack.c.bf16 %v2727_v28, %v2727_v28  ;;  %5663 = vmatpush3.bf16.msra.mxu1 %v7300_v56  ;;  %v2796_v58 = vsel %vm8508_vm1, %v2775_v9, %v2795_v4  ;;  %v2789_v49 = vsel %vm8507_vm2, %v2768_v6, %v2787_v54  ;;  %v7377_v24 = vrot.slane %v7368_v1, %v8563_v13 }
 0xb6f   : > { %v2797_v29 = vsel %vm8507_vm2, %v2776_v22, %v2796_v58  ;;  %5688 = vmatprep.subr.bf16.mxu1 %v8551_v11  ;;  %v2791_v10 = vsel %vm8506_vm3, %v2769_v37, %v2789_v49  ;;  %8565 = vst [vmem:[#allocation22_spill] sm:$0xff] %v7365_v46  ;;  %v7387_v33 = vrot.slane %v7368_v1, %v8564_v47 }
 0xb70   : > { %3261 = vbcast.lane.b32.xlu1 %v8562_v7, 272  ;;  %3169 = vbcast.lane.b32.xlu0 %v8561_v34, 280  ;;  %v2777_v36 = vunpack.c.l.b16 %v2745_v12  ;;  %8566 = vst [vmem:[#allocation21_spill] sm:$0xff] %v7377_v24  ;;  %v8568_v34 = vld [vmem:[#allocation14_spill] sm:$0xff]  ;;  %v7419_v22 = vrot.slane %v7410_v43, %v8563_v13  ;;  %v7429_v14 = vrot.slane %v7410_v43, %v8564_v47 }
 0xb71   : > { %8567 = vst [vmem:[#allocation23_spill] sm:$0xff] %v7387_v33  ;;  %v7397_v38 = vrot.slane %v7344_v31, %v8568_v34  ;;  %v7407_v28 = vrot.slane %v7368_v1, %v8568_v34  ;;  %v7441_v4 = vrot.slane %v7432_v62, %v8563_v13  ;;  %v7451_v58 = vrot.slane %v7432_v62, %v8564_v47 }
 0xb72   : > { %v7322_v20 = vpop.permute.xlu1 %2909  ;;  %v7324_v16 = vpop.permute.xlu0 %2905  ;;  %v2798_v45 = vsel %vm8506_vm3, %v2777_v36, %v2797_v29  ;;  %8571 = vst [vmem:[#allocation14_spill] sm:$0xff] %v7419_v22  ;;  %8572 = vst [vmem:[#allocation30_spill] sm:$0xff] %v7429_v14  ;;  %vm3046_vm4 = vcmp.eq.s32.totalorder %v6980_v59, %v7277_v55  ;;  %vm3044_vm5 = vcmp.eq.s32.totalorder %v6980_v59, %v7258_v5 }
 0xb73   : > { %v2799_v41 = vpack.c.b16 %v2798_v45, %v2791_v10  ;;  %8569 = vst [vmem:[#allocation13_spill] sm:$0xff] %v7397_v38  ;;  %8570 = vst [vmem:[#allocation12_spill] sm:$0xff] %v7407_v28  ;;  %v8575_v10 = vld [vmem:[#allocation15_spill] sm:$0xff]  ;;  %vm3045_vm6 = vcmp.eq.s32.totalorder %v6980_v59, %v7279_v50  ;;  %vm3043_vm9 = vcmp.eq.s32.totalorder %v6980_v59, %v7260_v51 }
 0xb74   : > { %3493 = vrot.lane.b32.xlu1 %v7236_v18, %s6026_s23  ;;  %3265 = vbcast.lane.b32.xlu0 %v8562_v7, 280  ;;  %8573 = vst [vmem:[#allocation31_spill] sm:$0xff] %v7441_v4  ;;  %8574 = vst [vmem:[#allocation32_spill] sm:$0xff] %v7451_v58  ;;  %v7461_v45 = vrot.slane %v7344_v31, %v8575_v10  ;;  %v7471_v47 = vrot.slane %v7368_v1, %v8575_v10 }
 0xb75   : > { %5665 = vmatmul.mubr.bf16.vlgmr.msra.gmra.mxu1 %v2799_v41  ;;  %vm3048_vm10 = vcmp.eq.s32.totalorder %v6980_v59, %v7291_v25  ;;  %vm3047_vm11 = vcmp.eq.s32.totalorder %v6980_v59, %v7293_v48  ;;  %vm3050_vm12 = vcmp.eq.s32.totalorder %v6980_v59, %v7308_v52  ;;  %vm3049_vm7 = vcmp.eq.s32.totalorder %v6980_v59, %v7310_v3 }
 0xb76   : > { %v7334_v61 = vpop.permute.xlu1 %2921  ;;  %v7336_v0 = vpop.permute.xlu0 %2917  ;;  %5704 = vmatprep.mubr.msk.bf16.mxu1 %vm8505_vm8, %v8551_v11  ;;  %8576 = vst [vmem:[#allocation15_spill] sm:$0xff] %v7461_v45  ;;  %8577 = vst [vmem:[#allocation33_spill] sm:$0xff] %v7471_v47  ;;  %vm3052_vm2 = vcmp.eq.s32.totalorder %v6980_v59, %v7322_v20  ;;  %v8623_v48 = vld [vmem:[#allocation22_spill] sm:$0xff] }
 0xb78   : > { %3489 = vrot.lane.b32.xlu1 %v7275_v17, %s6026_s23  ;;  %3491 = vrot.lane.b32.xlu0 %v7246_v35, %s6026_s23  ;;  %v7481_v35 = vrot.slane %v7410_v43, %v8568_v34 }
 0xb7a   : > { %v7346_v63 = vpop.permute.xlu1 %2933  ;;  %v7348_v42 = vpop.permute.xlu0 %2929  ;;  %8578 = vst [vmem:[#allocation34_spill] sm:$0xff] %v7481_v35 }
 0xb7c   : > { %3487 = vrot.lane.b32.xlu1 %v7139_v15, %s6026_s23  ;;  %4207 = vrot.lane.b32.xlu0 %v7180_v44, %s6027_s24 }
 0xb7e   : > { %v7358_v26 = vpop.permute.xlu1 %2945  ;;  %v7360_v23 = vpop.permute.xlu0 %2941 }
 0xb80   : > { %3577 = vbcast.lane.b32.xlu1 %v7354_v19, 296  ;;  %3573 = vbcast.lane.b32.xlu0 %v7354_v19, 288 }
 0xb82   : > { %v7370_v40 = vpop.permute.xlu1 %2957  ;;  %v7372_v21 = vpop.permute.xlu0 %2953 }
 0xb83   : > { %vm3059_vm8 = vcmp.eq.s32.totalorder %v6980_v59, %v7372_v21 }
 0xb84   : > { %3589 = vbcast.lane.b32.xlu1 %v7365_v46, 296  ;;  %3585 = vbcast.lane.b32.xlu0 %v7365_v46, 288 }
 0xb86   : > { %v7380_v8 = vpop.permute.xlu1 %2969  ;;  %v7382_v2 = vpop.permute.xlu0 %2965 }
 0xb87   : > { %vm3061_vm3 = vcmp.eq.s32.totalorder %v6980_v59, %v7382_v2 }
 0xb88   : > { %3673 = vbcast.lane.b32.xlu1 %v7377_v24, 296  ;;  %3669 = vbcast.lane.b32.xlu0 %v7377_v24, 288 }
 0xb8a   : > { %v7390_v30 = vpop.permute.xlu1 %2981  ;;  %v7392_v39 = vpop.permute.xlu0 %2977 }
 0xb8b   : > { %vm3064_vm1 = vcmp.eq.s32.totalorder %v6980_v59, %v7390_v30  ;;  %vm3063_vm0 = vcmp.eq.s32.totalorder %v6980_v59, %v7392_v39 }
 0xb8c   : > { %3685 = vbcast.lane.b32.xlu1 %v7387_v33, 296  ;;  %3681 = vbcast.lane.b32.xlu0 %v7387_v33, 288 }
 0xb8e   : > { %v7400_v57 = vpop.permute.xlu1 %2993  ;;  %v7402_v9 = vpop.permute.xlu0 %2989 }
 0xb8f   : > { %vm3066_vm15 = vcmp.eq.s32.totalorder %v6980_v59, %v7400_v57  ;;  %vm3065_vm14 = vcmp.eq.s32.totalorder %v6980_v59, %v7402_v9 }
 0xb90   : > { %3601 = vbcast.lane.b32.xlu1 %v7397_v38, 296  ;;  %3597 = vbcast.lane.b32.xlu0 %v7397_v38, 288 }
 0xb92   : > { %v7412_v6 = vpop.permute.xlu1 %3005  ;;  %v7414_v60 = vpop.permute.xlu0 %3001 }
 0xb94   : > { %3697 = vbcast.lane.b32.xlu1 %v7407_v28, 296  ;;  %3693 = vbcast.lane.b32.xlu0 %v7407_v28, 288  ;;  %v8581_v28 = vld [vmem:[#allocation16_spill] sm:$0xff] }
 0xb96   : > { %v7422_v12 = vpop.permute.xlu1 %3017  ;;  %v7424_v37 = vpop.permute.xlu0 %3013 }
 0xb97   : > { %vm3070_vm13 = vcmp.eq.s32.totalorder %v6980_v59, %v7422_v12  ;;  %v8636_v12 = vld [vmem:[#allocation21_spill] sm:$0xff] }
 0xb98   : > { %3801 = vbcast.lane.b32.xlu1 %v7419_v22, 296  ;;  %3797 = vbcast.lane.b32.xlu0 %v7419_v22, 288 }
 0xb9a   : > { %v7434_v7 = vpop.permute.xlu1 %3029  ;;  %v7436_v53 = vpop.permute.xlu0 %3025 }
 0xb9c   : > { %3813 = vbcast.lane.b32.xlu1 %v7429_v14, 296  ;;  %3809 = vbcast.lane.b32.xlu0 %v7429_v14, 288 }
 0xb9e   : > { %v7444_v36 = vpop.permute.xlu1 %3041  ;;  %v7446_v54 = vpop.permute.xlu0 %3037 }
 0xba0   : > { %3897 = vbcast.lane.b32.xlu1 %v7441_v4, 296  ;;  %3893 = vbcast.lane.b32.xlu0 %v7441_v4, 288 }
 0xba2   : > { %v7454_v49 = vpop.permute.xlu1 %3093  ;;  %v7456_v29 = vpop.permute.xlu0 %3081 }
 0xba3   : > { %v3267_v5 = vsel %vm3043_vm9, %v7456_v29, 0.0  ;;  %vm3069_vm9 = vcmp.eq.s32.totalorder %v6980_v59, %v7424_v37 }
 0xba4   : > { %3909 = vbcast.lane.b32.xlu1 %v7451_v58, 296  ;;  %3905 = vbcast.lane.b32.xlu0 %v7451_v58, 288 }
 0xba6   : > { %v7464_v41 = vpop.permute.xlu1 %3177  ;;  %v7466_v13 = vpop.permute.xlu0 %3085 }
 0xba7   : > { %v3268_v50 = vsel %vm3044_vm5, %v7466_v13, 0.0  ;;  %v3283_v39 = vsel %vm3059_vm8, %v7464_v41, 0.0  ;;  %vm3074_vm5 = vcmp.eq.s32.totalorder %v6980_v59, %v7444_v36  ;;  %vm3073_vm8 = vcmp.eq.s32.totalorder %v6980_v59, %v7446_v54 }
 0xba8   : > { %3613 = vbcast.lane.b32.xlu1 %v7461_v45, 296  ;;  %3609 = vbcast.lane.b32.xlu0 %v7461_v45, 288  ;;  %v7491_v45 = vrot.slane %v7432_v62, %v8568_v34  ;;  %v7511_v34 = vrot.slane %v7368_v1, %v8581_v28 }
 0xbaa   : > { %v7474_v15 = vpop.permute.xlu1 %3189  ;;  %v7476_v17 = vpop.permute.xlu0 %3097  ;;  %8580 = vst [vmem:[#allocation36_spill] sm:$0xff] %v7491_v45  ;;  %8584 = vst [vmem:[#allocation38_spill] sm:$0xff] %v7511_v34 }
 0xbac   : > { %3709 = vbcast.lane.b32.xlu1 %v7471_v47, 296  ;;  %3705 = vbcast.lane.b32.xlu0 %v7471_v47, 288  ;;  %v7501_v47 = vrot.slane %v7344_v31, %v8581_v28 }
 0xbae   : > { %v7484_v58 = vpop.permute.xlu1 %3109  ;;  %v7486_v4 = vpop.permute.xlu0 %3181  ;;  %8582 = vst [vmem:[#allocation16_spill] sm:$0xff] %v7501_v47 }
 0xbaf   : > { %8579 = vst [vmem:[#allocation35_spill] sm:$0xff] %v7484_v58 }
 0xbb0   : > { %3825 = vbcast.lane.b32.xlu1 %v7481_v35, 296  ;;  %3821 = vbcast.lane.b32.xlu0 %v7481_v35, 288 }
 0xbb2   : > { %v7494_v14 = vpop.permute.xlu1 %3205  ;;  %v7496_v22 = vpop.permute.xlu0 %3193 }
 0xbb3   : > { %v3288_v2 = vsel %vm3064_vm1, %v7494_v14, 0.0  ;;  %vm3057_vm1 = vcmp.eq.s32.totalorder %v6980_v59, %v7360_v23 }
 0xbb4   : > { %3921 = vbcast.lane.b32.xlu1 %v7491_v45, 296  ;;  %3917 = vbcast.lane.b32.xlu0 %v7491_v45, 288  ;;  %v7522_v45 = vrot.slane %v7410_v43, %v8575_v10 }
 0xbb6   : > { %v7504_v38 = vpop.permute.xlu1 %3121  ;;  %v7506_v33 = vpop.permute.xlu0 %3105  ;;  %8586 = vst [vmem:[#allocation40_spill] sm:$0xff] %v7522_v45 }
 0xbb7   : > { %8583 = vst [vmem:[#allocation37_spill] sm:$0xff] %v7504_v38  ;;  %v3271_v41 = vsel %vm3047_vm11, %v7506_v33, 0.0  ;;  %vm8663_vm11 = vcmask 1041409  }
 0xbb8   : > { %3621 = vbcast.lane.b32.xlu1 %v7501_v47, 288  ;;  %4205 = vrot.lane.b32.xlu0 %v7192_v32, %s6027_s24  ;;  %v7532_v32 = vrot.slane %v7432_v62, %v8575_v10 }
 0xbba   : > { %v7515_v35 = vpop.permute.xlu1 %3217  ;;  %v7517_v24 = vpop.permute.xlu0 %3201  ;;  %8589 = vst [vmem:[#allocation43_spill] sm:$0xff] %v7532_v32 }
 0xbbb   : > { %8585 = vst [vmem:[#allocation39_spill] sm:$0xff] %v7515_v35 }
 0xbbc   : > { %3717 = vbcast.lane.b32.xlu1 %v7511_v34, 288  ;;  %3625 = vbcast.lane.b32.xlu0 %v7501_v47, 296 }
 0xbbe   : > { %v7525_v38 = vpop.permute.xlu1 %3133  ;;  %v7527_v46 = vpop.permute.xlu0 %3117 }
 0xbbf   : > { %8587 = vst [vmem:[#allocation41_spill] sm:$0xff] %v7525_v38  ;;  %8588 = vst [vmem:[#allocation42_spill] sm:$0xff] %v7527_v46  ;;  %v8593_v46 = vld [vmem:[#allocation17_spill] sm:$0xff] }
 0xbc0   : > { %3833 = vbcast.lane.b32.xlu1 %v7522_v45, 288  ;;  %3721 = vbcast.lane.b32.xlu0 %v7511_v34, 296  ;;  %v7549_v10 = vrot.slane %v7344_v31, %v8593_v46 }
 0xbc2   : > { %v7535_v35 = vpop.permute.xlu1 %3229  ;;  %v7537_v58 = vpop.permute.xlu0 %3213  ;;  %8594 = vst [vmem:[#allocation17_spill] sm:$0xff] %v7549_v10 }
 0xbc3   : > { %8590 = vst [vmem:[#allocation44_spill] sm:$0xff] %v7535_v35 }
 0xbc4   : > { %3929 = vbcast.lane.b32.xlu1 %v7532_v32, 288  ;;  %3837 = vbcast.lane.b32.xlu0 %v7522_v45, 296  ;;  %v7558_v45 = vrot.slane %v7368_v1, %v8593_v46 }
 0xbc6   : > { %v7541_v47 = vpop.permute.xlu1 %3145  ;;  %v7543_v38 = vpop.permute.xlu0 %3129  ;;  %8596 = vst [vmem:[#allocation48_spill] sm:$0xff] %v7558_v45 }
 0xbc7   : > { %8591 = vst [vmem:[#allocation45_spill] sm:$0xff] %v7541_v47  ;;  %8592 = vst [vmem:[#allocation46_spill] sm:$0xff] %v7543_v38 }
 0xbc8   : > { %3485 = vrot.lane.b32.xlu1 %v7300_v56, %s6026_s23  ;;  %3933 = vbcast.lane.b32.xlu0 %v7532_v32, 296  ;;  %v7566_v32 = vrot.slane %v7410_v43, %v8581_v28 }
 0xbca   : > { %v3500_v34 = vpop.permute.xlu1 %3499  ;;  %v7552_v35 = vpop.permute.xlu0 %3225  ;;  %8598 = vst [vmem:[#allocation50_spill] sm:$0xff] %v7566_v32 }
 0xbcb   : > { %8595 = vst [vmem:[#allocation47_spill] sm:$0xff] %v7552_v35  ;;  %5669 = vmatpush3.bf16.msra.mxu0 %v3500_v34  ;;  %v8603_v35 = vld [vmem:[#allocation18_spill] sm:$0xff] }
 0xbcc   : > { %3637 = vbcast.lane.b32.xlu1 %v7549_v10, 296  ;;  %5670 = vmatprep.subr.bf16.mxu0 %v8551_v11 }
 0xbcd   : > { %3633 = vbcast.lane.b32.xlu0 %v7549_v10, 288  ;;  %v7577_v10 = vrot.slane %v7432_v62, %v8581_v28 }
 0xbce   : > { %v3498_v56 = vpop.permute.xlu1 %3497  ;;  %v7561_v47 = vpop.permute.xlu0 %3141 }
 0xbcf   : > { %8597 = vst [vmem:[#allocation49_spill] sm:$0xff] %v7561_v47  ;;  %5671 = vmatpush3.bf16.msra.mxu0 %v3498_v56  ;;  %8601 = vst [vmem:[#allocation53_spill] sm:$0xff] %v7577_v10 }
 0xbd0   : > { %3733 = vbcast.lane.b32.xlu1 %v7558_v45, 296  ;;  %5672 = vmatprep.subr.bf16.mxu0 %v8551_v11 }
 0xbd1   : > { %3729 = vbcast.lane.b32.xlu0 %v7558_v45, 288  ;;  %v7585_v45 = vrot.slane %v7344_v31, %v8603_v35 }
 0xbd2   : > { %v7570_v34 = vpop.permute.xlu1 %3241  ;;  %v7572_v38 = vpop.permute.xlu0 %3237  ;;  %v8627_v52 = vld [vmem:[#allocation47_spill] sm:$0xff] }
 0xbd3   : > { %8599 = vst [vmem:[#allocation51_spill] sm:$0xff] %v7570_v34  ;;  %8600 = vst [vmem:[#allocation52_spill] sm:$0xff] %v7572_v38 }
 0xbd4   : > { %3849 = vbcast.lane.b32.xlu1 %v7566_v32, 296  ;;  %8604 = vst [vmem:[#allocation18_spill] sm:$0xff] %v7585_v45 }
 0xbd5   : > { %3845 = vbcast.lane.b32.xlu0 %v7566_v32, 288  ;;  %v7596_v32 = vrot.slane %v7368_v1, %v8603_v35 }
 0xbd6   : > { %v7580_v56 = vpop.permute.xlu1 %3153  ;;  %v3496_v47 = vpop.permute.xlu0 %3495 }
 0xbd7   : > { %8602 = vst [vmem:[#allocation54_spill] sm:$0xff] %v7580_v56  ;;  %5673 = vmatpush3.bf16.msra.mxu0 %v3496_v47  ;;  %8607 = vst [vmem:[#allocation57_spill] sm:$0xff] %v7596_v32 }
 0xbd8   : > { %3945 = vbcast.lane.b32.xlu1 %v7577_v10, 296  ;;  %5674 = vmatprep.subr.bf16.mxu0 %v8551_v11 }
 0xbd9   : > { %3941 = vbcast.lane.b32.xlu0 %v7577_v10, 288  ;;  %v7606_v10 = vrot.slane %v7410_v43, %v8593_v46 }
 0xbda   : > { %v7589_v34 = vpop.permute.xlu1 %3249  ;;  %v7591_v28 = vpop.permute.xlu0 %3157  ;;  %v8629_v57 = vld [vmem:[#allocation52_spill] sm:$0xff]  ;;  %v8630_v3 = vld [vmem:[#allocation51_spill] sm:$0xff] }
 0xbdb   : > { %8605 = vst [vmem:[#allocation55_spill] sm:$0xff] %v7589_v34  ;;  %8606 = vst [vmem:[#allocation56_spill] sm:$0xff] %v7591_v28 }
 0xbdc   : > { %3649 = vbcast.lane.b32.xlu1 %v7585_v45, 296  ;;  %8610 = vst [vmem:[#allocation60_spill] sm:$0xff] %v7606_v10 }
 0xbdd   : > { %3645 = vbcast.lane.b32.xlu0 %v7585_v45, 288  ;;  %v7616_v45 = vrot.slane %v7432_v62, %v8593_v46 }
 0xbde   : > { %v7599_v47 = vpop.permute.xlu1 %3165  ;;  %v7601_v56 = vpop.permute.xlu0 %3253 }
 0xbdf   : > { %8608 = vst [vmem:[#allocation58_spill] sm:$0xff] %v7599_v47  ;;  %8609 = vst [vmem:[#allocation59_spill] sm:$0xff] %v7601_v56 }
 0xbe0   : > { %3745 = vbcast.lane.b32.xlu1 %v7596_v32, 296  ;;  %8613 = vst [vmem:[#allocation63_spill] sm:$0xff] %v7616_v45 }
 0xbe1   : > { %3741 = vbcast.lane.b32.xlu0 %v7596_v32, 288  ;;  %v8614_v32 = vld [vmem:[#allocation19_spill] sm:$0xff] }
 0xbe2   : > { %v7609_v34 = vpop.permute.xlu1 %3261  ;;  %v7611_v28 = vpop.permute.xlu0 %3169  ;;  %v7633_v46 = vrot.slane %v7368_v1, %v8614_v32 }
 0xbe3   : > { %8611 = vst [vmem:[#allocation61_spill] sm:$0xff] %v7609_v34  ;;  %8612 = vst [vmem:[#allocation62_spill] sm:$0xff] %v7611_v28  ;;  %v7625_v34 = vrot.slane %v7344_v31, %v8614_v32  ;;  %v7639_v31 = vrot.slane %v7410_v43, %v8603_v35 }
 0xbe4   : > { %3861 = vbcast.lane.b32.xlu1 %v7606_v10, 296  ;;  %8616 = vst [vmem:[#allocation64_spill] sm:$0xff] %v7633_v46 }
 0xbe5   : > { %3857 = vbcast.lane.b32.xlu0 %v7606_v10, 288  ;;  %8615 = vst [vmem:[#allocation19_spill] sm:$0xff] %v7625_v34  ;;  %8617 = vst [vmem:[#allocation65_spill] sm:$0xff] %v7639_v31 }
 0xbe6   : > { %v3494_v47 = vpop.permute.xlu1 %3493  ;;  %v7619_v56 = vpop.permute.xlu0 %3265 }
 0xbe7   : > { %5675 = vmatpush3.bf16.msra.mxu0 %v3494_v47 }
 0xbe8   : > { %3957 = vbcast.lane.b32.xlu1 %v7616_v45, 296  ;;  %5676 = vmatprep.subr.bf16.mxu0 %v8551_v11 }
 0xbe9   : > { %3953 = vbcast.lane.b32.xlu0 %v7616_v45, 288 }
 0xbea   : > { %v3490_v28 = vpop.permute.xlu1 %3489  ;;  %v3492_v38 = vpop.permute.xlu0 %3491 }
 0xbeb   : > { %5677 = vmatpush3.bf16.msra.mxu0 %v3492_v38 }
 0xbec   : > { %3661 = vbcast.lane.b32.xlu1 %v7625_v34, 296  ;;  %5678 = vmatprep.subr.bf16.mxu0 %v8551_v11 }
 0xbed   : > { %3657 = vbcast.lane.b32.xlu0 %v7625_v34, 288 }
 0xbee   : > { %v3488_v47 = vpop.permute.xlu1 %3487  ;;  %v4208_v10 = vpop.permute.xlu0 %4207 }
 0xbef   : > { %5679 = vmatpush3.bf16.msra.mxu0 %v3490_v28  ;;  %5689 = vmatpush3.bf16.msra.mxu1 %v4208_v10  ;;  %v7651_v10 = vrot.slane %v7432_v62, %v8603_v35  ;;  %v7673_v35 = vrot.slane %v7432_v62, %v8614_v32  ;;  %v3285_v62 = vsel %vm3061_vm3, %v7474_v15, 0.0  ;;  %vm3067_vm3 = vcmp.eq.s32.totalorder %v6980_v59, %v7414_v60  ;;  %v8631_v60 = vld [vmem:[#allocation44_spill] sm:$0xff] }
 0xbf0   : > { %3757 = vbcast.lane.b32.xlu1 %v7633_v46, 296  ;;  %5680 = vmatprep.subr.bf16.mxu0 %v8551_v11 }
 0xbf1   : > { %3753 = vbcast.lane.b32.xlu0 %v7633_v46, 288  ;;  %5690 = vmatprep.subr.bf16.mxu1 %v8551_v11  ;;  %8618 = vst [vmem:[#allocation66_spill] sm:$0xff] %v7651_v10  ;;  %8620 = vst [vmem:[#allocation68_spill] sm:$0xff] %v7673_v35 }
 0xbf2   : > { %v7642_v38 = vpop.permute.xlu1 %3577  ;;  %v7645_v1 = vpop.permute.xlu0 %3573 }
 0xbf3   : > { %5681 = vmatpush3.bf16.msra.mxu0 %v3488_v47  ;;  %v7662_v47 = vrot.slane %v7410_v43, %v8614_v32  ;;  %v3270_v43 = vsel %vm3046_vm4, %v7476_v17, 0.0  ;;  %v3269_v17 = vsel %vm3045_vm6, %v7454_v49, 0.0  ;;  %vm3060_vm4 = vcmp.eq.s32.totalorder %v6980_v59, %v7370_v40 }
 0xbf4   : > { %3873 = vbcast.lane.b32.xlu1 %v7639_v31, 296  ;;  %5682 = vmatprep.subr.bf16.mxu0 %v8551_v11  ;;  %v3306_v55 = vadd.f32 %v3270_v43, %v3269_v17  ;;  %vm3062_vm6 = vcmp.eq.s32.totalorder %v6980_v59, %v7380_v8  ;;  %v3287_v49 = vsel %vm3063_vm0, %v7517_v24, 0.0  ;;  %vm3071_vm0 = vcmp.eq.s32.totalorder %v6980_v59, %v7436_v53  ;;  %v8622_v43 = vld [vmem:[#allocation35_spill] sm:$0xff] }
 0xbf5   : > { %3869 = vbcast.lane.b32.xlu0 %v7639_v31, 288  ;;  %8619 = vst [vmem:[#allocation67_spill] sm:$0xff] %v7662_v47  ;;  %v3286_v21 = vsel %vm3062_vm6, %v7496_v22, 0.0  ;;  %v7743_v22 = vadd.f32 %v3268_v50, %v3267_v5  ;;  %vm3068_vm6 = vcmp.eq.s32.totalorder %v6980_v59, %v7412_v6  ;;  %v3369_v13 = vadd.f32 %v3288_v2, %v3287_v49  ;;  %v8628_v2 = vld [vmem:[#allocation41_spill] sm:$0xff] }
 0xbf6   : > { %v7653_v28 = vpop.permute.xlu1 %3589  ;;  %v7656_v46 = vpop.permute.xlu0 %3585  ;;  %v7763_v51 = vadd.f32 %v3286_v21, %v3285_v62  ;;  %v3272_v17 = vsel %vm3048_vm10, %v8622_v43, 0.0  ;;  %v8626_v62 = vld [vmem:[#allocation42_spill] sm:$0xff]  ;;  %v3291_v49 = vsel %vm3067_vm3, %v8627_v52, 0.0  ;;  %v3293_v43 = vsel %vm3069_vm9, %v8629_v57, 0.0  ;;  %v8634_v52 = vld [vmem:[#allocation59_spill] sm:$0xff] }
 0xbf7   : > { %v3300_v30 = vrot.slane %v7743_v22, 4  ;;  %v3313_v5 = vadd.f32 %v3272_v17, %v3271_v41  ;;  %v3276_v41 = vsel %vm3052_vm2, %v8628_v2, 0.0  ;;  %v3294_v17 = vsel %vm3070_vm13, %v8630_v3, 0.0  ;;  %v8637_v3 = vld [vmem:[#allocation49_spill] sm:$0xff] }
 0xbf8   : > { %3969 = vbcast.lane.b32.xlu1 %v7651_v10, 296  ;;  %v3363_v50 = vrot.slane %v7763_v51, 4  ;;  %vm8638_vm13 = vcmp.eq.s32.totalorder %v6980_v59, %v7336_v0  ;;  %vm8642_vm2 = vcmp.eq.s32.totalorder %v6980_v59, %v7346_v63  ;;  %v8643_v0 = vld [vmem:[#allocation55_spill] sm:$0xff]  ;;  %vm8645_vm10 = vcmp.eq.s32.totalorder %v6980_v59, %v7358_v26 }
 0xbf9   : > { %3965 = vbcast.lane.b32.xlu0 %v7651_v10, 288  ;;  %v3277_v6 = vsel %vm8638_vm13, %v8637_v3, 0.0  ;;  %vm8668_vm9 = vcmask 1044484   ;;  %vm8675_vm13 = vcmask 1047559  }
 0xbfa   : > { %v7664_v34 = vpop.permute.xlu1 %3673  ;;  %v7666_v31 = vpop.permute.xlu0 %3669 }
 0xbfc   : > { %3881 = vbcast.lane.b32.xlu1 %v7662_v47, 288 }
 0xbfd   : > { %4203 = vrot.lane.b32.xlu0 %v7221_v27, %s6027_s24 }
 0xbfe   : > { %v7675_v45 = vpop.permute.xlu1 %3685  ;;  %v7677_v10 = vpop.permute.xlu0 %3681 }
 0xc00   : > { %3977 = vbcast.lane.b32.xlu1 %v7673_v35, 288 }
 0xc01   : > { %3885 = vbcast.lane.b32.xlu0 %v7662_v47, 296 }
 0xc02   : > { %v7684_v27 = vpop.permute.xlu1 %3601  ;;  %v7690_v32 = vpop.permute.xlu0 %3597 }
 0xc03   : > { %8621 = vst [vmem:[#allocation69_spill] sm:$0xff] %v7684_v27  ;;  %v8659_v27 = vld [vmem:[#allocation30_spill] sm:$0xff] }
 0xc04   : > { %4915 = vrot.lane.b32.xlu1 %v7180_v44, %s6028_s25  ;;  %v3284_v44 = vsel %vm3060_vm4, %v7486_v4, 0.0  ;;  %v3307_v4 = vrot.slane %v3306_v55, 4  ;;  %vm3055_vm4 = vcmp.eq.s32.totalorder %v6980_v59, %v7348_v42 }
 0xc05   : > { %3981 = vbcast.lane.b32.xlu0 %v7673_v35, 296  ;;  %v7761_v15 = vadd.f32 %v3284_v44, %v3283_v39  ;;  %v8624_v44 = vld [vmem:[#allocation37_spill] sm:$0xff] }
 0xc06   : > { %v7718_v40 = vpop.permute.xlu1 %3697  ;;  %v7728_v8 = vpop.permute.xlu0 %3693  ;;  %v7796_v14 = vadd.f32 %v3307_v4, %v3306_v55  ;;  %v3274_v21 = vsel %vm3050_vm12, %v8624_v44, 0.0  ;;  %v3289_v55 = vsel %vm3065_vm14, %v7537_v58, 0.0  ;;  %v3273_v4 = vsel %vm3049_vm7, %v8626_v62, 0.0  ;;  %v8632_v62 = vld [vmem:[#allocation46_spill] sm:$0xff] }
 0xc07   : > { %v3356_v33 = vrot.slane %v7761_v15, 4  ;;  %v3370_v58 = vrot.slane %v3369_v13, 4  ;;  %v3292_v44 = vsel %vm3068_vm6, %v8631_v60, 0.0  ;;  %vm8633_vm7 = vcmp.eq.s32.totalorder %v6980_v59, %v7324_v16 }
 0xc08   : > { %4281 = vbcast.lane.b32.xlu1 %v7354_v19, 304  ;;  %v3275_v20 = vsel %vm8633_vm7, %v8632_v62, 0.0  ;;  %vm8635_vm14 = vcmp.eq.s32.totalorder %v6980_v59, %v7434_v7  ;;  %v3320_v2 = vadd.f32 %v3274_v21, %v3273_v4  ;;  %v3383_v57 = vadd.f32 %v3292_v44, %v3291_v49  ;;  %v8639_v7 = vld [vmem:[#allocation45_spill] sm:$0xff]  ;;  %v8641_v21 = vld [vmem:[#allocation56_spill] sm:$0xff]  ;;  %v8644_v44 = vld [vmem:[#allocation62_spill] sm:$0xff] }
 0xc09   : > { %4201 = vrot.lane.b32.xlu0 %v7236_v18, %s6027_s24  ;;  %v3296_v37 = vsel %vm8635_vm14, %v8634_v52, 0.0  ;;  %v3298_v16 = vsel %vm3074_vm5, %v7619_v56, 0.0  ;;  %v3280_v4 = vsel %vm8642_vm2, %v8641_v21, 0.0  ;;  %v3295_v49 = vsel %vm3071_vm0, %v8643_v0, 0.0  ;;  %v8647_v52 = vld [vmem:[#allocation54_spill] sm:$0xff]  ;;  %vm8665_vm5 = vmmov %vm8663_vm11 }
 0xc0a   : > { %v7765_v24 = vpop.permute.xlu1 %3801  ;;  %v7779_v29 = vpop.permute.xlu0 %3797  ;;  %v3327_v56 = vadd.f32 %v3276_v41, %v3275_v20  ;;  %v3397_v60 = vadd.f32 %v3296_v37, %v3295_v49  ;;  %v3279_v53 = vsel %vm3055_vm4, %v8647_v52, 0.0  ;;  %v8648_v41 = vld [vmem:[#allocation23_spill] sm:$0xff]  ;;  %v3314_v20 = vrot.slane %v3313_v5, 4  ;;  %vm8678_vm2 = vmmov %vm8675_vm13 }
 0xc0b   : > { %v3384_v26 = vrot.slane %v3383_v57, 4  ;;  %v3341_v37 = vadd.f32 %v3280_v4, %v3279_v53  ;;  %v3371_v49 = vadd.f32 %v3370_v58, %v3369_v13  ;;  %v3301_v4 = vadd.f32 %v3300_v30, %v7743_v22 }
 0xc0c   : > { %4293 = vbcast.lane.b32.xlu1 %v8623_v48, 304  ;;  %v3309_v53 = vrot.slane %v7796_v14, 2  ;;  %vm8664_vm12 = vcmask 1042434   ;;  %vm8666_vm4 = vcmask 1043459   ;;  %vm2844_vm6 = vcmask 64512  }
 0xc0d   : > { %4285 = vbcast.lane.b32.xlu0 %v7354_v19, 312  ;;  %v8625_v19 = vld [vmem:[#allocation39_spill] sm:$0xff]  ;;  %v3372_v30 = vrot.slane %v3371_v49, 2  ;;  %vm8670_vm3 = vmmov %vm8666_vm4  ;;  %vm8671_vm0 = vcmask 1045509   ;;  %vm8673_vm7 = vcmask 1046534  }
 0xc0e   : > { %v7814_v25 = vpop.permute.xlu1 %3813  ;;  %v3290_v39 = vsel %vm3066_vm15, %v8625_v19, 0.0  ;;  %v7828_v9 = vpop.permute.xlu0 %3809  ;;  %vm8640_vm15 = vcmp.eq.s32.totalorder %v6980_v59, %v7334_v61  ;;  %v3282_v61 = vsel %vm8645_vm10, %v8644_v44, 0.0  ;;  %v3328_v44 = vrot.slane %v3327_v56, 4  ;;  %vm8674_vm14 = vmmov %vm8671_vm0 }
 0xc0f   : > { %v3376_v19 = vadd.f32 %v3290_v39, %v3289_v55  ;;  %v3390_v39 = vadd.f32 %v3294_v17, %v3293_v43  ;;  %v8646_v43 = vld [vmem:[#allocation61_spill] sm:$0xff]  ;;  %vm3759_vm10 = vcmp.eq.s32.totalorder %v6980_v59, %v7645_v1 }
 0xc10   : > { %4377 = vbcast.lane.b32.xlu1 %v8636_v12, 304  ;;  %v3297_v63 = vsel %vm3073_vm8, %v8646_v43, 0.0  ;;  %v3398_v43 = vrot.slane %v3397_v60, 4  ;;  %vm8667_vm8 = vmmov %vm8664_vm12 }
 0xc11   : > { %4297 = vbcast.lane.b32.xlu0 %v8623_v48, 312  ;;  %v3278_v48 = vsel %vm8640_vm15, %v8639_v7, 0.0  ;;  %v3377_v17 = vrot.slane %v3376_v19, 4  ;;  %v3404_v3 = vadd.f32 %v3298_v16, %v3297_v63  ;;  %v8649_v7 = vld [vmem:[#allocation58_spill] sm:$0xff]  ;;  %v3391_v42 = vrot.slane %v3390_v39, 4  ;;  %vm8676_vm15 = vmmov %vm8673_vm7 }
 0xc12   : > { %v7864_v55 = vpop.permute.xlu1 %3897  ;;  %v7878_v36 = vpop.permute.xlu0 %3893  ;;  %v3334_v62 = vadd.f32 %v3278_v48, %v3277_v6  ;;  %v3281_v54 = vsel %vm3057_vm1, %v8649_v7, 0.0  ;;  %v3364_v6 = vadd.f32 %v3363_v50, %v7763_v51  ;;  %v3321_v48 = vrot.slane %v3320_v2, 4  ;;  %vm8672_vm1 = vmmov %vm8668_vm9 }
 0xc13   : > { %v3348_v0 = vadd.f32 %v3282_v61, %v3281_v54  ;;  %v3378_v63 = vadd.f32 %v3377_v17, %v3376_v19  ;;  %v3405_v23 = vrot.slane %v3404_v3, 4  ;;  %v3315_v51 = vadd.f32 %v3314_v20, %v3313_v5  ;;  %v8650_v61 = vld [vmem:[#allocation13_spill] sm:$0xff] }
 0xc14   : > { %4389 = vbcast.lane.b32.xlu1 %v8648_v41, 304  ;;  %v3335_v52 = vrot.slane %v3334_v62, 4  ;;  %v3385_v50 = vadd.f32 %v3384_v26, %v3383_v57  ;;  %v3342_v7 = vrot.slane %v3341_v37, 4  ;;  %v3322_v13 = vadd.f32 %v3321_v48, %v3320_v2  ;;  %v8653_v2 = vld [vmem:[#allocation12_spill] sm:$0xff] }
 0xc15   : > { %4381 = vbcast.lane.b32.xlu0 %v8636_v12, 312  ;;  %v3357_v12 = vadd.f32 %v3356_v33, %v7761_v15  ;;  %v3365_v15 = vrot.slane %v3364_v6, 2  ;;  %v3392_v33 = vadd.f32 %v3391_v42, %v3390_v39  ;;  %v3349_v58 = vrot.slane %v3348_v0, 4 }
 0xc16   : > { %v7898_v21 = vpop.permute.xlu1 %3909  ;;  %v7901_v16 = vpop.permute.xlu0 %3905  ;;  %v3329_v19 = vadd.f32 %v3328_v44, %v3327_v56  ;;  %v3399_v17 = vadd.f32 %v3398_v43, %v3397_v60  ;;  %v3379_v35 = vrot.slane %v3378_v63, 2  ;;  %v3336_v47 = vadd.f32 %v3335_v52, %v3334_v62 }
 0xc17   : > { %v3358_v22 = vrot.slane %v3357_v12, 2  ;;  %v3406_v5 = vadd.f32 %v3405_v23, %v3404_v3  ;;  %v3310_v57 = vadd.f32 %v3309_v53, %v7796_v14  ;;  %v3316_v20 = vrot.slane %v3315_v51, 2 }
 0xc18   : > { %4305 = vbcast.lane.b32.xlu1 %v8650_v61, 304  ;;  %v3386_v26 = vrot.slane %v3385_v50, 2  ;;  %v3366_v48 = vadd.f32 %v3365_v15, %v3364_v6  ;;  %v3323_v42 = vrot.slane %v3322_v13, 2  ;;  %v3350_v56 = vadd.f32 %v3349_v58, %v3348_v0  ;;  %v8656_v6 = vld [vmem:[#allocation14_spill] sm:$0xff] }
 0xc19   : > { %4393 = vbcast.lane.b32.xlu0 %v8648_v41, 312  ;;  %v3302_v41 = vrot.slane %v3301_v4, 2  ;;  %v3359_v44 = vadd.f32 %v3358_v22, %v3357_v12  ;;  %v3373_v62 = vadd.f32 %v3372_v30, %v3371_v49  ;;  %v3330_v3 = vrot.slane %v3329_v19, 2 }
 0xc1a   : > { %v7908_v54 = vpop.permute.xlu1 %3613  ;;  %v7910_v18 = vpop.permute.xlu0 %3609  ;;  %v3400_v43 = vrot.slane %v3399_v17, 2  ;;  %v3380_v23 = vadd.f32 %v3379_v35, %v3378_v63  ;;  %v3337_v14 = vrot.slane %v3336_v47, 2  ;;  %v3407_v53 = vrot.slane %v3406_v5, 2 }
 0xc1b   : > { %8651 = vst [vmem:[#allocation35_spill] sm:$0xff] %v7908_v54  ;;  %8652 = vst [vmem:[#allocation22_spill] sm:$0xff] %v7910_v18  ;;  %v3343_v54 = vadd.f32 %v3342_v7, %v3341_v37  ;;  %v3393_v18 = vrot.slane %v3392_v33, 2  ;;  %v3303_v52 = vadd.f32 %v3302_v41, %v3301_v4  ;;  %v3311_v37 = vrot.slane %v3310_v57, 1 }
 0xc1c   : > { %4401 = vbcast.lane.b32.xlu1 %v8653_v2, 304  ;;  %v3317_v7 = vadd.f32 %v3316_v20, %v3315_v51  ;;  %v3367_v0 = vrot.slane %v3366_v48, 1  ;;  %v3324_v58 = vadd.f32 %v3323_v42, %v3322_v13  ;;  %v3351_v49 = vrot.slane %v3350_v56, 2 }
 0xc1d   : > { %4309 = vbcast.lane.b32.xlu0 %v8650_v61, 312  ;;  %v3387_v61 = vadd.f32 %v3386_v26, %v3385_v50  ;;  %v3394_v12 = vadd.f32 %v3393_v18, %v3392_v33  ;;  %v3360_v4 = vrot.slane %v3359_v44, 1  ;;  %v3374_v35 = vrot.slane %v3373_v62, 1 }
 0xc1e   : > { %v7915_v39 = vpop.permute.xlu1 %3709  ;;  %v7917_v60 = vpop.permute.xlu0 %3705  ;;  %v3331_v63 = vadd.f32 %v3330_v3, %v3329_v19  ;;  %v3401_v30 = vadd.f32 %v3400_v43, %v3399_v17  ;;  %v3304_v41 = vrot.slane %v3303_v52, 1  ;;  %v3408_v51 = vadd.f32 %v3407_v53, %v3406_v5 }
 0xc1f   : > { %8654 = vst [vmem:[#allocation37_spill] sm:$0xff] %v7915_v39  ;;  %8655 = vst [vmem:[#allocation39_spill] sm:$0xff] %v7917_v60  ;;  %v3344_v39 = vrot.slane %v3343_v54, 2  ;;  %v3338_v60 = vadd.f32 %v3337_v14, %v3336_v47  ;;  %v3312_v50 = vadd.f32 %v3311_v37, %v3310_v57  ;;  %v3318_v20 = vrot.slane %v3317_v7, 1 }
 0xc20   : > { %4505 = vbcast.lane.b32.xlu1 %v8656_v6, 304  ;;  %v3388_v26 = vrot.slane %v3387_v61, 1  ;;  %v3368_v13 = vadd.f32 %v3367_v0, %v3366_v48  ;;  %v3325_v33 = vrot.slane %v3324_v58, 1  ;;  %v3395_v42 = vrot.slane %v3394_v12, 1  ;;  %v8660_v48 = vld [vmem:[#allocation31_spill] sm:$0xff] }
 0xc21   : > { %4405 = vbcast.lane.b32.xlu0 %v8653_v2, 312  ;;  %v3381_v2 = vrot.slane %v3380_v23, 1  ;;  %v3361_v17 = vadd.f32 %v3360_v4, %v3359_v44  ;;  %v3375_v3 = vadd.f32 %v3374_v35, %v3373_v62  ;;  %v3332_v47 = vrot.slane %v3331_v63, 1 }
 0xc22   : > { %v7921_v15 = vpop.permute.xlu1 %3825  ;;  %v7923_v22 = vpop.permute.xlu0 %3821  ;;  %v3402_v5 = vrot.slane %v3401_v30, 1  ;;  %v3305_v43 = vadd.f32 %v3304_v41, %v3303_v52  ;;  %v3339_v57 = vrot.slane %v3338_v60, 1  ;;  %v3409_v53 = vrot.slane %v3408_v51, 1 }
 0xc23   : > { %8657 = vst [vmem:[#allocation42_spill] sm:$0xff] %v7921_v15  ;;  %8658 = vst [vmem:[#allocation47_spill] sm:$0xff] %v7923_v22  ;;  %v3345_v15 = vadd.f32 %v3344_v39, %v3343_v54  ;;  %v3352_v22 = vadd.f32 %v3351_v49, %v3350_v56  ;;  %v3382_v14 = vadd.f32 %v3381_v2, %v3380_v23 }
 0xc24   : > { %4517 = vbcast.lane.b32.xlu1 %v8659_v27, 304  ;;  %v3414_v54 = vpack.c.bf16 %v3312_v50, %v3312_v50  ;;  %v3319_v39 = vadd.f32 %v3318_v20, %v3317_v7  ;;  %v3389_v37 = vadd.f32 %v3388_v26, %v3387_v61  ;;  %v3422_v56 = vpack.c.bf16 %v3368_v13, %v3368_v13 }
 0xc25   : > { %4509 = vbcast.lane.b32.xlu0 %v8656_v6, 312  ;;  %v3346_v6 = vrot.slane %v3345_v15, 1  ;;  %v3326_v49 = vadd.f32 %v3325_v33, %v3324_v58  ;;  %v3396_v44 = vadd.f32 %v3395_v42, %v3394_v12  ;;  %v3353_v62 = vrot.slane %v3352_v22, 1  ;;  %v8661_v58 = vld [vmem:[#allocation32_spill] sm:$0xff] }
 0xc26   : > { %v7927_v18 = vpop.permute.xlu1 %3921  ;;  %v7929_v19 = vpop.permute.xlu0 %3917  ;;  %v3421_v35 = vpack.c.bf16 %v3361_v17, %v3361_v17  ;;  %v3423_v52 = vpack.c.bf16 %v3375_v3, %v3375_v3  ;;  %v3333_v23 = vadd.f32 %v3332_v47, %v3331_v63  ;;  %v3403_v41 = vadd.f32 %v3402_v5, %v3401_v30 }
 0xc27   : > { %v3424_v2 = vpack.c.bf16 %v3382_v14, %v3382_v14  ;;  %v3410_v50 = vadd.f32 %v3409_v53, %v3408_v51  ;;  %v3413_v7 = vpack.c.bf16 %v3305_v43, %v3305_v43  ;;  %v3415_v61 = vpack.c.bf16 %v3319_v39, %v3319_v39 }
 0xc28   : > { %4601 = vbcast.lane.b32.xlu1 %v8660_v48, 304  ;;  %v3425_v20 = vpack.c.bf16 %v3389_v37, %v3389_v37  ;;  %v3347_v26 = vadd.f32 %v3346_v6, %v3345_v15  ;;  %v3454_v13 = vunpack.c.l.b16 %v3422_v56  ;;  %v3416_v33 = vpack.c.bf16 %v3326_v49, %v3326_v49  ;;  %v8662_v37 = vld [vmem:[#allocation15_spill] sm:$0xff] }
 0xc29   : > { %4521 = vbcast.lane.b32.xlu0 %v8659_v27, 312  ;;  %v3340_v27 = vadd.f32 %v3339_v57, %v3338_v60  ;;  %v3426_v63 = vpack.c.bf16 %v3396_v44, %v3396_v44  ;;  %v3354_v30 = vadd.f32 %v3353_v62, %v3352_v22  ;;  %v3446_v60 = vunpack.c.l.b16 %v3414_v54 }
 0xc2a   : > { %v7933_v0 = vpop.permute.xlu1 %3621  ;;  %v4206_v4 = vpop.permute.xlu0 %4205  ;;  %v3455_v51 = vunpack.c.l.b16 %v3423_v52  ;;  %v3417_v17 = vpack.c.bf16 %v3333_v23, %v3333_v23  ;;  %v3427_v3 = vpack.c.bf16 %v3403_v41, %v3403_v41  ;;  %v3453_v47 = vunpack.c.l.b16 %v3421_v35  ;;  %v2728_v35 = vld [vmem:[#allocation4] sm:$0xff] }
 0xc2b   : > { %5691 = vmatpush3.bf16.msra.mxu1 %v4206_v4  ;;  %v3456_v5 = vunpack.c.l.b16 %v3424_v2  ;;  %v3418_v43 = vpack.c.bf16 %v3340_v27, %v3340_v27  ;;  %v3428_v14 = vpack.c.bf16 %v3410_v50, %v3410_v50  ;;  %v3445_v15 = vunpack.c.l.b16 %v3413_v7 }
 0xc2c   : > { %5692 = vmatprep.subr.bf16.mxu1 %v8551_v11  ;;  %4613 = vbcast.lane.b32.xlu1 %v8661_v58, 304  ;;  %v3447_v57 = vunpack.c.l.b16 %v3415_v61  ;;  %v3457_v53 = vunpack.c.l.b16 %v3425_v20  ;;  %v3419_v39 = vpack.c.bf16 %v3347_v26, %v3347_v26  ;;  %v3468_v22 = vsel %vm8663_vm11, %v3454_v13, %v3453_v47  ;;  %v8669_v61 = vld [vmem:[#allocation33_spill] sm:$0xff] }
 0xc2d   : > { %4605 = vbcast.lane.b32.xlu0 %v8660_v48, 312  ;;  %v3448_v54 = vunpack.c.l.b16 %v3416_v33  ;;  %v3458_v48 = vunpack.c.l.b16 %v3426_v63  ;;  %v3420_v56 = vpack.c.bf16 %v3354_v30, %v3354_v30  ;;  %v3469_v44 = vsel %vm8664_vm12, %v3455_v51, %v3468_v22 }
 0xc2e   : > { %v7938_v12 = vpop.permute.xlu1 %3717  ;;  %v7940_v42 = vpop.permute.xlu0 %3625  ;;  %v3449_v62 = vunpack.c.l.b16 %v3417_v17  ;;  %v3459_v4 = vunpack.c.l.b16 %v3427_v3  ;;  %v3461_v52 = vsel %vm8665_vm5, %v3446_v60, %v3445_v15  ;;  %v3470_v23 = vsel %vm8666_vm4, %v3456_v5, %v3469_v44  ;;  %v2729_v3 = vld [vmem:[#allocation4 + $0x8] sm:$0xff] }
 0xc2f   : > { %v3450_v41 = vunpack.c.l.b16 %v3418_v43  ;;  %v3460_v2 = vunpack.c.l.b16 %v3428_v14  ;;  %v3462_v27 = vsel %vm8667_vm8, %v3447_v57, %v3461_v52  ;;  %v3471_v50 = vsel %vm8668_vm9, %v3457_v53, %v3470_v23  ;;  %v8677_v14 = vld [vmem:[#allocation34_spill] sm:$0xff]  ;;  %v8682_v23 = vld [vmem:[#allocation16_spill] sm:$0xff] }
 0xc30   : > { %4317 = vbcast.lane.b32.xlu1 %v8662_v37, 304  ;;  %v3451_v7 = vunpack.c.l.b16 %v3419_v39  ;;  %v3472_v13 = vsel %vm8671_vm0, %v3458_v48, %v3471_v50  ;;  %v3452_v33 = vunpack.c.l.b16 %v3420_v56  ;;  %vm3760_vm11 = vcmp.eq.s32.totalorder %v6980_v59, %v7642_v38  ;;  %v8679_v48 = vld [vmem:[#allocation36_spill] sm:$0xff]  ;;  %v8683_v50 = vld [vmem:[#allocation38_spill] sm:$0xff] }
 0xc31   : > { %4617 = vbcast.lane.b32.xlu0 %v8661_v58, 312  ;;  %v3463_v58 = vsel %vm8670_vm3, %v3448_v54, %v3462_v27  ;;  %v3473_v51 = vsel %vm8673_vm7, %v3459_v4, %v3472_v13  ;;  %v3983_v44 = vsel %vm3759_vm10, %v7779_v29, 0.0  ;;  %vm8680_vm12 = vmmov 0  }
 0xc32   : > { %v7944_v6 = vpop.permute.xlu1 %3833  ;;  %v7947_v49 = vpop.permute.xlu0 %3721  ;;  %v3464_v60 = vsel %vm8672_vm1, %v3449_v62, %v3463_v58  ;;  %v3474_v5 = vsel %vm8675_vm13, %v3460_v2, %v3473_v51  ;;  %v3984_v62 = vsel %vm3760_vm11, %v7765_v24, 0.0  ;;  %vm3775_vm5 = vcmp.eq.s32.totalorder %v6980_v59, %v7666_v31 }
 0xc33   : > { %v3465_v47 = vsel %vm8674_vm14, %v3450_v41, %v3464_v60  ;;  %v4015_v1 = vadd.f32 %v3984_v62, %v3983_v44  ;;  %vm3776_vm4 = vcmp.eq.s32.totalorder %v6980_v59, %v7664_v34  ;;  %v3999_v29 = vsel %vm3775_vm5, %v7878_v36, 0.0 }
 0xc34   : > { %4413 = vbcast.lane.b32.xlu1 %v8669_v61, 304  ;;  %v3466_v43 = vsel %vm8676_vm15, %v3451_v7, %v3465_v47  ;;  %v4000_v52 = vsel %vm3776_vm4, %v7864_v55, 0.0  ;;  %vm3762_vm8 = vcmp.eq.s32.totalorder %v6980_v59, %v7653_v28  ;;  %vm3761_vm9 = vcmp.eq.s32.totalorder %v6980_v59, %v7656_v46 }
 0xc35   : > { %4321 = vbcast.lane.b32.xlu0 %v8662_v37, 312  ;;  %v2835_v20 = vpop.f32.mrf.mxu1  ;;  %v3467_v37 = vsel %vm8678_vm2, %v3452_v33, %v3466_v43  ;;  %v4016_v41 = vrot.slane %v4015_v1, 4  ;;  %vm3778_vm3 = vcmp.eq.s32.totalorder %v6980_v59, %v7675_v45  ;;  %v4071_v34 = vadd.f32 %v4000_v52, %v3999_v29 }
 0xc36   : > { %v7956_v26 = vpop.permute.xlu1 %3929  ;;  %v2842_v63 = vadd.f32 %v2835_v20, %v2728_v35  ;;  %v7960_v30 = vpop.permute.xlu0 %3837  ;;  %v3475_v54 = vpack.c.b16 %v3474_v5, %v3467_v37  ;;  %v8681_v35 = vld [vmem:[#allocation26_spill] sm:$0xff]  ;;  %v3985_v55 = vsel %vm3761_vm9, %v7828_v9, 0.0  ;;  %v3986_v28 = vsel %vm3762_vm8, %v7814_v25, 0.0  ;;  %v8684_v25 = vld [vmem:[#allocation40_spill] sm:$0xff]  ;;  %v8689_v5 = vld [vmem:[#allocation37_spill] sm:$0xff] }
 0xc37   : > { %v5666_v17 = vpop.f32.mrf.mxu1  ;;  %v4002_v27 = vsel %vm3778_vm3, %v7898_v21, 0.0  ;;  %v4017_v46 = vadd.f32 %v4016_v41, %v4015_v1  ;;  %v4022_v7 = vadd.f32 %v3986_v28, %v3985_v55  ;;  %vm3779_vm0 = vcmp.eq.s32.totalorder %v6980_v59, %v7728_v8  ;;  %v8686_v8 = vld [vmem:[#allocation47_spill] sm:$0xff]  ;;  %v8691_v1 = vld [vmem:[#allocation29_spill] sm:$0xff] }
 0xc38   : > { %2845 = vst.msk [vmem:[#allocation4] sm:$0xff] %vm2844_vm6, %v2842_v63  ;;  %4529 = vbcast.lane.b32.xlu1 %v8677_v14, 304  ;;  %vm3780_vm1 = vcmp.eq.s32.totalorder %v6980_v59, %v7718_v40  ;;  %v4003_v21 = vsel %vm3779_vm0, %v7929_v19, 0.0  ;;  %vm3763_vm7 = vcmp.eq.s32.totalorder %v6980_v59, %v7690_v32  ;;  %v8685_v40 = vld [vmem:[#allocation69_spill] sm:$0xff]  ;;  %v8687_v19 = vld [vmem:[#allocation42_spill] sm:$0xff]  ;;  %vm3782_vm13 = vcmp.eq.s32.totalorder %v6980_v59, %v8689_v5  ;;  %v8690_v37 = vld [vmem:[#allocation39_spill] sm:$0xff] }
 0xc39   : > { %4417 = vbcast.lane.b32.xlu0 %v8669_v61, 312  ;;  %v2838_v15 = vpop.f32.mrf.mxu1  ;;  %v4072_v61 = vrot.slane %v4071_v34, 4  ;;  %v4018_v9 = vrot.slane %v4017_v46, 2  ;;  %v4023_v13 = vrot.slane %v4022_v7, 4  ;;  %vm3764_vm14 = vcmp.eq.s32.totalorder %v6980_v59, %v8685_v40 }
 0xc3a   : > { %v3486_v57 = vpop.permute.xlu1 %3485  ;;  %v2843_v53 = vadd.f32 %v2838_v15, %v2729_v3  ;;  %v7970_v39 = vpop.permute.xlu0 %3933  ;;  %v3987_v51 = vsel %vm3763_vm7, %v8686_v8, 0.0  ;;  %v3988_v17 = vsel %vm3764_vm14, %v8687_v19, 0.0  ;;  %v8688_v3 = vld [vmem:[#allocation43_spill] sm:$0xff]  ;;  %vm3781_vm15 = vcmp.eq.s32.totalorder %v6980_v59, %v8690_v37 }
 0xc3b   : > { %5683 = vmatpush3.bf16.msra.mxu0 %v3486_v57  ;;  %v5667_v22 = vpop.f32.mrf.mxu1  ;;  %v4073_v33 = vadd.f32 %v4072_v61, %v4071_v34  ;;  %v8041_v47 = vadd.f32 %v4018_v9, %v4017_v46  ;;  %v4024_v32 = vadd.f32 %v4023_v13, %v4022_v7  ;;  %v4006_v57 = vsel %vm3782_vm13, %v7970_v39, 0.0  ;;  %v8693_v34 = vld [vmem:[#allocation22_spill] sm:$0xff]  ;;  %v8695_v46 = vld [vmem:[#allocation48_spill] sm:$0xff] }
 0xc3c   : > { %5708 = vmatprep.subr.bf16.mxu0 %v8551_v11  ;;  %2846 = vst.msk [vmem:[#allocation4 + $0x8] sm:$0xff] %vm2844_vm6, %v2843_v53  ;;  %4625 = vbcast.lane.b32.xlu1 %v8679_v48, 304  ;;  %vm3777_vm6 = vcmp.eq.s32.totalorder %v6980_v59, %v7677_v10  ;;  %v4029_v22 = vadd.f32 %v3988_v17, %v3987_v51 }
 0xc3d   : > { %4533 = vbcast.lane.b32.xlu0 %v8677_v14, 312  ;;  %v4001_v36 = vsel %vm3777_vm6, %v7901_v16, 0.0  ;;  %v4004_v16 = vsel %vm3780_vm1, %v7927_v18, 0.0  ;;  %v4074_v14 = vrot.slane %v4073_v33, 2  ;;  %vm3783_vm2 = vcmp.eq.s32.totalorder %v6980_v59, %v7938_v12 }
 0xc3e   : > { %5685 = vmatmul.mubr.bf16.vlgmr.msra.gmra.mxu0 %v3475_v54  ;;  %v7981_v56 = vpop.permute.xlu1 %3637  ;;  %v4078_v45 = vadd.f32 %v4002_v27, %v4001_v36  ;;  %v4085_v18 = vadd.f32 %v4004_v16, %v4003_v21  ;;  %vm3784_vm10 = vcmp.eq.s32.totalorder %v6980_v59, %v7947_v49  ;;  %v4020_v52 = vrot.slane %v8041_v47, 1  ;;  %v8694_v49 = vld [vmem:[#allocation35_spill] sm:$0xff]  ;;  %v8696_v21 = vld [vmem:[#allocation50_spill] sm:$0xff] }
 0xc3f   : > { %v7985_v4 = vpop.permute.xlu0 %3633  ;;  %5724 = vmatprep.mubr.msk.bf16.mxu0 %vm8680_vm12, %v8551_v11  ;;  %v4075_v12 = vadd.f32 %v4074_v14, %v4073_v33  ;;  %vm3765_vm11 = vcmp.eq.s32.totalorder %v6980_v59, %v8693_v34  ;;  %vm3766_vm12 = vcmp.eq.s32.totalorder %v6980_v59, %v8694_v49  ;;  %v4030_v28 = vrot.slane %v4029_v22, 4  ;;  %v8697_v14 = vld [vmem:[#allocation53_spill] sm:$0xff] }
 0xc40   : > { %4913 = vrot.lane.b32.xlu1 %v8681_v35, %s6028_s25  ;;  %v4079_v63 = vrot.slane %v4078_v45, 4  ;;  %v4086_v54 = vrot.slane %v4085_v18, 4  ;;  %v8692_v35 = vld [vmem:[#allocation17_spill] sm:$0xff]  ;;  %vm3767_vm5 = vcmp.eq.s32.totalorder %v6980_v59, %v7933_v0  ;;  %vm3768_vm4 = vcmp.eq.s32.totalorder %v6980_v59, %v7940_v42 }
 0xc41   : > { %4629 = vbcast.lane.b32.xlu0 %v8679_v48, 312  ;;  %v4005_v48 = vsel %vm3781_vm15, %v7956_v26, 0.0  ;;  %v3990_v27 = vsel %vm3766_vm12, %v7960_v30, 0.0  ;;  %vm3769_vm9 = vcmp.eq.s32.totalorder %v6980_v59, %v7985_v4  ;;  %vm3770_vm6 = vcmp.eq.s32.totalorder %v6980_v59, %v7981_v56 }
 0xc42   : > { %v7992_v38 = vpop.permute.xlu1 %3733  ;;  %v4080_v15 = vadd.f32 %v4079_v63, %v4078_v45  ;;  %v4092_v39 = vadd.f32 %v4006_v57, %v4005_v48  ;;  %v4087_v36 = vadd.f32 %v4086_v54, %v4085_v18  ;;  %v4076_v8 = vrot.slane %v4075_v12, 1 }
 0xc43   : > { %v7998_v24 = vpop.permute.xlu0 %3729  ;;  %vm3786_vm8 = vcmp.eq.s32.totalorder %v6980_v59, %v7992_v38  ;;  %v3989_v38 = vsel %vm3765_vm11, %v7944_v6, 0.0  ;;  %v8094_v6 = vadd.f32 %v4020_v52, %v8041_v47  ;;  %v4031_v51 = vadd.f32 %v4030_v28, %v4029_v22 }
 0xc44   : > { %4333 = vbcast.lane.b32.xlu1 %v8682_v23, 312  ;;  %v4081_v55 = vrot.slane %v4080_v15, 2  ;;  %vm3785_vm3 = vcmp.eq.s32.totalorder %v6980_v59, %v7998_v24  ;;  %v4036_v24 = vadd.f32 %v3990_v27, %v3989_v38  ;;  %v4088_v19 = vrot.slane %v4087_v36, 2 }
 0xc45   : > { %4329 = vbcast.lane.b32.xlu0 %v8682_v23, 304  ;;  %v4025_v23 = vrot.slane %v4024_v32, 2  ;;  %v4129_v22 = vpack.c.bf16 %v8094_v6, %v8094_v6  ;;  %v4077_v48 = vadd.f32 %v4076_v8, %v4075_v12  ;;  %vm8704_vm12 = vcmask 1042434  }
 0xc46   : > { %v8006_v2 = vpop.permute.xlu1 %3849  ;;  %v4082_v56 = vadd.f32 %v4081_v55, %v4080_v15  ;;  %v4037_v18 = vrot.slane %v4036_v24, 4 }
 0xc47   : > { %v8014_v31 = vpop.permute.xlu0 %3845  ;;  %v3992_v7 = vsel %vm3768_vm4, %v8006_v2, 0.0  ;;  %v4026_v2 = vadd.f32 %v4025_v23, %v4024_v32  ;;  %v8698_v23 = vld [vmem:[#allocation18_spill] sm:$0xff]  ;;  %v4137_v27 = vpack.c.bf16 %v4077_v48, %v4077_v48  ;;  %vm8707_vm4 = vcmask 1044484  }
 0xc48   : > { %4429 = vbcast.lane.b32.xlu1 %v8683_v50, 312  ;;  %v3991_v30 = vsel %vm3767_vm5, %v8014_v31, 0.0  ;;  %v4083_v17 = vrot.slane %v4082_v56, 1  ;;  %vm8706_vm5 = vcmask 1043459  }
 0xc49   : > { %4425 = vbcast.lane.b32.xlu0 %v8683_v50, 304  ;;  %v4093_v50 = vrot.slane %v4092_v39, 4  ;;  %v4043_v16 = vadd.f32 %v3992_v7, %v3991_v30  ;;  %v4027_v32 = vrot.slane %v4026_v2, 1 }
 0xc4a   : > { %v3946_v10 = vpop.permute.xlu1 %3945 }
 0xc4b   : > { %v3942_v20 = vpop.permute.xlu0 %3941  ;;  %v4008_v62 = vsel %vm3784_vm10, %v3946_v10, 0.0  ;;  %v4094_v9 = vadd.f32 %v4093_v50, %v4092_v39  ;;  %v4044_v15 = vrot.slane %v4043_v16, 4  ;;  %v4084_v39 = vadd.f32 %v4083_v17, %v4082_v56 }
 0xc4c   : > { %4545 = vbcast.lane.b32.xlu1 %v8684_v25, 312  ;;  %v4007_v44 = vsel %vm3783_vm2, %v3942_v20, 0.0  ;;  %vm8702_vm10 = vcmask 1041409  }
 0xc4d   : > { %4541 = vbcast.lane.b32.xlu0 %v8684_v25, 304  ;;  %v4099_v26 = vadd.f32 %v4008_v62, %v4007_v44  ;;  %v4032_v44 = vrot.slane %v4031_v51, 2  ;;  %v4089_v62 = vadd.f32 %v4088_v19, %v4087_v36  ;;  %v4045_v34 = vadd.f32 %v4044_v15, %v4043_v16 }
 0xc4e   : > { %v8030_v58 = vpop.permute.xlu1 %3649 }
 0xc4f   : > { %v8032_v60 = vpop.permute.xlu0 %3645  ;;  %v4100_v61 = vrot.slane %v4099_v26, 4  ;;  %vm3772_vm1 = vcmp.eq.s32.totalorder %v6980_v59, %v8030_v58  ;;  %v4033_v50 = vadd.f32 %v4032_v44, %v4031_v51 }
 0xc50   : > { %4641 = vbcast.lane.b32.xlu1 %v8688_v3, 312  ;;  %vm3771_vm0 = vcmp.eq.s32.totalorder %v6980_v59, %v8032_v60  ;;  %v8699_v60 = vld [vmem:[#allocation57_spill] sm:$0xff] }
 0xc51   : > { %4637 = vbcast.lane.b32.xlu0 %v8688_v3, 304  ;;  %v4101_v63 = vadd.f32 %v4100_v61, %v4099_v26  ;;  %v4095_v3 = vrot.slane %v4094_v9, 2  ;;  %v4046_v61 = vrot.slane %v4045_v34, 2 }
 0xc52   : > { %v8046_v43 = vpop.permute.xlu1 %3745 }
 0xc53   : > { %v8049_v53 = vpop.permute.xlu0 %3741  ;;  %v4102_v54 = vrot.slane %v4101_v63, 2  ;;  %vm3788_vm14 = vcmp.eq.s32.totalorder %v6980_v59, %v8046_v43  ;;  %v4047_v43 = vadd.f32 %v4046_v61, %v4045_v34 }
 0xc54   : > { %4341 = vbcast.lane.b32.xlu1 %v8692_v35, 304  ;;  %vm3787_vm7 = vcmp.eq.s32.totalorder %v6980_v59, %v8049_v53 }
 0xc55   : > { %4199 = vrot.lane.b32.xlu0 %v8691_v1, %s6027_s24  ;;  %v4103_v26 = vadd.f32 %v4102_v54, %v4101_v63 }
 0xc56   : > { %v3862_v29 = vpop.permute.xlu1 %3861 }
 0xc57   : > { %v3858_v41 = vpop.permute.xlu0 %3857  ;;  %v3994_v20 = vsel %vm3770_vm6, %v3862_v29, 0.0  ;;  %v4096_v29 = vadd.f32 %v4095_v3, %v4094_v9  ;;  %vm8711_vm6 = vmmov %vm8702_vm10 }
 0xc58   : > { %4437 = vbcast.lane.b32.xlu1 %v8695_v46, 304  ;;  %v3993_v4 = vsel %vm3769_vm9, %v3858_v41, 0.0  ;;  %v8106_v41 = vadd.f32 %v4027_v32, %v4026_v2  ;;  %vm8710_vm9 = vcmask 1046534  }
 0xc59   : > { %4345 = vbcast.lane.b32.xlu0 %v8692_v35, 312  ;;  %v4050_v40 = vadd.f32 %v3994_v20, %v3993_v4  ;;  %v4038_v35 = vadd.f32 %v4037_v18, %v4036_v24  ;;  %v4097_v30 = vrot.slane %v4096_v29, 1  ;;  %v4104_v4 = vrot.slane %v4103_v26, 1 }
 0xc5a   : > { %v3958_v10 = vpop.permute.xlu1 %3957  ;;  %v4034_v24 = vrot.slane %v4033_v50, 1  ;;  %v4130_v16 = vpack.c.bf16 %v8106_v41, %v8106_v41  ;;  %v4169_v18 = vunpack.c.l.b16 %v4137_v27  ;;  %v8708_v41 = vld [vmem:[#allocation65_spill] sm:$0xff] }
 0xc5b   : > { %v3954_v0 = vpop.permute.xlu0 %3953  ;;  %v4010_v42 = vsel %vm3786_vm8, %v3958_v10, 0.0  ;;  %v4051_v47 = vrot.slane %v4050_v40, 4  ;;  %v4098_v53 = vadd.f32 %v4097_v30, %v4096_v29  ;;  %v4105_v3 = vadd.f32 %v4104_v4, %v4103_v26 }
 0xc5c   : > { %v4009_v45 = vsel %vm3785_vm3, %v3954_v0, 0.0  ;;  %4553 = vbcast.lane.b32.xlu1 %v8696_v21, 304  ;;  %v4138_v0 = vpack.c.bf16 %v4084_v39, %v4084_v39  ;;  %v8124_v15 = vadd.f32 %v4034_v24, %v4033_v50  ;;  %v8701_v39 = vld [vmem:[#allocation63_spill] sm:$0xff]  ;;  %vm8709_vm8 = vcmask 1045509   ;;  %vm8712_vm3 = vmmov %vm8704_vm12 }
 0xc5d   : > { %v4106_v25 = vadd.f32 %v4010_v42, %v4009_v45  ;;  %4441 = vbcast.lane.b32.xlu0 %v8695_v46, 312  ;;  %v4052_v55 = vadd.f32 %v4051_v47, %v4050_v40  ;;  %v4090_v46 = vrot.slane %v4089_v62, 1  ;;  %v4039_v42 = vrot.slane %v4038_v35, 2  ;;  %v8700_v40 = vld [vmem:[#allocation60_spill] sm:$0xff] }
 0xc5e   : > { %v8089_v31 = vpop.permute.xlu1 %3661  ;;  %v4170_v32 = vunpack.c.l.b16 %v4138_v0  ;;  %v4141_v34 = vpack.c.bf16 %v4105_v3, %v4105_v3 }
 0xc5f   : > { %v4107_v13 = vrot.slane %v4106_v25, 4  ;;  %v8091_v33 = vpop.permute.xlu0 %3657  ;;  %v4053_v20 = vrot.slane %v4052_v55, 2  ;;  %v4091_v9 = vadd.f32 %v4090_v46, %v4089_v62  ;;  %vm3774_vm15 = vcmp.eq.s32.totalorder %v6980_v59, %v8089_v31 }
 0xc60   : > { %4649 = vbcast.lane.b32.xlu1 %v8697_v14, 304  ;;  %vm3773_vm13 = vcmp.eq.s32.totalorder %v6980_v59, %v8091_v33  ;;  %v4140_v33 = vpack.c.bf16 %v4098_v53, %v4098_v53 }
 0xc61   : > { %4557 = vbcast.lane.b32.xlu0 %v8696_v21, 312  ;;  %v4108_v5 = vadd.f32 %v4107_v13, %v4106_v25  ;;  %v4040_v13 = vadd.f32 %v4039_v42, %v4038_v35  ;;  %v4139_v54 = vpack.c.bf16 %v4091_v9, %v4091_v9  ;;  %v4048_v35 = vrot.slane %v4047_v43, 1 }
 0xc62   : > { %v8100_v37 = vpop.permute.xlu1 %3757  ;;  %v4172_v0 = vunpack.c.l.b16 %v4140_v33 }
 0xc63   : > { %v8098_v57 = vpop.permute.xlu0 %3753  ;;  %v4109_v52 = vrot.slane %v4108_v5, 2  ;;  %v4041_v48 = vrot.slane %v4040_v13, 1  ;;  %v4171_v31 = vunpack.c.l.b16 %v4139_v54  ;;  %vm3790_vm11 = vcmp.eq.s32.totalorder %v6980_v59, %v8100_v37 }
 0xc64   : > { %4353 = vbcast.lane.b32.xlu1 %v8698_v23, 304  ;;  %vm3789_vm2 = vcmp.eq.s32.totalorder %v6980_v59, %v8098_v57  ;;  %v4049_v61 = vadd.f32 %v4048_v35, %v4047_v43 }
 0xc65   : > { %4653 = vbcast.lane.b32.xlu0 %v8697_v14, 312  ;;  %v4110_v7 = vadd.f32 %v4109_v52, %v4108_v5  ;;  %v4054_v5 = vadd.f32 %v4053_v20, %v4052_v55  ;;  %v4184_v55 = vsel %vm8702_vm10, %v4170_v32, %v4169_v18  ;;  %v4042_v50 = vadd.f32 %v4041_v48, %v4040_v13 }
 0xc66   : > { %v3874_v12 = vpop.permute.xlu1 %3873 }
 0xc67   : > { %v3870_v49 = vpop.permute.xlu0 %3869  ;;  %v3996_v36 = vsel %vm3772_vm1, %v3874_v12, 0.0  ;;  %v4111_v63 = vrot.slane %v4110_v7, 1  ;;  %v4132_v24 = vpack.c.bf16 %v4042_v50, %v4042_v50  ;;  %vm8715_vm1 = vmmov %vm8707_vm4 }
 0xc68   : > { %v3995_v28 = vsel %vm3771_vm0, %v3870_v49, 0.0  ;;  %4449 = vbcast.lane.b32.xlu1 %v8699_v60, 304  ;;  %v4055_v49 = vrot.slane %v4054_v5, 1  ;;  %vm8714_vm0 = vmmov %vm8706_vm5 }
 0xc69   : > { %v4057_v10 = vadd.f32 %v3996_v36, %v3995_v28  ;;  %4357 = vbcast.lane.b32.xlu0 %v8698_v23, 312  ;;  %v4112_v44 = vadd.f32 %v4111_v63, %v4110_v7  ;;  %v4131_v28 = vpack.c.bf16 %v8124_v15, %v8124_v15  ;;  %v4164_v54 = vunpack.c.l.b16 %v4132_v24  ;;  %v8724_v24 = vld [vmem:[#allocation28_spill] sm:$0xff] }
 0xc6a   : > { %v3970_v38 = vpop.permute.xlu1 %3969 }
 0xc6b   : > { %v4058_v45 = vrot.slane %v4057_v10, 4  ;;  %v3966_v58 = vpop.permute.xlu0 %3965  ;;  %v4012_v56 = vsel %vm3788_vm14, %v3970_v38, 0.0  ;;  %v4142_v46 = vpack.c.bf16 %v4112_v44, %v4112_v44  ;;  %v4163_v32 = vunpack.c.l.b16 %v4131_v28  ;;  %vm8718_vm14 = vmmov %vm8710_vm9 }
 0xc6c   : > { %v4011_v25 = vsel %vm3787_vm7, %v3966_v58, 0.0  ;;  %4565 = vbcast.lane.b32.xlu1 %v8700_v40, 304  ;;  %v4056_v58 = vadd.f32 %v4055_v49, %v4054_v5  ;;  %vm8716_vm7 = vmmov %vm8709_vm8 }
 0xc6d   : > { %v4059_v21 = vadd.f32 %v4058_v45, %v4057_v10  ;;  %v4113_v2 = vadd.f32 %v4012_v56, %v4011_v25  ;;  %4453 = vbcast.lane.b32.xlu0 %v8699_v60, 312  ;;  %v8703_v10 = vld [vmem:[#allocation19_spill] sm:$0xff]  ;;  %v4173_v45 = vunpack.c.l.b16 %v4141_v34  ;;  %v4185_v56 = vsel %vm8704_vm12, %v4171_v31, %v4184_v55  ;;  %v8713_v34 = vld [vmem:[#allocation66_spill] sm:$0xff] }
 0xc6e   : > { %v3882_v17 = vpop.permute.xlu1 %3881  ;;  %v4174_v37 = vunpack.c.l.b16 %v4142_v46  ;;  %v8717_v46 = vld [vmem:[#allocation27_spill] sm:$0xff] }
 0xc6f   : > { %v4060_v8 = vrot.slane %v4059_v21, 2  ;;  %v4114_v51 = vrot.slane %v4113_v2, 4  ;;  %v4204_v19 = vpop.permute.xlu0 %4203  ;;  %v3997_v14 = vsel %vm3773_vm13, %v3882_v17, 0.0  ;;  %v4134_v17 = vpack.c.bf16 %v4056_v58, %v4056_v58 }
 0xc70   : > { %5693 = vmatpush3.bf16.msra.mxu1 %v4204_v19  ;;  %4661 = vbcast.lane.b32.xlu1 %v8701_v39, 304  ;;  %vm8719_vm13 = vcmask 1047559  }
 0xc71   : > { %v4115_v47 = vadd.f32 %v4114_v51, %v4113_v2  ;;  %4569 = vbcast.lane.b32.xlu0 %v8700_v40, 312  ;;  %5694 = vmatprep.subr.bf16.mxu1 %v8551_v11  ;;  %v4061_v62 = vadd.f32 %v4060_v8, %v4059_v21  ;;  %v8705_v21 = vld [vmem:[#allocation64_spill] sm:$0xff]  ;;  %v4186_v2 = vsel %vm8706_vm5, %v4172_v0, %v4185_v56  ;;  %v4162_v8 = vunpack.c.l.b16 %v4130_v16 }
 0xc72   : > { %v3978_v23 = vpop.permute.xlu1 %3977  ;;  %v4133_v51 = vpack.c.bf16 %v4049_v61, %v4049_v61  ;;  %v4187_v19 = vsel %vm8707_vm4, %v4173_v45, %v4186_v2  ;;  %v8723_v56 = vld [vmem:[#allocation24_spill] sm:$0xff]  ;;  %v8725_v2 = vld [vmem:[#allocation25_spill] sm:$0xff] }
 0xc73   : > { %v4116_v29 = vrot.slane %v4115_v47, 2  ;;  %v3886_v52 = vpop.permute.xlu0 %3885  ;;  %v4013_v26 = vsel %vm3789_vm2, %v3978_v23, 0.0  ;;  %v4062_v57 = vrot.slane %v4061_v62, 1  ;;  %v4188_v16 = vsel %vm8709_vm8, %v4174_v37, %v4187_v19 }
 0xc74   : > { %v3998_v12 = vsel %vm3774_vm15, %v3886_v52, 0.0  ;;  %4365 = vbcast.lane.b32.xlu1 %v8703_v10, 304  ;;  %vm8721_vm15 = vmmov %vm8719_vm13 }
 0xc75   : > { %v4117_v36 = vadd.f32 %v4116_v29, %v4115_v47  ;;  %v4064_v27 = vadd.f32 %v3998_v12, %v3997_v14  ;;  %4665 = vbcast.lane.b32.xlu0 %v8701_v39, 312  ;;  %v4063_v9 = vadd.f32 %v4062_v57, %v4061_v62  ;;  %v4161_v14 = vunpack.c.l.b16 %v4129_v22 }
 0xc76   : > { %v4916_v60 = vpop.permute.xlu1 %4915  ;;  %v4165_v39 = vunpack.c.l.b16 %v4133_v51  ;;  %v4166_v29 = vunpack.c.l.b16 %v4134_v17  ;;  %v8726_v51 = vld [vmem:[#allocation20_spill] sm:$0xff] }
 0xc77   : > { %v4118_v42 = vrot.slane %v4117_v36, 1  ;;  %v4065_v30 = vrot.slane %v4064_v27, 4  ;;  %v3982_v7 = vpop.permute.xlu0 %3981  ;;  %5709 = vmatpush3.bf16.msra.mxu0 %v4916_v60  ;;  %v4135_v15 = vpack.c.bf16 %v4063_v9, %v4063_v9  ;;  %v4177_v35 = vsel %vm8711_vm6, %v4162_v8, %v4161_v14  ;;  %v8720_v60 = vld [vmem:[#allocation67_spill] sm:$0xff] }
 0xc78   : > { %v4014_v38 = vsel %vm3790_vm11, %v3982_v7, 0.0  ;;  %5710 = vmatprep.subr.bf16.mxu0 %v8551_v11  ;;  %4461 = vbcast.lane.b32.xlu1 %v8705_v21, 304  ;;  %v4178_v22 = vsel %vm8712_vm3, %v4163_v32, %v4177_v35 }
 0xc79   : > { %v4119_v4 = vadd.f32 %v4118_v42, %v4117_v36  ;;  %v4066_v20 = vadd.f32 %v4065_v30, %v4064_v27  ;;  %v4120_v25 = vadd.f32 %v4014_v38, %v4013_v26  ;;  %4369 = vbcast.lane.b32.xlu0 %v8703_v10, 312  ;;  %v4167_v23 = vunpack.c.l.b16 %v4135_v15 }
 0xc7a   : > { %v8145_v43 = vpop.permute.xlu1 %4281  ;;  %v4179_v49 = vsel %vm8714_vm0, %v4164_v54, %v4178_v22  ;;  %vm8727_vm0 = vcmask 1041409  }
 0xc7b   : > { %v4143_v13 = vpack.c.bf16 %v4119_v4, %v4119_v4  ;;  %v4067_v53 = vrot.slane %v4066_v20, 2  ;;  %v4121_v63 = vrot.slane %v4120_v25, 4  ;;  %v4202_v40 = vpop.permute.xlu0 %4201  ;;  %v4180_v36 = vsel %vm8715_vm1, %v4165_v39, %v4179_v49  ;;  %v8722_v4 = vld [vmem:[#allocation68_spill] sm:$0xff] }
 0xc7c   : > { %5695 = vmatpush3.bf16.msra.mxu1 %v4202_v40  ;;  %4577 = vbcast.lane.b32.xlu1 %v8708_v41, 304  ;;  %v4181_v50 = vsel %vm8716_vm7, %v4166_v29, %v4180_v36  ;;  %vm4467_vm2 = vcmp.eq.s32.totalorder %v6980_v59, %v8145_v43 }
 0xc7d   : > { %v4175_v18 = vunpack.c.l.b16 %v4143_v13  ;;  %v4068_v3 = vadd.f32 %v4067_v53, %v4066_v20  ;;  %v4122_v5 = vadd.f32 %v4121_v63, %v4120_v25  ;;  %4465 = vbcast.lane.b32.xlu0 %v8705_v21, 312  ;;  %5696 = vmatprep.subr.bf16.mxu1 %v8551_v11  ;;  %v4182_v57 = vsel %vm8718_vm14, %v4167_v23, %v4181_v50  ;;  %vm8728_vm14 = vmmov %vm8727_vm0 }
 0xc7e   : > { %v4294_v44 = vpop.permute.xlu1 %4293 }
 0xc7f   : > { %v4069_v47 = vrot.slane %v4068_v3, 1  ;;  %v4123_v48 = vrot.slane %v4122_v5, 2  ;;  %v4286_v33 = vpop.permute.xlu0 %4285  ;;  %v4189_v62 = vsel %vm8710_vm9, %v4175_v18, %v4188_v16  ;;  %vm4469_vm11 = vcmp.eq.s32.totalorder %v6980_v59, %v4294_v44 }
 0xc80   : > { %4673 = vbcast.lane.b32.xlu1 %v8713_v34, 304  ;;  %vm4468_vm10 = vcmp.eq.s32.totalorder %v6980_v59, %v4286_v33 }
 0xc81   : > { %v4070_v52 = vadd.f32 %v4069_v47, %v4068_v3  ;;  %v4124_v6 = vadd.f32 %v4123_v48, %v4122_v5  ;;  %4581 = vbcast.lane.b32.xlu0 %v8708_v41, 312 }
 0xc82   : > { %v4378_v28 = vpop.permute.xlu1 %4377 }
 0xc83   : > { %v4136_v12 = vpack.c.bf16 %v4070_v52, %v4070_v52  ;;  %v4125_v26 = vrot.slane %v4124_v6, 1  ;;  %v4298_v55 = vpop.permute.xlu0 %4297  ;;  %vm4483_vm5 = vcmp.eq.s32.totalorder %v6980_v59, %v4378_v28 }
 0xc84   : > { %4911 = vrot.lane.b32.xlu1 %v8717_v46, %s6028_s25  ;;  %vm4470_vm12 = vcmp.eq.s32.totalorder %v6980_v59, %v4298_v55 }
 0xc85   : > { %v4168_v27 = vunpack.c.l.b16 %v4136_v12  ;;  %v4126_v31 = vadd.f32 %v4125_v26, %v4124_v6  ;;  %4677 = vbcast.lane.b32.xlu0 %v8713_v34, 312 }
 0xc86   : > { %v4390_v42 = vpop.permute.xlu1 %4389 }
 0xc87   : > { %v4144_v10 = vpack.c.bf16 %v4126_v31, %v4126_v31  ;;  %v4382_v0 = vpop.permute.xlu0 %4381  ;;  %v8171_v30 = vsel %vm8719_vm13, %v4168_v27, %v4182_v57  ;;  %vm4485_vm8 = vcmp.eq.s32.totalorder %v6980_v59, %v4390_v42 }
 0xc88   : > { %4593 = vbcast.lane.b32.xlu1 %v8720_v60, 312  ;;  %vm4484_vm4 = vcmp.eq.s32.totalorder %v6980_v59, %v4382_v0 }
 0xc89   : > { %v4176_v7 = vunpack.c.l.b16 %v4144_v10  ;;  %4589 = vbcast.lane.b32.xlu0 %v8720_v60, 304 }
 0xc8a   : > { %v8178_v58 = vpop.permute.xlu1 %4305 }
 0xc8b   : > { %v4394_v61 = vpop.permute.xlu0 %4393  ;;  %v8176_v45 = vsel %vm8721_vm15, %v4176_v7, %v4189_v62  ;;  %vm4471_vm6 = vcmp.eq.s32.totalorder %v6980_v59, %v8178_v58 }
 0xc8c   : > { %v4191_v38 = vpack.c.b16 %v8176_v45, %v8171_v30  ;;  %4689 = vbcast.lane.b32.xlu1 %v8722_v4, 312  ;;  %vm4486_vm9 = vcmp.eq.s32.totalorder %v6980_v59, %v4394_v61 }
 0xc8d   : > { %4685 = vbcast.lane.b32.xlu0 %v8722_v4, 304 }
 0xc8e   : > { %v8186_v25 = vpop.permute.xlu1 %4401 }
 0xc8f   : > { %v8184_v20 = vpop.permute.xlu0 %4309  ;;  %vm4487_vm1 = vcmp.eq.s32.totalorder %v6980_v59, %v8186_v25 }
 0xc90   : > { %4909 = vrot.lane.b32.xlu1 %v8724_v24, %s6028_s25  ;;  %vm4472_vm3 = vcmp.eq.s32.totalorder %v6980_v59, %v8184_v20 }
 0xc91   : > { %4197 = vrot.lane.b32.xlu0 %v8723_v56, %s6027_s24 }
 0xc92   : > { %v4506_v9 = vpop.permute.xlu1 %4505 }
 0xc93   : > { %v8192_v37 = vpop.permute.xlu0 %4405  ;;  %v4691_v21 = vsel %vm4467_vm2, %v4506_v9, 0.0 }
 0xc94   : > { %4907 = vrot.lane.b32.xlu1 %v8691_v1, %s6028_s25  ;;  %vm4488_vm7 = vcmp.eq.s32.totalorder %v6980_v59, %v8192_v37 }
 0xc95   : > { %4195 = vrot.lane.b32.xlu0 %v8725_v2, %s6027_s24 }
 0xc96   : > { %v4518_v63 = vpop.permute.xlu1 %4517 }
 0xc97   : > { %v4510_v13 = vpop.permute.xlu0 %4509  ;;  %v4693_v8 = vsel %vm4469_vm11, %v4518_v63, 0.0 }
 0xc98   : > { %v4692_v53 = vsel %vm4468_vm10, %v4510_v13, 0.0  ;;  %4905 = vrot.lane.b32.xlu1 %v8723_v56, %s6028_s25  ;;  %vm8729_vm10 = vcmask 1042434  }
 0xc99   : > { %v4723_v40 = vadd.f32 %v4692_v53, %v4691_v21  ;;  %4193 = vrot.lane.b32.xlu0 %v8726_v51, %s6027_s24  ;;  %s8749_s24 = sld [smem:[#allocation77_spill]] (!%p5450_p8) }
 0xc9a   : > { %v4602_v17 = vpop.permute.xlu1 %4601 }
 0xc9b   : > { %v4724_v43 = vrot.slane %v4723_v40, 4  ;;  %v4522_v19 = vpop.permute.xlu0 %4521  ;;  %v4707_v5 = vsel %vm4483_vm5, %v4602_v17, 0.0 }
 0xc9c   : > { %v4694_v1 = vsel %vm4470_vm12, %v4522_v19, 0.0  ;;  %4901 = vrot.lane.b32.xlu1 %v8726_v51, %s6028_s25  ;;  %vm8730_vm12 = vmmov %vm8729_vm10 }
 0xc9d   : > { %v4725_v18 = vadd.f32 %v4724_v43, %v4723_v40  ;;  %v4730_v3 = vadd.f32 %v4694_v1, %v4693_v8  ;;  %4903 = vrot.lane.b32.xlu0 %v8725_v2, %s6028_s25 }
 0xc9e   : > { %v4614_v16 = vpop.permute.xlu1 %4613 }
 0xc9f   : > { %v4726_v14 = vrot.slane %v4725_v18, 2  ;;  %v4731_v32 = vrot.slane %v4730_v3, 4  ;;  %v4606_v15 = vpop.permute.xlu0 %4605  ;;  %v4709_v33 = vsel %vm4485_vm8, %v4614_v16, 0.0  ;;  %vm8731_vm8 = vcmask 1043459  }
 0xca0   : > { %v4708_v41 = vsel %vm4484_vm4, %v4606_v15, 0.0 }
 0xca1   : > { %v4727_v54 = vadd.f32 %v4726_v14, %v4725_v18  ;;  %v4732_v47 = vadd.f32 %v4731_v32, %v4730_v3  ;;  %v4779_v48 = vadd.f32 %v4708_v41, %v4707_v5 }
 0xca2   : > { %v8215_v52 = vpop.permute.xlu1 %4317 }
 0xca3   : > { %v4728_v44 = vrot.slane %v4727_v54, 1  ;;  %v4733_v62 = vrot.slane %v4732_v47, 2  ;;  %v4780_v39 = vrot.slane %v4779_v48, 4  ;;  %v4618_v35 = vpop.permute.xlu0 %4617  ;;  %vm4473_vm13 = vcmp.eq.s32.totalorder %v6980_v59, %v8215_v52 }
 0xca4   : > { %v4710_v29 = vsel %vm4486_vm9, %v4618_v35, 0.0 }
 0xca5   : > { %v4729_v6 = vadd.f32 %v4728_v44, %v4727_v54  ;;  %v4734_v22 = vadd.f32 %v4733_v62, %v4732_v47  ;;  %v4781_v23 = vadd.f32 %v4780_v39, %v4779_v48  ;;  %v4786_v34 = vadd.f32 %v4710_v29, %v4709_v33 }
 0xca6   : > { %v8219_v36 = vpop.permute.xlu1 %4413 }
 0xca7   : > { %v4735_v49 = vrot.slane %v4734_v22, 1  ;;  %v4782_v12 = vrot.slane %v4781_v23, 2  ;;  %v4787_v26 = vrot.slane %v4786_v34, 4  ;;  %v8217_v55 = vpop.permute.xlu0 %4321  ;;  %v4837_v28 = vpack.c.bf16 %v4729_v6, %v4729_v6 }
 0xca8   : > { %vm4474_vm15 = vcmp.eq.s32.totalorder %v6980_v59, %v8217_v55  ;;  %vm4489_vm2 = vcmp.eq.s32.totalorder %v6980_v59, %v8219_v36 }
 0xca9   : > { %v4736_v27 = vadd.f32 %v4735_v49, %v4734_v22  ;;  %v4783_v31 = vadd.f32 %v4782_v12, %v4781_v23  ;;  %v4788_v50 = vadd.f32 %v4787_v26, %v4786_v34  ;;  %v4869_v42 = vunpack.c.l.b16 %v4837_v28 }
 0xcaa   : > { %v4530_v7 = vpop.permute.xlu1 %4529 }
 0xcab   : > { %v4838_v46 = vpack.c.bf16 %v4736_v27, %v4736_v27  ;;  %v4784_v57 = vrot.slane %v4783_v31, 1  ;;  %v4789_v10 = vrot.slane %v4788_v50, 2  ;;  %v8221_v0 = vpop.permute.xlu0 %4417  ;;  %v4695_v56 = vsel %vm4471_vm6, %v4530_v7, 0.0 }
 0xcac   : > { %vm4490_vm11 = vcmp.eq.s32.totalorder %v6980_v59, %v8221_v0 }
 0xcad   : > { %v4870_v60 = vunpack.c.l.b16 %v4838_v46  ;;  %v4785_v61 = vadd.f32 %v4784_v57, %v4783_v31  ;;  %v4790_v4 = vadd.f32 %v4789_v10, %v4788_v50 }
 0xcae   : > { %v4626_v13 = vpop.permute.xlu1 %4625 }
 0xcaf   : > { %v4885_v24 = vsel %vm8727_vm0, %v4870_v60, %v4869_v42  ;;  %v4791_v9 = vrot.slane %v4790_v4, 1  ;;  %v4534_v21 = vpop.permute.xlu0 %4533  ;;  %v4845_v53 = vpack.c.bf16 %v4785_v61, %v4785_v61  ;;  %v4711_v40 = vsel %vm4487_vm1, %v4626_v13, 0.0 }
 0xcb0   : > { %v4696_v2 = vsel %vm4472_vm3, %v4534_v21, 0.0  ;;  %vm8732_vm3 = vmmov %vm8731_vm8  ;;  %vm8733_vm0 = vcmask 1044484  }
 0xcb1   : > { %v4792_v58 = vadd.f32 %v4791_v9, %v4790_v4  ;;  %v4737_v63 = vadd.f32 %v4696_v2, %v4695_v56  ;;  %v4877_v1 = vunpack.c.l.b16 %v4845_v53 }
 0xcb2   : > { %v4914_v19 = vpop.permute.xlu1 %4913 }
 0xcb3   : > { %v4846_v8 = vpack.c.bf16 %v4792_v58, %v4792_v58  ;;  %v4738_v51 = vrot.slane %v4737_v63, 4  ;;  %v4630_v43 = vpop.permute.xlu0 %4629  ;;  %5711 = vmatpush3.bf16.msra.mxu0 %v4914_v19 }
 0xcb4   : > { %v4712_v20 = vsel %vm4488_vm7, %v4630_v43, 0.0  ;;  %5712 = vmatprep.subr.bf16.mxu0 %v8551_v11 }
 0xcb5   : > { %v4878_v17 = vunpack.c.l.b16 %v4846_v8  ;;  %v4739_v18 = vadd.f32 %v4738_v51, %v4737_v63  ;;  %v4793_v3 = vadd.f32 %v4712_v20, %v4711_v40 }
 0xcb6   : > { %v4334_v15 = vpop.permute.xlu1 %4333 }
 0xcb7   : > { %v4892_v25 = vsel %vm8728_vm14, %v4878_v17, %v4877_v1  ;;  %v4740_v5 = vrot.slane %v4739_v18, 2  ;;  %v4794_v14 = vrot.slane %v4793_v3, 4  ;;  %v4330_v32 = vpop.permute.xlu0 %4329  ;;  %vm4476_vm4 = vcmp.eq.s32.totalorder %v6980_v59, %v4334_v15  ;;  %vm8734_vm14 = vmmov %vm8733_vm0 }
 0xcb8   : > { %vm4475_vm5 = vcmp.eq.s32.totalorder %v6980_v59, %v4330_v32 }
 0xcb9   : > { %v4741_v41 = vadd.f32 %v4740_v5, %v4739_v18  ;;  %v4795_v37 = vadd.f32 %v4794_v14, %v4793_v3 }
 0xcba   : > { %v8236_v48 = vpop.permute.xlu1 %4429 }
 0xcbb   : > { %v4742_v16 = vrot.slane %v4741_v41, 1  ;;  %v4796_v54 = vrot.slane %v4795_v37, 2  ;;  %v8234_v47 = vpop.permute.xlu0 %4425  ;;  %vm4492_vm6 = vcmp.eq.s32.totalorder %v6980_v59, %v8236_v48 }
 0xcbc   : > { %vm4491_vm9 = vcmp.eq.s32.totalorder %v6980_v59, %v8234_v47 }
 0xcbd   : > { %v4743_v33 = vadd.f32 %v4742_v16, %v4741_v41  ;;  %v4797_v44 = vadd.f32 %v4796_v54, %v4795_v37 }
 0xcbe   : > { %v4546_v6 = vpop.permute.xlu1 %4545 }
 0xcbf   : > { %v4839_v62 = vpack.c.bf16 %v4743_v33, %v4743_v33  ;;  %v4798_v39 = vrot.slane %v4797_v44, 1  ;;  %v4542_v35 = vpop.permute.xlu0 %4541  ;;  %v4698_v34 = vsel %vm4474_vm15, %v4546_v6, 0.0 }
 0xcc0   : > { %v4697_v29 = vsel %vm4473_vm13, %v4542_v35, 0.0 }
 0xcc1   : > { %v4871_v22 = vunpack.c.l.b16 %v4839_v62  ;;  %v4799_v23 = vadd.f32 %v4798_v39, %v4797_v44  ;;  %v4744_v49 = vadd.f32 %v4698_v34, %v4697_v29 }
 0xcc2   : > { %v4642_v31 = vpop.permute.xlu1 %4641 }
 0xcc3   : > { %v4886_v12 = vsel %vm8729_vm10, %v4871_v22, %v4885_v24  ;;  %v4847_v26 = vpack.c.bf16 %v4799_v23, %v4799_v23  ;;  %v4638_v28 = vpop.permute.xlu0 %4637  ;;  %v4745_v52 = vrot.slane %v4744_v49, 4  ;;  %v4714_v50 = vsel %vm4490_vm11, %v4642_v31, 0.0 }
 0xcc4   : > { %v4713_v27 = vsel %vm4489_vm2, %v4638_v28, 0.0 }
 0xcc5   : > { %v4879_v55 = vunpack.c.l.b16 %v4847_v26  ;;  %v4746_v46 = vadd.f32 %v4745_v52, %v4744_v49  ;;  %v4800_v57 = vadd.f32 %v4714_v50, %v4713_v27 }
 0xcc6   : > { %v8248_v36 = vpop.permute.xlu1 %4341 }
 0xcc7   : > { %v4893_v10 = vsel %vm8730_vm12, %v4879_v55, %v4892_v25  ;;  %v4200_v42 = vpop.permute.xlu0 %4199  ;;  %v4747_v7 = vrot.slane %v4746_v46, 2  ;;  %v4801_v60 = vrot.slane %v4800_v57, 4  ;;  %vm4477_vm13 = vcmp.eq.s32.totalorder %v6980_v59, %v8248_v36 }
 0xcc8   : > { %5697 = vmatpush3.bf16.msra.mxu1 %v4200_v42 }
 0xcc9   : > { %5698 = vmatprep.subr.bf16.mxu1 %v8551_v11  ;;  %v4748_v61 = vadd.f32 %v4747_v7, %v4746_v46  ;;  %v4802_v4 = vadd.f32 %v4801_v60, %v4800_v57 }
 0xcca   : > { %v8251_v9 = vpop.permute.xlu1 %4437 }
 0xccb   : > { %v4346_v0 = vpop.permute.xlu0 %4345  ;;  %v4749_v56 = vrot.slane %v4748_v61, 1  ;;  %v4803_v24 = vrot.slane %v4802_v4, 2  ;;  %vm4493_vm15 = vcmp.eq.s32.totalorder %v6980_v59, %v8251_v9 }
 0xccc   : > { %vm4478_vm1 = vcmp.eq.s32.totalorder %v6980_v59, %v4346_v0 }
 0xccd   : > { %v4750_v21 = vadd.f32 %v4749_v56, %v4748_v61  ;;  %v4804_v2 = vadd.f32 %v4803_v24, %v4802_v4 }
 0xcce   : > { %v4554_v63 = vpop.permute.xlu1 %4553 }
 0xccf   : > { %v4442_v13 = vpop.permute.xlu0 %4441  ;;  %v4840_v53 = vpack.c.bf16 %v4750_v21, %v4750_v21  ;;  %v4805_v58 = vrot.slane %v4804_v2, 1  ;;  %v4699_v19 = vsel %vm4475_vm5, %v4554_v63, 0.0 }
 0xcd0   : > { %vm4494_vm7 = vcmp.eq.s32.totalorder %v6980_v59, %v4442_v13 }
 0xcd1   : > { %v4872_v40 = vunpack.c.l.b16 %v4840_v53  ;;  %v4806_v8 = vadd.f32 %v4805_v58, %v4804_v2 }
 0xcd2   : > { %v4650_v17 = vpop.permute.xlu1 %4649 }
 0xcd3   : > { %v4558_v51 = vpop.permute.xlu0 %4557  ;;  %v4887_v43 = vsel %vm8731_vm8, %v4872_v40, %v4886_v12  ;;  %v4848_v20 = vpack.c.bf16 %v4806_v8, %v4806_v8  ;;  %v4715_v32 = vsel %vm4491_vm9, %v4650_v17, 0.0 }
 0xcd4   : > { %v4700_v1 = vsel %vm4476_vm4, %v4558_v51, 0.0 }
 0xcd5   : > { %v4751_v18 = vadd.f32 %v4700_v1, %v4699_v19  ;;  %v4880_v3 = vunpack.c.l.b16 %v4848_v20 }
 0xcd6   : > { %v4354_v41 = vpop.permute.xlu1 %4353 }
 0xcd7   : > { %v4752_v25 = vrot.slane %v4751_v18, 4  ;;  %v4654_v5 = vpop.permute.xlu0 %4653  ;;  %v4894_v14 = vsel %vm8732_vm3, %v4880_v3, %v4893_v10  ;;  %vm4479_vm2 = vcmp.eq.s32.totalorder %v6980_v59, %v4354_v41 }
 0xcd8   : > { %v4716_v15 = vsel %vm4492_vm6, %v4654_v5, 0.0  ;;  %vm8735_vm6 = vcmask 1045509  }
 0xcd9   : > { %v4753_v37 = vadd.f32 %v4752_v25, %v4751_v18  ;;  %v4807_v16 = vadd.f32 %v4716_v15, %v4715_v32  ;;  %vm8736_vm3 = vmmov %vm8735_vm6 }
 0xcda   : > { %v4450_v62 = vpop.permute.xlu1 %4449 }
 0xcdb   : > { %v4754_v54 = vrot.slane %v4753_v37, 2  ;;  %v4808_v33 = vrot.slane %v4807_v16, 4  ;;  %v4358_v44 = vpop.permute.xlu0 %4357  ;;  %vm4495_vm11 = vcmp.eq.s32.totalorder %v6980_v59, %v4450_v62 }
 0xcdc   : > { %vm4480_vm10 = vcmp.eq.s32.totalorder %v6980_v59, %v4358_v44 }
 0xcdd   : > { %v4755_v39 = vadd.f32 %v4754_v54, %v4753_v37  ;;  %v4809_v35 = vadd.f32 %v4808_v33, %v4807_v16 }
 0xcde   : > { %v4566_v22 = vpop.permute.xlu1 %4565 }
 0xcdf   : > { %v4756_v29 = vrot.slane %v4755_v39, 1  ;;  %v4810_v47 = vrot.slane %v4809_v35, 2  ;;  %v4454_v6 = vpop.permute.xlu0 %4453  ;;  %v4701_v61 = vsel %vm4477_vm13, %v4566_v22, 0.0  ;;  %vm3560_vm13 = vcmask 130112  }
 0xce0   : > { %vm4496_vm12 = vcmp.eq.s32.totalorder %v6980_v59, %v4454_v6 }
 0xce1   : > { %v4757_v48 = vadd.f32 %v4756_v29, %v4755_v39  ;;  %v4811_v23 = vadd.f32 %v4810_v47, %v4809_v35 }
 0xce2   : > { %v4662_v26 = vpop.permute.xlu1 %4661 }
 0xce3   : > { %v4841_v34 = vpack.c.bf16 %v4757_v48, %v4757_v48  ;;  %v4812_v49 = vrot.slane %v4811_v23, 1  ;;  %v4570_v12 = vpop.permute.xlu0 %4569  ;;  %v4717_v4 = vsel %vm4493_vm15, %v4662_v26, 0.0  ;;  %vm4268_vm15 = vcmask 195712  }
 0xce4   : > { %v4702_v10 = vsel %vm4478_vm1, %v4570_v12, 0.0 }
 0xce5   : > { %v4873_v28 = vunpack.c.l.b16 %v4841_v34  ;;  %v4813_v52 = vadd.f32 %v4812_v49, %v4811_v23  ;;  %v4758_v56 = vadd.f32 %v4702_v10, %v4701_v61 }
 0xce6   : > { %v4366_v50 = vpop.permute.xlu1 %4365 }
 0xce7   : > { %v8262_v27 = vsel %vm8733_vm0, %v4873_v28, %v4887_v43  ;;  %v4849_v31 = vpack.c.bf16 %v4813_v52, %v4813_v52  ;;  %v4666_v55 = vpop.permute.xlu0 %4665  ;;  %v4759_v2 = vrot.slane %v4758_v56, 4  ;;  %vm4481_vm5 = vcmp.eq.s32.totalorder %v6980_v59, %v4366_v50 }
 0xce8   : > { %v4718_v42 = vsel %vm4494_vm7, %v4666_v55, 0.0  ;;  %vm8737_vm0 = vcmask 1046534   ;;  %vm8739_vm7 = vcmask 1047559  }
 0xce9   : > { %v4881_v46 = vunpack.c.l.b16 %v4849_v31  ;;  %v4814_v24 = vadd.f32 %v4718_v42, %v4717_v4  ;;  %v4760_v8 = vadd.f32 %v4759_v2, %v4758_v56  ;;  %vm8738_vm1 = vmmov %vm8737_vm0 }
 0xcea   : > { %v4462_v60 = vpop.permute.xlu1 %4461 }
 0xceb   : > { %v8267_v57 = vsel %vm8734_vm14, %v4881_v46, %v4894_v14  ;;  %v4370_v7 = vpop.permute.xlu0 %4369  ;;  %v4815_v13 = vrot.slane %v4814_v24, 4  ;;  %v4761_v3 = vrot.slane %v4760_v8, 2  ;;  %vm4497_vm8 = vcmp.eq.s32.totalorder %v6980_v59, %v4462_v60  ;;  %vm8740_vm14 = vmmov %vm8739_vm7 }
 0xcec   : > { %vm4482_vm4 = vcmp.eq.s32.totalorder %v6980_v59, %v4370_v7 }
 0xced   : > { %v4816_v9 = vadd.f32 %v4815_v13, %v4814_v24  ;;  %v4762_v54 = vadd.f32 %v4761_v3, %v4760_v8 }
 0xcee   : > { %v4578_v21 = vpop.permute.xlu1 %4577 }
 0xcef   : > { %v4466_v0 = vpop.permute.xlu0 %4465  ;;  %v4703_v58 = vsel %vm4479_vm2, %v4578_v21, 0.0  ;;  %v4817_v25 = vrot.slane %v4816_v9, 2  ;;  %v4763_v49 = vrot.slane %v4762_v54, 1  ;;  %vm4976_vm2 = vcmask 261312  }
 0xcf0   : > { %vm4498_vm9 = vcmp.eq.s32.totalorder %v6980_v59, %v4466_v0 }
 0xcf1   : > { %v4818_v33 = vadd.f32 %v4817_v25, %v4816_v9  ;;  %v4764_v7 = vadd.f32 %v4763_v49, %v4762_v54 }
 0xcf2   : > { %v4674_v36 = vpop.permute.xlu1 %4673 }
 0xcf3   : > { %v4582_v53 = vpop.permute.xlu0 %4581  ;;  %v4719_v20 = vsel %vm4495_vm11, %v4674_v36, 0.0  ;;  %v4819_v12 = vrot.slane %v4818_v33, 1 }
 0xcf4   : > { %v4704_v63 = vsel %vm4480_vm10, %v4582_v53, 0.0  ;;  %v4842_v53 = vpack.c.bf16 %v4764_v7, %v4764_v7 }
 0xcf5   : > { %v4765_v40 = vadd.f32 %v4704_v63, %v4703_v58  ;;  %v4820_v60 = vadd.f32 %v4819_v12, %v4818_v33  ;;  %v3411_v33 = vld [vmem:[#allocation4] sm:$0xff] }
 0xcf6   : > { %v4912_v1 = vpop.permute.xlu1 %4911 }
 0xcf7   : > { %v4766_v51 = vrot.slane %v4765_v40, 4  ;;  %v4678_v43 = vpop.permute.xlu0 %4677  ;;  %5713 = vmatpush3.bf16.msra.mxu0 %v4912_v1  ;;  %v4850_v58 = vpack.c.bf16 %v4820_v60, %v4820_v60 }
 0xcf8   : > { %v4720_v19 = vsel %vm4496_vm12, %v4678_v43, 0.0  ;;  %5714 = vmatprep.subr.bf16.mxu0 %v8551_v11 }
 0xcf9   : > { %v4767_v17 = vadd.f32 %v4766_v51, %v4765_v40  ;;  %v4821_v18 = vadd.f32 %v4720_v19, %v4719_v20  ;;  %v4874_v19 = vunpack.c.l.b16 %v4842_v53  ;;  %v4882_v1 = vunpack.c.l.b16 %v4850_v58 }
 0xcfa   : > { %v4594_v41 = vpop.permute.xlu1 %4593 }
 0xcfb   : > { %v4768_v5 = vrot.slane %v4767_v17, 2  ;;  %v4822_v14 = vrot.slane %v4821_v18, 4  ;;  %v4590_v32 = vpop.permute.xlu0 %4589  ;;  %v4706_v16 = vsel %vm4482_vm4, %v4594_v41, 0.0  ;;  %v4896_v41 = vsel %vm8736_vm3, %v4882_v1, %v8267_v57 }
 0xcfc   : > { %v4705_v15 = vsel %vm4481_vm5, %v4590_v32, 0.0 }
 0xcfd   : > { %v4823_v37 = vadd.f32 %v4822_v14, %v4821_v18  ;;  %v4772_v44 = vadd.f32 %v4706_v16, %v4705_v15  ;;  %v4769_v39 = vadd.f32 %v4768_v5, %v4767_v17  ;;  %v4889_v15 = vsel %vm8735_vm6, %v4874_v19, %v8262_v27 }
 0xcfe   : > { %v3543_v62 = vpop.f32.mrf.mxu0  ;;  %v4690_v22 = vpop.permute.xlu1 %4689 }
 0xcff   : > { %v4824_v35 = vrot.slane %v4823_v37, 2  ;;  %v4686_v29 = vpop.permute.xlu0 %4685  ;;  %3552 = vrot.lane.b32.xlu0 %v3543_v62, %s6029_s26  ;;  %v4773_v47 = vrot.slane %v4772_v44, 4  ;;  %v4722_v34 = vsel %vm4498_vm9, %v4690_v22, 0.0  ;;  %v4770_v31 = vrot.slane %v4769_v39, 1  ;;  %v3412_v62 = vld [vmem:[#allocation4 + $0x8] sm:$0xff] }
 0xd00   : > { %v4721_v6 = vsel %vm4497_vm8, %v4686_v29, 0.0  ;;  %v5686_v48 = vpop.f32.mrf.mxu0 }
 0xd01   : > { %v4825_v23 = vadd.f32 %v4824_v35, %v4823_v37  ;;  %v4774_v26 = vadd.f32 %v4773_v47, %v4772_v44  ;;  %v4828_v28 = vadd.f32 %v4722_v34, %v4721_v6  ;;  %v4771_v56 = vadd.f32 %v4770_v31, %v4769_v39 }
 0xd02   : > { %v3546_v52 = vpop.f32.mrf.mxu0  ;;  %v4910_v42 = vpop.permute.xlu1 %4909 }
 0xd03   : > { %v4826_v55 = vrot.slane %v4825_v23, 1  ;;  %v4198_v50 = vpop.permute.xlu0 %4197  ;;  %3554 = vrot.lane.b32.xlu1 %v3546_v52, %s6029_s26  ;;  %v4775_v46 = vrot.slane %v4774_v26, 2  ;;  %v4829_v10 = vrot.slane %v4828_v28, 4  ;;  %5715 = vmatpush3.bf16.msra.mxu0 %v4910_v42  ;;  %v4843_v40 = vpack.c.bf16 %v4771_v56, %v4771_v56 }
 0xd04   : > { %5699 = vmatpush3.bf16.msra.mxu1 %v4198_v50  ;;  %v5687_v59 = vpop.f32.mrf.mxu0  ;;  %5716 = vmatprep.subr.bf16.mxu0 %v8551_v11 }
 0xd05   : > { %5700 = vmatprep.subr.bf16.mxu1 %v8551_v11  ;;  %v4776_v61 = vadd.f32 %v4775_v46, %v4774_v26  ;;  %v4830_v4 = vadd.f32 %v4829_v10, %v4828_v28  ;;  %v4827_v24 = vadd.f32 %v4826_v55, %v4825_v23  ;;  %v4875_v18 = vunpack.c.l.b16 %v4843_v40 }
 0xd06   : > { %v4908_v13 = vpop.permute.xlu1 %4907 }
 0xd07   : > { %v4196_v0 = vpop.permute.xlu0 %4195  ;;  %v4777_v21 = vrot.slane %v4776_v61, 1  ;;  %v4831_v2 = vrot.slane %v4830_v4, 2  ;;  %5717 = vmatpush3.bf16.msra.mxu0 %v4908_v13  ;;  %v4851_v8 = vpack.c.bf16 %v4827_v24, %v4827_v24  ;;  %v4890_v37 = vsel %vm8737_vm0, %v4875_v18, %v4889_v15 }
 0xd08   : > { %5701 = vmatpush3.bf16.msra.mxu1 %v4196_v0  ;;  %5718 = vmatprep.subr.bf16.mxu0 %v8551_v11 }
 0xd09   : > { %5702 = vmatprep.subr.bf16.mxu1 %v8551_v11  ;;  %v4778_v63 = vadd.f32 %v4777_v21, %v4776_v61  ;;  %v4832_v36 = vadd.f32 %v4831_v2, %v4830_v4  ;;  %v4883_v3 = vunpack.c.l.b16 %v4851_v8 }
 0xd0a   : > { %v4906_v20 = vpop.permute.xlu1 %4905 }
 0xd0b   : > { %v4194_v9 = vpop.permute.xlu0 %4193  ;;  %v4844_v51 = vpack.c.bf16 %v4778_v63, %v4778_v63  ;;  %v4833_v43 = vrot.slane %v4832_v36, 1  ;;  %5719 = vmatpush3.bf16.msra.mxu0 %v4906_v20  ;;  %v4897_v16 = vsel %vm8738_vm1, %v4883_v3, %v4896_v41 }
 0xd0c   : > { %5703 = vmatpush3.bf16.msra.mxu1 %v4194_v9  ;;  %5720 = vmatprep.subr.bf16.mxu0 %v8551_v11 }
 0xd0d   : > { %v4834_v17 = vadd.f32 %v4833_v43, %v4832_v36  ;;  %v4876_v5 = vunpack.c.l.b16 %v4844_v51 }
 0xd0e   : > { %v4902_v54 = vpop.permute.xlu1 %4901 }
 0xd0f   : > { %v4904_v25 = vpop.permute.xlu0 %4903  ;;  %5705 = vmatmul.mubr.bf16.vlgmr.msra.gmra.mxu1 %v4191_v38  ;;  %v4852_v14 = vpack.c.bf16 %v4834_v17, %v4834_v17  ;;  %v4891_v30 = vsel %vm8739_vm7, %v4876_v5, %v4890_v37 }
 0xd10   : > { %5721 = vmatpush3.bf16.msra.mxu0 %v4904_v25 }
 0xd11   : > { %v4884_v32 = vunpack.c.l.b16 %v4852_v14  ;;  %5722 = vmatprep.subr.bf16.mxu0 %v8551_v11 }
 0xd13   : > { %v4898_v45 = vsel %vm8740_vm14, %v4884_v32, %v4897_v16 }
 0xd14   : > { %5723 = vmatpush3.bf16.msra.mxu0 %v4902_v54  ;;  %v4899_v38 = vpack.c.b16 %v4898_v45, %v4891_v30 }
 0xd17   : > { %5725 = vmatmul.mubr.bf16.vlgmr.msra.gmra.mxu0 %v4899_v38 }
 0xd71   : > { %v3553_v11 = vpop.permute.xlu0 %3552 }
 0xd72   : > { %v3558_v44 = vadd.f32 %v3553_v11, %v3411_v33 }
 0xd74   : > { %3561 = vst.msk [vmem:[#allocation4] sm:$0xff] %vm3560_vm13, %v3558_v44 }
 0xd75   : > { %v3555_v27 = vpop.permute.xlu1 %3554 }
 0xd76   : > { %v3559_v57 = vadd.f32 %v3555_v27, %v3412_v62 }
 0xd78   : > { %3562 = vst.msk [vmem:[#allocation4 + $0x8] sm:$0xff] %vm3560_vm13, %v3559_v57 }
 0xd7b   : > { %v4127_v34 = vld [vmem:[#allocation4] sm:$0xff] }
 0xd7f   : > { %v4128_v26 = vld [vmem:[#allocation4 + $0x8] sm:$0xff] }
 0xdcf   : > { %v4251_v39 = vpop.f32.mrf.mxu1 }
 0xdd0   : > { %4260 = vrot.lane.b32.xlu0 %v4251_v39, %s6030_s22 }
 0xdd1   : > { %v5706_v35 = vpop.f32.mrf.mxu1 }
 0xdd3   : > { %v4254_v29 = vpop.f32.mrf.mxu1 }
 0xdd4   : > { %4262 = vrot.lane.b32.xlu1 %v4254_v29, %s6030_s22 }
 0xdd5   : > { %v5707_v47 = vpop.f32.mrf.mxu1 }
 0xdd7   : > { %v4959_v6 = vpop.f32.mrf.mxu0 }
 0xdd8   : > { %4968 = vrot.lane.b32.xlu0 %v4959_v6, %s6031_s16 }
 0xdd9   : > { %v5726_v22 = vpop.f32.mrf.mxu0 }
 0xddb   : > { %v4962_v48 = vpop.f32.mrf.mxu0 }
 0xddc   : > { %4970 = vrot.lane.b32.xlu1 %v4962_v48, %s6031_s16 }
 0xddd   : > { %v5727_v23 = vpop.f32.mrf.mxu0 }
 0xe42   : > { %v4261_v49 = vpop.permute.xlu0 %4260 }
 0xe43   : > { %v4266_v12 = vadd.f32 %v4261_v49, %v4127_v34 }
 0xe45   : > { %4269 = vst.msk [vmem:[#allocation4] sm:$0xff] %vm4268_vm15, %v4266_v12 }
 0xe46   : > { %v4263_v28 = vpop.permute.xlu1 %4262 }
 0xe47   : > { %v4267_v52 = vadd.f32 %v4263_v28, %v4128_v26 }
 0xe49   : > { %4270 = vst.msk [vmem:[#allocation4 + $0x8] sm:$0xff] %vm4268_vm15, %v4267_v52 }
 0xe4a   : > { %v4969_v55 = vpop.permute.xlu0 %4968 }
 0xe4c   : > { %v4835_v31 = vld [vmem:[#allocation4] sm:$0xff] }
 0xe4d   : > { %v4974_v50 = vadd.f32 %v4969_v55, %v4835_v31 }
 0xe4e   : > { %v4971_v10 = vpop.permute.xlu1 %4970 }
 0xe4f   : > { %4977 = vst.msk [vmem:[#allocation4] sm:$0xff] %vm4976_vm2, %v4974_v50  ;;  %4982 = sbr.rel (%p5450_p8) target bundleno = 4901 (0x1325), region = 100 }
 0xe50   : > { %v4836_v46 = vld [vmem:[#allocation4 + $0x8] sm:$0xff] }
 0xe51   : > { %v4975_v42 = vadd.f32 %v4971_v10, %v4836_v46 }
 0xe53   : > { %4978 = vst.msk [vmem:[#allocation4 + $0x8] sm:$0xff] %vm4976_vm2, %v4975_v42 }
 0xe54   : > { %v5939_v59 = vld [vmem:[%s8741_s19 + $0x8] sm:$0xff]   ;;  %v6032_v7 = vmov 0.0   ;;  %v5940_v60 = vld [vmem:[%s8741_s19] sm:$0xff]   ;;  %vm6033_vm10 = vmmov 0   ;;  %vm8742_vm11 = vcmask 261120   ;;  %v5943_v41 = vld [vmem:[%s8749_s24 + $0x18] sm:$0xff]  }
 0xe55   : > { %5728 = vmatprep.subr.bf16.mxu1 %v6032_v7  ;;  %5744 = vmatprep.subr.bf16.mxu0 %v6032_v7  ;;  %v5451_v24 = vld [vmem:[%s8743_s29] ss:$0 sm:$0xff]  ;;  %v4984_v63 = vld [vmem:[#allocation2 + $0x8] sm:$0xff]  ;;  %vm8744_vm12 = vmmov %vm8742_vm11  ;;  %vm5208_vm6 = vcmask 523264  }
 0xe56   : > { %5729 = vmatpush3.bf16.msra.mxu1 %v5939_v59  ;;  %5732 = vmatprep.mubr.msk.bf16.mxu1 %vm6033_vm10, %v6032_v7  ;;  %v4985_v61 = vld [vmem:[#allocation4] sm:$0xff]  ;;  %vm8745_vm5 = vmmov %vm8742_vm11  ;;  %v5941_v32 = vld [vmem:[%s8748_s2 + $0x8] sm:$0xff]  }
 0xe57   : > { %5730 = vmatprep.subr.bf16.mxu1 %v6032_v7  ;;  %5752 = vmatprep.mubr.msk.bf16.mxu0 %vm6033_vm10, %v6032_v7  ;;  %v4983_v21 = vld [vmem:[#allocation2] sm:$0xff]  ;;  %vm8746_vm4 = vmmov %vm8745_vm5  ;;  %v5944_v22 = vld [vmem:[%s8749_s24 + $0x10] sm:$0xff]  }
 0xe58   : > { %vm8747_vm8 = vmmov %vm8746_vm4  ;;  %v5942_v15 = vld [vmem:[%s8748_s2] sm:$0xff]   ;;  %5745 = vmatpush3.bf16.msra.mxu0 %v5943_v41  ;;  %v5945_v48 = vld [vmem:[%s8749_s24 + $0x8] sm:$0xff]  }
 0xe59   : > { %5746 = vmatprep.subr.bf16.mxu0 %v6032_v7  ;;  %v5455_v44 = vld [vmem:[%s8402_s17 + $0x2] ss:$0 sm:$0xff]  ;;  %v5456_v39 = vld [vmem:[%s8402_s17 + $0x3] ss:$0 sm:$0xff]  ;;  %vm8750_vm9 = vmmov %vm8746_vm4 }
 0xe5a   : > { %v4986_v4 = vld [vmem:[#allocation4 + $0x8] sm:$0xff]  ;;  %5731 = vmatpush3.bf16.msra.mxu1 %v5940_v60  ;;  %v5946_v23 = vld [vmem:[%s8749_s24] sm:$0xff]   ;;  %vm8753_vm3 = vmmov %vm8746_vm4 }
 0xe5b   : > { %v4987_v56 = vpack.c.bf16 %v4986_v4, %v4985_v61  ;;  %5736 = vmatprep.subr.bf16.mxu1 %v6032_v7  ;;  %v5457_v34 = vld [vmem:[%s8751_s21] ss:$0 sm:$0xff]  ;;  %vm8754_vm0 = vmmov %vm8753_vm3 }
 0xe5c   : > { %5747 = vmatpush3.bf16.msra.mxu0 %v5944_v22  ;;  %v5461_v10 = vld [vmem:[%s8752_s15] ss:$0 sm:$0xff]  ;;  %vm8755_vm1 = vmmov %vm8754_vm0 }
 0xe5d   : > { %5733 = vmatmul.mubr.msk.bf16.vlgmr.msra.gmra.mxu1 %vm8742_vm11, %v4987_v56  ;;  %5748 = vmatprep.subr.bf16.mxu0 %v6032_v7  ;;  %vm8756_vm7 = vmmov %vm8754_vm0 }
 0xe5e   : > { %5740 = vmatprep.mubr.msk.bf16.mxu1 %vm6033_vm10, %v6032_v7  ;;  %5737 = vmatpush3.bf16.msra.mxu1 %v5941_v32  ;;  %vm8757_vm14 = vmmov %vm8754_vm0 }
 0xe5f   : > { %5738 = vmatprep.subr.bf16.mxu1 %v6032_v7  ;;  %vm8758_vm13 = vmmov %vm8754_vm0 }
 0xe60   : > { %5749 = vmatpush3.bf16.msra.mxu0 %v5945_v48 }
 0xe61   : > { %5750 = vmatprep.subr.bf16.mxu0 %v6032_v7 }
 0xe62   : > { %5739 = vmatpush3.bf16.msra.mxu1 %v5942_v15 }
 0xe64   : > { %5751 = vmatpush3.bf16.msra.mxu0 %v5946_v23 }
 0xf1d   : > { %v5048_v0 = vpop.f32.mrf.mxu1 }
 0xf1e   : > { %v5049_v2 = vadd.f32 %v5451_v24, %v5048_v0 }
 0xf1f   : > { %v5734_v13 = vpop.f32.mrf.mxu1 }
 0xf20   : > { %v5055_v53 = vadd.f32 %v5049_v2, %v4983_v21 }
 0xf21   : > { %v5051_v58 = vpop.f32.mrf.mxu1 }
 0xf22   : > { %v5052_v36 = vadd.f32 %v5451_v24, %v5051_v58  ;;  %v5059_v40 = vsel %vm8744_vm12, %v5055_v53, 0.0 }
 0xf23   : > { %v5735_v8 = vpop.f32.mrf.mxu1  ;;  %5060 = vadd.xlane.f32.xlu0 %v5059_v40 }
 0xf24   : > { %v5056_v9 = vadd.f32 %v5052_v36, %v4984_v63 }
 0xf26   : > { %v5062_v51 = vsel %vm8745_vm5, %v5056_v9, 0.0 }
 0xf27   : > { %5063 = vadd.xlane.f32.xlu0 %v5062_v51 }
 0xfac   : > { %v5061_v43 = vpop.xlane.xlu0 %5060 }
 0xfad   : > { %v5066_v20 = vmul.f32 0.03125, %v5061_v43 }
 0xfaf   : > { %v5068_v19 = vsub.f32 %v5055_v53, %v5066_v20 }
 0xfb0   : > { %v5064_v1 = vpop.xlane.xlu0 %5063 }
 0xfb1   : > { %v5067_v17 = vmul.f32 0.03125, %v5064_v1  ;;  %v5070_v18 = vmul.f32 %v5068_v19, %v5068_v19 }
 0xfb3   : > { %v5069_v3 = vsub.f32 %v5056_v9, %v5067_v17  ;;  %v5072_v25 = vsel %vm8746_vm4, %v5070_v18, 0.0 }
 0xfb4   : > { %5073 = vadd.xlane.f32.xlu1 %v5072_v25  ;;  %v5467_v25 = vld [vmem:[%s8402_s17 + $0x4] ss:$0 sm:$0xff] }
 0xfb5   : > { %v5071_v5 = vmul.f32 %v5069_v3, %v5069_v3 }
 0xfb7   : > { %v5075_v14 = vsel %vm8747_vm8, %v5071_v5, 0.0 }
 0xfb8   : > { %5076 = vadd.xlane.f32.xlu1 %v5075_v14  ;;  %v5468_v14 = vld [vmem:[%s8402_s17 + $0x5] ss:$0 sm:$0xff] }
0x103d   : > { %v5074_v37 = vpop.xlane.xlu1 %5073 }
0x103e   : > { %v5078_v16 = vmul.f32 0.03125, %v5074_v37 }
0x1040   : > { %v5080_v54 = vadd.f32 1e-05, %v5078_v16 }
0x1041   : > { %v5077_v30 = vpop.xlane.xlu1 %5076 }
0x1042   : > { %5947 = vrsqrt.f32 %v5080_v54  ;;  %v5079_v45 = vmul.f32 0.03125, %v5077_v30 }
0x1044   : > { %v5081_v38 = vadd.f32 1e-05, %v5079_v45 }
0x1046   : > { %5949 = vrsqrt.f32 %v5081_v38 }
0x104f   : > { %v5948_v11 = vpop.eup %5947 }
0x1050   : > { %v5084_v33 = vmul.f32 %v5948_v11, %v5068_v19 }
0x1052   : > { %v5090_v57 = vmul.f32 %v5455_v44, %v5084_v33 }
0x1053   : > { %v5950_v27 = vpop.eup %5949 }
0x1054   : > { %v5085_v62 = vmul.f32 %v5950_v27, %v5069_v3  ;;  %v5096_v29 = vadd.f32 %v5456_v39, %v5090_v57 }
0x1056   : > { %v5091_v35 = vmul.f32 %v5455_v44, %v5085_v62 }
0x1058   : > { %v5097_v47 = vadd.f32 %v5456_v39, %v5091_v35 }
0x105a   : > { %v5098_v6 = vpack.c.bf16 %v5097_v47, %v5096_v29 }
0x105c   : > { %5741 = vmatmul.mubr.msk.bf16.vlgmr.msra.gmra.mxu1 %vm8750_vm9, %v5098_v6 }
0x111c   : > { %v5159_v49 = vpop.f32.mrf.mxu1 }
0x111d   : > { %v5160_v26 = vadd.f32 %v5457_v34, %v5159_v49 }
0x111e   : > { %v5742_v12 = vpop.f32.mrf.mxu1 }
0x111f   : > { %v5166_v55 = vmax.f32 %v5160_v26, 0.0 }
0x1120   : > { %v5162_v28 = vpop.f32.mrf.mxu1 }
0x1121   : > { %v5163_v52 = vadd.f32 %v5457_v34, %v5162_v28 }
0x1122   : > { %v5743_v31 = vpop.f32.mrf.mxu1 }
0x1123   : > { %v5167_v50 = vmax.f32 %v5163_v52, 0.0 }
0x1125   : > { %v5168_v46 = vpack.c.bf16 %v5167_v50, %v5166_v55 }
0x1127   : > { %5753 = vmatmul.mubr.msk.bf16.vlgmr.msra.gmra.mxu0 %vm5208_vm6, %v5168_v46 }
0x11e7   : > { %v5246_v42 = vpop.f32.mrf.mxu0 }
0x11e8   : > { %v5247_v59 = vadd.f32 %v5461_v10, %v5246_v42 }
0x11e9   : > { %v5754_v7 = vpop.f32.mrf.mxu0 }
0x11ea   : > { %v5253_v60 = vadd.f32 %v5247_v59, %v5096_v29 }
0x11eb   : > { %v5249_v61 = vpop.f32.mrf.mxu0 }
0x11ec   : > { %v5250_v4 = vadd.f32 %v5461_v10, %v5249_v61  ;;  %v5257_v56 = vsel %vm8753_vm3, %v5253_v60, 0.0 }
0x11ed   : > { %5258 = vadd.xlane.f32.xlu0 %v5257_v56  ;;  %v5755_v24 = vpop.f32.mrf.mxu0 }
0x11ee   : > { %v5254_v0 = vadd.f32 %v5250_v4, %v5097_v47 }
0x11f0   : > { %v5260_v21 = vsel %vm8754_vm0, %v5254_v0, 0.0 }
0x11f1   : > { %5261 = vadd.xlane.f32.xlu1 %v5260_v21 }
0x1276   : > { %v5259_v2 = vpop.xlane.xlu0 %5258 }
0x1277   : > { %v5263_v13 = vmul.f32 0.03125, %v5259_v2 }
0x1279   : > { %v5265_v53 = vsub.f32 %v5253_v60, %v5263_v13 }
0x127a   : > { %v5262_v58 = vpop.xlane.xlu1 %5261 }
0x127b   : > { %v5264_v63 = vmul.f32 0.03125, %v5262_v58  ;;  %v5267_v36 = vmul.f32 %v5265_v53, %v5265_v53 }
0x127d   : > { %v5266_v40 = vsub.f32 %v5254_v0, %v5264_v63  ;;  %v5269_v8 = vsel %vm8755_vm1, %v5267_v36, 0.0 }
0x127e   : > { %5270 = vadd.xlane.f32.xlu0 %v5269_v8 }
0x127f   : > { %v5268_v9 = vmul.f32 %v5266_v40, %v5266_v40 }
0x1281   : > { %v5272_v51 = vsel %vm8756_vm7, %v5268_v9, 0.0 }
0x1282   : > { %5273 = vadd.xlane.f32.xlu1 %v5272_v51 }
0x1307   : > { %v5271_v43 = vpop.xlane.xlu0 %5270 }
0x1308   : > { %v5275_v20 = vmul.f32 0.03125, %v5271_v43 }
0x130a   : > { %v5277_v19 = vadd.f32 1e-05, %v5275_v20 }
0x130b   : > { %v5274_v1 = vpop.xlane.xlu1 %5273 }
0x130c   : > { %5951 = vrsqrt.f32 %v5277_v19  ;;  %v5276_v17 = vmul.f32 0.03125, %v5274_v1 }
0x130e   : > { %v5278_v18 = vadd.f32 1e-05, %v5276_v17 }
0x1310   : > { %5953 = vrsqrt.f32 %v5278_v18 }
0x1319   : > { %v5952_v3 = vpop.eup %5951 }
0x131a   : > { %v5281_v5 = vmul.f32 %v5952_v3, %v5265_v53 }
0x131c   : > { %v5287_v32 = vmul.f32 %v5467_v25, %v5281_v5 }
0x131d   : > { %v5954_v15 = vpop.eup %5953 }
0x131e   : > { %v5293_v41 = vadd.f32 %v5468_v14, %v5287_v32  ;;  %v5282_v37 = vmul.f32 %v5954_v15, %v5266_v40 }
0x1320   : > { %5295 = vst.msk [vmem:[%s6178_s28] sm:$0xff] %vm8757_vm14, %v5293_v41  ;;  %v5288_v16 = vmul.f32 %v5467_v25, %v5282_v37 }
0x1322   : > { %v5294_v54 = vadd.f32 %v5468_v14, %v5288_v16 }
0x1324   : > { %5296 = vst.msk [vmem:[%s6178_s28 + $0x8] sm:$0xff] %vm8758_vm13, %v5294_v54 }
0x1325 PF: > { %s8759_s16 = sld [smem:[#allocation9_spill]] }
0x1326   : > { %s8760_s27 = sld [smem:[#allocation7_spill]] }
0x1327   : > { %s8761_s28 = sld [smem:[#allocation8_spill]] }
0x1328   : > { %s8762_s29 = sld [smem:[#allocation10_spill]] }
0x1329   : > { %s8763_s30 = sld [smem:[#allocation11_spill]] }
0x132b   : > { %s28_s0 = sadd.s32 1, %s8759_s16  }
0x132c   : > { %p25_p9 = scmp.ge.s32.totalorder %s28_s0, 6  }
0x132e   :  { %27 = sbr.rel (!%p25_p9) target bundleno = 10 (0xa), region = 136 }

</bundles_post_ra>
